<compile_context>
chip_gen: v7x
topology: tpu7x:2x2x1
jax: 0.10.0
libtpu: 0.0.40
codegen_flags: <defaults>
</compile_context>

<pallas_src>
import numpy as np
import jax
import jax.numpy as jnp
from jax import lax
from jax.experimental import pallas as pl
from jax.experimental.pallas import tpu as pltpu

# -----------------------------------------------------------------------------
# Static configuration
# -----------------------------------------------------------------------------
N_BATCH = 2
C_IN = 1
M_CH = 8            # m_channels
C_OUT = 2
H0 = W0 = 16        # input spatial size
BN_EPS = 1e-5

M0 = H0 * W0        # 256 lanes at level 0 (valid == padded)
M1 = 128            # level-1 lane width (valid 8*8=64, rest zero/garbage pad)
M2 = 128            # level-2 lane width (valid 4*4=16)


# -----------------------------------------------------------------------------
# In-kernel helpers (channel-major layout: activations are (C, H*W))
# -----------------------------------------------------------------------------
def _shift(x, d):
    """out[:, i] = x[:, i + d] (wrap-around; wrapped lanes are masked by caller)."""
    if d == 0:
        return x
    m = x.shape[-1]
    return pltpu.roll(x, shift=(-d) % m, axis=1)


def _border_masks(M, H, W):
    """f32 (1, M) lane masks for the four non-center tap directions."""
    idx = lax.broadcasted_iota(jnp.int32, (1, M), 1)
    wpos = jnp.bitwise_and(idx, W - 1)           # w coordinate (W is a power of 2)
    rpos = jnp.bitwise_and(idx, H * W - 1)       # h*W + w within one image
    wneg_ok = jnp.where(wpos >= 1, 1.0, 0.0)            # reading w-1 is valid
    wpos_ok = jnp.where(wpos <= W - 2, 1.0, 0.0)        # reading w+1 is valid
    hneg_ok = jnp.where(rpos >= W, 1.0, 0.0)            # reading h-1 is valid
    hpos_ok = jnp.where(rpos < (H - 1) * W, 1.0, 0.0)   # reading h+1 is valid
    return {-1: wneg_ok, 1: wpos_ok}, {-1: hneg_ok, 1: hpos_ok}


def _conv3x3(x, w_ref, b_ref, H, W):
    """3x3 / stride 1 / zero-pad 1 convolution in channel-major layout.

    x: (Cin, M) f32, w_ref: (3, 3, Cout, Cin) with BN scale pre-folded,
    b_ref: (Cout, 1).  Returns (Cout, M) f32 (bias added, no activation).
    """
    _, M = x.shape
    cout = w_ref.shape[2]
    wmask, hmask = _border_masks(M, H, W)
    acc = jnp.zeros((cout, M), jnp.float32)
    for dy in (-1, 0, 1):
        for dx in (-1, 0, 1):
            t = _shift(x, dy * W + dx)
            if dy != 0 and dx != 0:
                t = t * (hmask[dy] * wmask[dx])
            elif dy != 0:
                t = t * hmask[dy]
            elif dx != 0:
                t = t * wmask[dx]
            wt = w_ref[dy + 1, dx + 1]                        # (Cout, Cin)
            acc = acc + jnp.dot(wt, t, preferred_element_type=jnp.float32)
    return acc + b_ref[...]


def _maxpool2x2(x, d_ref, W):
    """2x2 / stride-2 max pool: max of 4 rolled copies + one decimation matmul."""
    m = jnp.maximum(jnp.maximum(x, _shift(x, 1)),
                    jnp.maximum(_shift(x, W), _shift(x, W + 1)))
    return jnp.dot(m, d_ref[...].astype(jnp.float32),
                   preferred_element_type=jnp.float32)


def _matmul(a, b):
    return jnp.dot(a, b, preferred_element_type=jnp.float32)


# -----------------------------------------------------------------------------
# The single fused UNet kernel (one grid step == one image of the batch)
# -----------------------------------------------------------------------------
def _unet_kernel(x_ref,
                 w0_ref, b0_ref, d0_ref,
                 w1_ref, b1_ref, d1_ref,
                 w2_ref, b2_ref,
                 u2_ref, uw0_ref, ub0_ref, w3_ref, b3_ref,
                 u1_ref, uw1_ref, ub1_ref, w4_ref, b4_ref,
                 lw_ref, lb_ref,
                 o_ref):
    relu = lambda v: jnp.maximum(v, 0.0)
    x = x_ref[0]                                                   # (Cin, 256)

    # ---- down path ---------------------------------------------------------
    f0 = relu(_conv3x3(x, w0_ref, b0_ref, 16, 16))                 # (8, 256)
    p0 = _maxpool2x2(f0, d0_ref, 16)                               # (8, 128)
    f1 = relu(_conv3x3(p0, w1_ref, b1_ref, 8, 8))                  # (16, 128)
    p1 = _maxpool2x2(f1, d1_ref, 8)                                # (16, 128)
    xb = relu(_conv3x3(p1, w2_ref, b2_ref, 4, 4))                  # (32, 128)

    # ---- up path -----------------------------------------------------------
    up = _matmul(xb, u2_ref[...].astype(jnp.float32))              # bilinear 2x
    up = _matmul(uw0_ref[...], up) + ub0_ref[...]                  # 1x1 conv
    x1 = relu(_conv3x3(jnp.concatenate([f1, up], axis=0),
                       w3_ref, b3_ref, 8, 8))                      # (16, 128)

    up = _matmul(x1, u1_ref[...].astype(jnp.float32))              # bilinear 2x
    up = _matmul(uw1_ref[...], up) + ub1_ref[...]                  # 1x1 conv
    x0 = relu(_conv3x3(jnp.concatenate([f0, up], axis=0),
                       w4_ref, b4_ref, 16, 16))                    # (8, 256)

    # ---- final 1x1 conv + ReLU: lane-dense (Cout, 256) store ----------------
    o_ref[0] = relu(_matmul(lw_ref[...], x0) + lb_ref[...])


# -----------------------------------------------------------------------------
# pallas_call wrapper
# -----------------------------------------------------------------------------
_IDX0 = {2: lambda i: (0, 0), 4: lambda i: (0, 0, 0, 0)}


def _const_spec(shape):
    return pl.BlockSpec(shape, _IDX0[len(shape)])


def unet_forward(x_nchw, kp):
    """x_nchw: (N, 1, 16, 16) f32.  Returns (N, 2, 16, 16) f32 (NCHW)."""
    n = x_nchw.shape[0]
    x = x_nchw.reshape(n, C_IN, M0)

    order = ("w0", "b0", "D0", "w1", "b1", "D1", "w2", "b2",
             "U2", "uw0", "ub0", "w3", "b3",
             "U1", "uw1", "ub1", "w4", "b4", "lw", "lb")
    consts = [kp[k] for k in order]

    in_specs = [pl.BlockSpec((1, C_IN, M0), lambda i: (i, 0, 0))]
    in_specs += [_const_spec(c.shape) for c in consts]

    out = pl.pallas_call(
        _unet_kernel,
        out_shape=jax.ShapeDtypeStruct((n, C_OUT, M0), jnp.float32),
        grid=(n,),
        in_specs=in_specs,
        out_specs=pl.BlockSpec((1, C_OUT, M0), lambda i: (i, 0, 0)),
        compiler_params=pltpu.CompilerParams(
            dimension_semantics=("parallel",)),   # lets v7x use both TensorCores
    )(x, *consts)
    return out.reshape(n, C_OUT, H0, W0)


# -----------------------------------------------------------------------------
# Parameters (deterministic synthetic, PyTorch layouts) and setup-time folding
# -----------------------------------------------------------------------------
def init_raw_params(key):
    ks = iter(jax.random.split(key, 64))

    def conv_w(cout, cin, k):
        return 0.1 * jax.random.normal(next(ks), (cout, cin, k, k), jnp.float32)

    def vec(c, s=0.05):
        return s * jax.random.normal(next(ks), (c,), jnp.float32)

    def bn(c):
        return dict(gamma=1.0 + vec(c), beta=vec(c), mean=vec(c),
                    var=1.0 + 0.1 * jnp.abs(jax.random.normal(next(ks), (c,), jnp.float32)))

    p = {}
    p["down0"] = dict(w=conv_w(8, 1, 3), b=vec(8), bn=bn(8))        # first DownBlock
    p["down1"] = dict(w=conv_w(16, 8, 3), b=vec(16), bn=bn(16))     # pool + conv
    p["bottom"] = dict(w=conv_w(32, 16, 3), b=vec(32), bn=bn(32))   # pool + conv
    p["up0"] = dict(uw=conv_w(16, 32, 1), ub=vec(16),
                    w=conv_w(16, 32, 3), b=vec(16), bn=bn(16))
    p["up1"] = dict(uw=conv_w(8, 16, 1), ub=vec(8),
                    w=conv_w(8, 16, 3), b=vec(8), bn=bn(8))
    p["last"] = dict(w=conv_w(2, 8, 1), b=vec(2))
    return p


def _fold_conv_bn(blk):
    # Inference-mode BN: scale folded into the weights, bias becomes a column.
    scale = blk["bn"]["gamma"] / jnp.sqrt(blk["bn"]["var"] + BN_EPS)
    w = blk["w"] * scale[:, None, None, None]
    b = (blk["b"] - blk["bn"]["mean"]) * scale + blk["bn"]["beta"]
    return jnp.transpose(w, (2, 3, 0, 1)), b[:, None]   # (3,3,Cout,Cin), (Cout,1)


def _bilinear_1d(n):
    """1-D x2 bilinear upsampling operator, align_corners=False.  Shape (2n, n)."""
    a = np.zeros((2 * n, n), np.float32)
    for j in range(n):
        a[2 * j, j] += 0.75
        a[2 * j, max(j - 1, 0)] += 0.25
        a[2 * j + 1, j] += 0.75
        a[2 * j + 1, min(j + 1, n - 1)] += 0.25
    return a


def _pool_mat(h, w, rows_pad, cols_pad):
    """Decimation matrix: fine (h*w) flattened -> coarse (h/2 * w/2), padded."""
    hc, wc = h // 2, w // 2
    d = np.zeros((rows_pad, cols_pad), np.float32)
    for i in range(hc):
        for j in range(wc):
            d[(2 * i) * w + 2 * j, i * wc + j] = 1.0
    return d


def _upsample_mat(hc, wc, rows_pad, cols_pad):
    """Bilinear x2 operator: coarse (hc*wc) flattened -> fine (2hc*2wc), padded."""
    uv = np.kron(_bilinear_1d(hc).T, _bilinear_1d(wc).T)   # (hc*wc, 4*hc*wc)
    u = np.zeros((rows_pad, cols_pad), np.float32)
    u[: uv.shape[0], : uv.shape[1]] = uv
    return u


def prepare_kernel_params(raw):
    kp = {}
    kp["w0"], kp["b0"] = _fold_conv_bn(raw["down0"])
    kp["w1"], kp["b1"] = _fold_conv_bn(raw["down1"])
    kp["w2"], kp["b2"] = _fold_conv_bn(raw["bottom"])
    kp["w3"], kp["b3"] = _fold_conv_bn(raw["up0"])
    kp["w4"], kp["b4"] = _fold_conv_bn(raw["up1"])
    kp["uw0"] = raw["up0"]["uw"].reshape(16, 32)
    kp["ub0"] = raw["up0"]["ub"][:, None]
    kp["uw1"] = raw["up1"]["uw"].reshape(8, 16)
    kp["ub1"] = raw["up1"]["ub"][:, None]
    kp["lw"] = raw["last"]["w"].reshape(C_OUT, M_CH)
    kp["lb"] = raw["last"]["b"][:, None]
    # Constant spatial operators (entries are k/16 -> exact in bf16; halves DMA).
    kp["D0"] = jnp.asarray(_pool_mat(16, 16, M0, M1), jnp.bfloat16)
    kp["D1"] = jnp.asarray(_pool_mat(8, 8, M1, M2), jnp.bfloat16)
    kp["U2"] = jnp.asarray(_upsample_mat(4, 4, M2, M1), jnp.bfloat16)
    kp["U1"] = jnp.asarray(_upsample_mat(8, 8, M1, M0), jnp.bfloat16)
    return kp


# -----------------------------------------------------------------------------
if __name__ == "__main__":
    key = jax.random.PRNGKey(0)
    k_in, k_par = jax.random.split(key)

    # PyTorch-style NCHW input: batch=2, in_channels=1, 16x16 spatial.
    x_nchw = jax.random.normal(k_in, (N_BATCH, C_IN, H0, W0), jnp.float32)

    kparams = prepare_kernel_params(init_raw_params(k_par))

    fwd = jax.jit(unet_forward)
    out = jax.block_until_ready(fwd(x_nchw, kparams))

    assert out.shape == (N_BATCH, C_OUT, H0, W0), out.shape
    assert bool(jnp.all(jnp.isfinite(out)))
    assert bool(jnp.all(out >= 0.0))   # final ReLU
    print("KERNEL_OK")
</pallas_src>

<mosaic_0001>
module attributes {stable_mosaic.version = 11 : i64} {
  func.func @_unet_kernel(%arg0: i32, %arg1: memref<1x1x256xf32, #tpu.memory_space<vmem>>, %arg2: memref<3x3x8x1xf32, #tpu.memory_space<vmem>>, %arg3: memref<8x1xf32, #tpu.memory_space<vmem>>, %arg4: memref<256x128xbf16, #tpu.memory_space<vmem>>, %arg5: memref<3x3x16x8xf32, #tpu.memory_space<vmem>>, %arg6: memref<16x1xf32, #tpu.memory_space<vmem>>, %arg7: memref<128x128xbf16, #tpu.memory_space<vmem>>, %arg8: memref<3x3x32x16xf32, #tpu.memory_space<vmem>>, %arg9: memref<32x1xf32, #tpu.memory_space<vmem>>, %arg10: memref<128x128xbf16, #tpu.memory_space<vmem>>, %arg11: memref<16x32xf32, #tpu.memory_space<vmem>>, %arg12: memref<16x1xf32, #tpu.memory_space<vmem>>, %arg13: memref<3x3x16x32xf32, #tpu.memory_space<vmem>>, %arg14: memref<16x1xf32, #tpu.memory_space<vmem>>, %arg15: memref<128x256xbf16, #tpu.memory_space<vmem>>, %arg16: memref<8x16xf32, #tpu.memory_space<vmem>>, %arg17: memref<8x1xf32, #tpu.memory_space<vmem>>, %arg18: memref<3x3x8x16xf32, #tpu.memory_space<vmem>>, %arg19: memref<8x1xf32, #tpu.memory_space<vmem>>, %arg20: memref<2x8xf32, #tpu.memory_space<vmem>>, %arg21: memref<2x1xf32, #tpu.memory_space<vmem>>, %arg22: memref<1x2x256xf32, #tpu.memory_space<vmem>>) attributes {dimension_semantics = [#tpu.dimension_semantics<parallel>], iteration_bounds = array<i64: 2>, scalar_prefetch = 0 : i64, scratch_operands = 0 : i64, tpu.core_type = #tpu.core_type<tc>, window_params = [{transform_indices = @transform_0, window_bounds = array<i64: 1, 1, 256>}, {pipeline_mode = #tpu.pipeline_mode<synchronous>, transform_indices = @transform_1, window_bounds = array<i64: 3, 3, 8, 1>}, {pipeline_mode = #tpu.pipeline_mode<synchronous>, transform_indices = @transform_2, window_bounds = array<i64: 8, 1>}, {pipeline_mode = #tpu.pipeline_mode<synchronous>, transform_indices = @transform_3, window_bounds = array<i64: 256, 128>}, {pipeline_mode = #tpu.pipeline_mode<synchronous>, transform_indices = @transform_4, window_bounds = array<i64: 3, 3, 16, 8>}, {pipeline_mode = #tpu.pipeline_mode<synchronous>, transform_indices = @transform_5, window_bounds = array<i64: 16, 1>}, {pipeline_mode = #tpu.pipeline_mode<synchronous>, transform_indices = @transform_6, window_bounds = array<i64: 128, 128>}, {pipeline_mode = #tpu.pipeline_mode<synchronous>, transform_indices = @transform_7, window_bounds = array<i64: 3, 3, 32, 16>}, {pipeline_mode = #tpu.pipeline_mode<synchronous>, transform_indices = @transform_8, window_bounds = array<i64: 32, 1>}, {pipeline_mode = #tpu.pipeline_mode<synchronous>, transform_indices = @transform_9, window_bounds = array<i64: 128, 128>}, {pipeline_mode = #tpu.pipeline_mode<synchronous>, transform_indices = @transform_10, window_bounds = array<i64: 16, 32>}, {pipeline_mode = #tpu.pipeline_mode<synchronous>, transform_indices = @transform_11, window_bounds = array<i64: 16, 1>}, {pipeline_mode = #tpu.pipeline_mode<synchronous>, transform_indices = @transform_12, window_bounds = array<i64: 3, 3, 16, 32>}, {pipeline_mode = #tpu.pipeline_mode<synchronous>, transform_indices = @transform_13, window_bounds = array<i64: 16, 1>}, {pipeline_mode = #tpu.pipeline_mode<synchronous>, transform_indices = @transform_14, window_bounds = array<i64: 128, 256>}, {pipeline_mode = #tpu.pipeline_mode<synchronous>, transform_indices = @transform_15, window_bounds = array<i64: 8, 16>}, {pipeline_mode = #tpu.pipeline_mode<synchronous>, transform_indices = @transform_16, window_bounds = array<i64: 8, 1>}, {pipeline_mode = #tpu.pipeline_mode<synchronous>, transform_indices = @transform_17, window_bounds = array<i64: 3, 3, 8, 16>}, {pipeline_mode = #tpu.pipeline_mode<synchronous>, transform_indices = @transform_18, window_bounds = array<i64: 8, 1>}, {pipeline_mode = #tpu.pipeline_mode<synchronous>, transform_indices = @transform_19, window_bounds = array<i64: 2, 8>}, {pipeline_mode = #tpu.pipeline_mode<synchronous>, transform_indices = @transform_20, window_bounds = array<i64: 2, 1>}, {transform_indices = @transform_21, window_bounds = array<i64: 1, 2, 256>}]} {
    %c0 = arith.constant 0 : index
    %c0_0 = arith.constant 0 : index
    %c0_1 = arith.constant 0 : index
    %0 = vector.load %arg1[%c0, %c0_0, %c0_1] : memref<1x1x256xf32, #tpu.memory_space<vmem>>, vector<1x1x256xf32>
    %1 = vector.shape_cast %0 : vector<1x1x256xf32> to vector<1x256xf32>
    %2 = tpu.iota {dimensions = array<i32: 1>} : vector<1x256xi32>
    %c15_i32 = arith.constant 15 : i32
    %3 = vector.broadcast %c15_i32 : i32 to vector<1x256xi32>
    %4 = arith.andi %2, %3 : vector<1x256xi32>
    %c255_i32 = arith.constant 255 : i32
    %5 = vector.broadcast %c255_i32 : i32 to vector<1x256xi32>
    %6 = arith.andi %2, %5 : vector<1x256xi32>
    %c1_i32 = arith.constant 1 : i32
    %7 = vector.broadcast %c1_i32 : i32 to vector<1x256xi32>
    %8 = arith.cmpi sge, %4, %7 : vector<1x256xi32>
    %cst = arith.constant 1.000000e+00 : f32
    %cst_2 = arith.constant 0.000000e+00 : f32
    %9 = vector.broadcast %cst : f32 to vector<1x256xf32>
    %10 = vector.broadcast %cst_2 : f32 to vector<1x256xf32>
    %11 = arith.select %8, %9, %10 : vector<1x256xi1>, vector<1x256xf32>
    %c14_i32 = arith.constant 14 : i32
    %12 = vector.broadcast %c14_i32 : i32 to vector<1x256xi32>
    %13 = arith.cmpi sle, %4, %12 : vector<1x256xi32>
    %cst_3 = arith.constant 1.000000e+00 : f32
    %cst_4 = arith.constant 0.000000e+00 : f32
    %14 = vector.broadcast %cst_3 : f32 to vector<1x256xf32>
    %15 = vector.broadcast %cst_4 : f32 to vector<1x256xf32>
    %16 = arith.select %13, %14, %15 : vector<1x256xi1>, vector<1x256xf32>
    %c16_i32 = arith.constant 16 : i32
    %17 = vector.broadcast %c16_i32 : i32 to vector<1x256xi32>
    %18 = arith.cmpi sge, %6, %17 : vector<1x256xi32>
    %cst_5 = arith.constant 1.000000e+00 : f32
    %cst_6 = arith.constant 0.000000e+00 : f32
    %19 = vector.broadcast %cst_5 : f32 to vector<1x256xf32>
    %20 = vector.broadcast %cst_6 : f32 to vector<1x256xf32>
    %21 = arith.select %18, %19, %20 : vector<1x256xi1>, vector<1x256xf32>
    %c240_i32 = arith.constant 240 : i32
    %22 = vector.broadcast %c240_i32 : i32 to vector<1x256xi32>
    %23 = arith.cmpi slt, %6, %22 : vector<1x256xi32>
    %cst_7 = arith.constant 1.000000e+00 : f32
    %cst_8 = arith.constant 0.000000e+00 : f32
    %24 = vector.broadcast %cst_7 : f32 to vector<1x256xf32>
    %25 = vector.broadcast %cst_8 : f32 to vector<1x256xf32>
    %26 = arith.select %23, %24, %25 : vector<1x256xi1>, vector<1x256xf32>
    %cst_9 = arith.constant 0.000000e+00 : f32
    %27 = vector.broadcast %cst_9 : f32 to vector<8x256xf32>
    %c17_i32 = arith.constant 17 : i32
    %28 = tpu.dynamic_rotate %1 by %c17_i32 dim 1 : vector<1x256xf32>, i32 -> vector<1x256xf32>
    %29 = arith.mulf %21, %11 : vector<1x256xf32>
    %30 = arith.mulf %28, %29 : vector<1x256xf32>
    %c0_10 = arith.constant 0 : index
    %c0_11 = arith.constant 0 : index
    %c0_12 = arith.constant 0 : index
    %c0_13 = arith.constant 0 : index
    %31 = vector.load %arg2[%c0_10, %c0_11, %c0_12, %c0_13] : memref<3x3x8x1xf32, #tpu.memory_space<vmem>>, vector<1x1x8x1xf32>
    %32 = vector.shape_cast %31 : vector<1x1x8x1xf32> to vector<8x1xf32>
    %cst_14 = arith.constant dense<0.000000e+00> : vector<8x256xf32>
    %33 = tpu.matmul %32, %30, %cst_14 {dimension_numbers = #tpu.dot_dimension_numbers<[1], [0], [0], [1], [0, 0, 1, 1], [], []>} : vector<8x1xf32>, vector<1x256xf32>, vector<8x256xf32> -> vector<8x256xf32>
    %34 = arith.addf %27, %33 : vector<8x256xf32>
    %c16_i32_15 = arith.constant 16 : i32
    %35 = tpu.dynamic_rotate %1 by %c16_i32_15 dim 1 : vector<1x256xf32>, i32 -> vector<1x256xf32>
    %36 = arith.mulf %35, %21 : vector<1x256xf32>
    %c0_16 = arith.constant 0 : index
    %c1 = arith.constant 1 : index
    %c0_17 = arith.constant 0 : index
    %c0_18 = arith.constant 0 : index
    %37 = vector.load %arg2[%c0_16, %c1, %c0_17, %c0_18] : memref<3x3x8x1xf32, #tpu.memory_space<vmem>>, vector<1x1x8x1xf32>
    %38 = vector.shape_cast %37 : vector<1x1x8x1xf32> to vector<8x1xf32>
    %cst_19 = arith.constant dense<0.000000e+00> : vector<8x256xf32>
    %39 = tpu.matmul %38, %36, %cst_19 {dimension_numbers = #tpu.dot_dimension_numbers<[1], [0], [0], [1], [0, 0, 1, 1], [], []>} : vector<8x1xf32>, vector<1x256xf32>, vector<8x256xf32> -> vector<8x256xf32>
    %40 = arith.addf %34, %39 : vector<8x256xf32>
    %c15_i32_20 = arith.constant 15 : i32
    %41 = tpu.dynamic_rotate %1 by %c15_i32_20 dim 1 : vector<1x256xf32>, i32 -> vector<1x256xf32>
    %42 = arith.mulf %21, %16 : vector<1x256xf32>
    %43 = arith.mulf %41, %42 : vector<1x256xf32>
    %c0_21 = arith.constant 0 : index
    %c2 = arith.constant 2 : index
    %c0_22 = arith.constant 0 : index
    %c0_23 = arith.constant 0 : index
    %44 = vector.load %arg2[%c0_21, %c2, %c0_22, %c0_23] : memref<3x3x8x1xf32, #tpu.memory_space<vmem>>, vector<1x1x8x1xf32>
    %45 = vector.shape_cast %44 : vector<1x1x8x1xf32> to vector<8x1xf32>
    %cst_24 = arith.constant dense<0.000000e+00> : vector<8x256xf32>
    %46 = tpu.matmul %45, %43, %cst_24 {dimension_numbers = #tpu.dot_dimension_numbers<[1], [0], [0], [1], [0, 0, 1, 1], [], []>} : vector<8x1xf32>, vector<1x256xf32>, vector<8x256xf32> -> vector<8x256xf32>
    %47 = arith.addf %40, %46 : vector<8x256xf32>
    %c1_i32_25 = arith.constant 1 : i32
    %48 = tpu.dynamic_rotate %1 by %c1_i32_25 dim 1 : vector<1x256xf32>, i32 -> vector<1x256xf32>
    %49 = arith.mulf %48, %11 : vector<1x256xf32>
    %c1_26 = arith.constant 1 : index
    %c0_27 = arith.constant 0 : index
    %c0_28 = arith.constant 0 : index
    %c0_29 = arith.constant 0 : index
    %50 = vector.load %arg2[%c1_26, %c0_27, %c0_28, %c0_29] : memref<3x3x8x1xf32, #tpu.memory_space<vmem>>, vector<1x1x8x1xf32>
    %51 = vector.shape_cast %50 : vector<1x1x8x1xf32> to vector<8x1xf32>
    %cst_30 = arith.constant dense<0.000000e+00> : vector<8x256xf32>
    %52 = tpu.matmul %51, %49, %cst_30 {dimension_numbers = #tpu.dot_dimension_numbers<[1], [0], [0], [1], [0, 0, 1, 1], [], []>} : vector<8x1xf32>, vector<1x256xf32>, vector<8x256xf32> -> vector<8x256xf32>
    %53 = arith.addf %47, %52 : vector<8x256xf32>
    %c1_31 = arith.constant 1 : index
    %c1_32 = arith.constant 1 : index
    %c0_33 = arith.constant 0 : index
    %c0_34 = arith.constant 0 : index
    %54 = vector.load %arg2[%c1_31, %c1_32, %c0_33, %c0_34] : memref<3x3x8x1xf32, #tpu.memory_space<vmem>>, vector<1x1x8x1xf32>
    %55 = vector.shape_cast %54 : vector<1x1x8x1xf32> to vector<8x1xf32>
    %cst_35 = arith.constant dense<0.000000e+00> : vector<8x256xf32>
    %56 = tpu.matmul %55, %1, %cst_35 {dimension_numbers = #tpu.dot_dimension_numbers<[1], [0], [0], [1], [0, 0, 1, 1], [], []>} : vector<8x1xf32>, vector<1x256xf32>, vector<8x256xf32> -> vector<8x256xf32>
    %57 = arith.addf %53, %56 : vector<8x256xf32>
    %c255_i32_36 = arith.constant 255 : i32
    %58 = tpu.dynamic_rotate %1 by %c255_i32_36 dim 1 : vector<1x256xf32>, i32 -> vector<1x256xf32>
    %59 = arith.mulf %58, %16 : vector<1x256xf32>
    %c1_37 = arith.constant 1 : index
    %c2_38 = arith.constant 2 : index
    %c0_39 = arith.constant 0 : index
    %c0_40 = arith.constant 0 : index
    %60 = vector.load %arg2[%c1_37, %c2_38, %c0_39, %c0_40] : memref<3x3x8x1xf32, #tpu.memory_space<vmem>>, vector<1x1x8x1xf32>
    %61 = vector.shape_cast %60 : vector<1x1x8x1xf32> to vector<8x1xf32>
    %cst_41 = arith.constant dense<0.000000e+00> : vector<8x256xf32>
    %62 = tpu.matmul %61, %59, %cst_41 {dimension_numbers = #tpu.dot_dimension_numbers<[1], [0], [0], [1], [0, 0, 1, 1], [], []>} : vector<8x1xf32>, vector<1x256xf32>, vector<8x256xf32> -> vector<8x256xf32>
    %63 = arith.addf %57, %62 : vector<8x256xf32>
    %c241_i32 = arith.constant 241 : i32
    %64 = tpu.dynamic_rotate %1 by %c241_i32 dim 1 : vector<1x256xf32>, i32 -> vector<1x256xf32>
    %65 = arith.mulf %26, %11 : vector<1x256xf32>
    %66 = arith.mulf %64, %65 : vector<1x256xf32>
    %c2_42 = arith.constant 2 : index
    %c0_43 = arith.constant 0 : index
    %c0_44 = arith.constant 0 : index
    %c0_45 = arith.constant 0 : index
    %67 = vector.load %arg2[%c2_42, %c0_43, %c0_44, %c0_45] : memref<3x3x8x1xf32, #tpu.memory_space<vmem>>, vector<1x1x8x1xf32>
    %68 = vector.shape_cast %67 : vector<1x1x8x1xf32> to vector<8x1xf32>
    %cst_46 = arith.constant dense<0.000000e+00> : vector<8x256xf32>
    %69 = tpu.matmul %68, %66, %cst_46 {dimension_numbers = #tpu.dot_dimension_numbers<[1], [0], [0], [1], [0, 0, 1, 1], [], []>} : vector<8x1xf32>, vector<1x256xf32>, vector<8x256xf32> -> vector<8x256xf32>
    %70 = arith.addf %63, %69 : vector<8x256xf32>
    %c240_i32_47 = arith.constant 240 : i32
    %71 = tpu.dynamic_rotate %1 by %c240_i32_47 dim 1 : vector<1x256xf32>, i32 -> vector<1x256xf32>
    %72 = arith.mulf %71, %26 : vector<1x256xf32>
    %c2_48 = arith.constant 2 : index
    %c1_49 = arith.constant 1 : index
    %c0_50 = arith.constant 0 : index
    %c0_51 = arith.constant 0 : index
    %73 = vector.load %arg2[%c2_48, %c1_49, %c0_50, %c0_51] : memref<3x3x8x1xf32, #tpu.memory_space<vmem>>, vector<1x1x8x1xf32>
    %74 = vector.shape_cast %73 : vector<1x1x8x1xf32> to vector<8x1xf32>
    %cst_52 = arith.constant dense<0.000000e+00> : vector<8x256xf32>
    %75 = tpu.matmul %74, %72, %cst_52 {dimension_numbers = #tpu.dot_dimension_numbers<[1], [0], [0], [1], [0, 0, 1, 1], [], []>} : vector<8x1xf32>, vector<1x256xf32>, vector<8x256xf32> -> vector<8x256xf32>
    %76 = arith.addf %70, %75 : vector<8x256xf32>
    %c239_i32 = arith.constant 239 : i32
    %77 = tpu.dynamic_rotate %1 by %c239_i32 dim 1 : vector<1x256xf32>, i32 -> vector<1x256xf32>
    %78 = arith.mulf %26, %16 : vector<1x256xf32>
    %79 = arith.mulf %77, %78 : vector<1x256xf32>
    %c2_53 = arith.constant 2 : index
    %c2_54 = arith.constant 2 : index
    %c0_55 = arith.constant 0 : index
    %c0_56 = arith.constant 0 : index
    %80 = vector.load %arg2[%c2_53, %c2_54, %c0_55, %c0_56] : memref<3x3x8x1xf32, #tpu.memory_space<vmem>>, vector<1x1x8x1xf32>
    %81 = vector.shape_cast %80 : vector<1x1x8x1xf32> to vector<8x1xf32>
    %cst_57 = arith.constant dense<0.000000e+00> : vector<8x256xf32>
    %82 = tpu.matmul %81, %79, %cst_57 {dimension_numbers = #tpu.dot_dimension_numbers<[1], [0], [0], [1], [0, 0, 1, 1], [], []>} : vector<8x1xf32>, vector<1x256xf32>, vector<8x256xf32> -> vector<8x256xf32>
    %83 = arith.addf %76, %82 : vector<8x256xf32>
    %c0_58 = arith.constant 0 : index
    %c0_59 = arith.constant 0 : index
    %84 = vector.load %arg3[%c0_58, %c0_59] : memref<8x1xf32, #tpu.memory_space<vmem>>, vector<8x1xf32>
    %85 = vector.broadcast %84 : vector<8x1xf32> to vector<8x256xf32>
    %86 = arith.addf %83, %85 : vector<8x256xf32>
    %cst_60 = arith.constant 0.000000e+00 : f32
    %87 = vector.broadcast %cst_60 : f32 to vector<8x256xf32>
    %88 = arith.maximumf %86, %87 : vector<8x256xf32>
    %c255_i32_61 = arith.constant 255 : i32
    %89 = tpu.dynamic_rotate %88 by %c255_i32_61 dim 1 : vector<8x256xf32>, i32 -> vector<8x256xf32>
    %90 = arith.maximumf %88, %89 : vector<8x256xf32>
    %c240_i32_62 = arith.constant 240 : i32
    %91 = tpu.dynamic_rotate %88 by %c240_i32_62 dim 1 : vector<8x256xf32>, i32 -> vector<8x256xf32>
    %c239_i32_63 = arith.constant 239 : i32
    %92 = tpu.dynamic_rotate %88 by %c239_i32_63 dim 1 : vector<8x256xf32>, i32 -> vector<8x256xf32>
    %93 = arith.maximumf %91, %92 : vector<8x256xf32>
    %94 = arith.maximumf %90, %93 : vector<8x256xf32>
    %c0_64 = arith.constant 0 : index
    %c0_65 = arith.constant 0 : index
    %95 = vector.load %arg4[%c0_64, %c0_65] : memref<256x128xbf16, #tpu.memory_space<vmem>>, vector<256x128xbf16>
    %96 = arith.extf %95 : vector<256x128xbf16> to vector<256x128xf32>
    %cst_66 = arith.constant dense<0.000000e+00> : vector<8x128xf32>
    %97 = tpu.matmul %94, %96, %cst_66 {dimension_numbers = #tpu.dot_dimension_numbers<[1], [0], [0], [1], [0, 0, 1, 1], [], []>} : vector<8x256xf32>, vector<256x128xf32>, vector<8x128xf32> -> vector<8x128xf32>
    %98 = tpu.iota {dimensions = array<i32: 1>} : vector<1x128xi32>
    %c7_i32 = arith.constant 7 : i32
    %99 = vector.broadcast %c7_i32 : i32 to vector<1x128xi32>
    %100 = arith.andi %98, %99 : vector<1x128xi32>
    %c63_i32 = arith.constant 63 : i32
    %101 = vector.broadcast %c63_i32 : i32 to vector<1x128xi32>
    %102 = arith.andi %98, %101 : vector<1x128xi32>
    %c1_i32_67 = arith.constant 1 : i32
    %103 = vector.broadcast %c1_i32_67 : i32 to vector<1x128xi32>
    %104 = arith.cmpi sge, %100, %103 : vector<1x128xi32>
    %cst_68 = arith.constant 1.000000e+00 : f32
    %cst_69 = arith.constant 0.000000e+00 : f32
    %105 = vector.broadcast %cst_68 : f32 to vector<1x128xf32>
    %106 = vector.broadcast %cst_69 : f32 to vector<1x128xf32>
    %107 = arith.select %104, %105, %106 : vector<1x128xi1>, vector<1x128xf32>
    %c6_i32 = arith.constant 6 : i32
    %108 = vector.broadcast %c6_i32 : i32 to vector<1x128xi32>
    %109 = arith.cmpi sle, %100, %108 : vector<1x128xi32>
    %cst_70 = arith.constant 1.000000e+00 : f32
    %cst_71 = arith.constant 0.000000e+00 : f32
    %110 = vector.broadcast %cst_70 : f32 to vector<1x128xf32>
    %111 = vector.broadcast %cst_71 : f32 to vector<1x128xf32>
    %112 = arith.select %109, %110, %111 : vector<1x128xi1>, vector<1x128xf32>
    %c8_i32 = arith.constant 8 : i32
    %113 = vector.broadcast %c8_i32 : i32 to vector<1x128xi32>
    %114 = arith.cmpi sge, %102, %113 : vector<1x128xi32>
    %cst_72 = arith.constant 1.000000e+00 : f32
    %cst_73 = arith.constant 0.000000e+00 : f32
    %115 = vector.broadcast %cst_72 : f32 to vector<1x128xf32>
    %116 = vector.broadcast %cst_73 : f32 to vector<1x128xf32>
    %117 = arith.select %114, %115, %116 : vector<1x128xi1>, vector<1x128xf32>
    %c56_i32 = arith.constant 56 : i32
    %118 = vector.broadcast %c56_i32 : i32 to vector<1x128xi32>
    %119 = arith.cmpi slt, %102, %118 : vector<1x128xi32>
    %cst_74 = arith.constant 1.000000e+00 : f32
    %cst_75 = arith.constant 0.000000e+00 : f32
    %120 = vector.broadcast %cst_74 : f32 to vector<1x128xf32>
    %121 = vector.broadcast %cst_75 : f32 to vector<1x128xf32>
    %122 = arith.select %119, %120, %121 : vector<1x128xi1>, vector<1x128xf32>
    %cst_76 = arith.constant 0.000000e+00 : f32
    %123 = vector.broadcast %cst_76 : f32 to vector<16x128xf32>
    %c9_i32 = arith.constant 9 : i32
    %124 = tpu.dynamic_rotate %97 by %c9_i32 dim 1 : vector<8x128xf32>, i32 -> vector<8x128xf32>
    %125 = arith.mulf %117, %107 : vector<1x128xf32>
    %126 = vector.broadcast %125 : vector<1x128xf32> to vector<8x128xf32>
    %127 = arith.mulf %124, %126 : vector<8x128xf32>
    %c0_77 = arith.constant 0 : index
    %c0_78 = arith.constant 0 : index
    %c0_79 = arith.constant 0 : index
    %c0_80 = arith.constant 0 : index
    %128 = vector.load %arg5[%c0_77, %c0_78, %c0_79, %c0_80] : memref<3x3x16x8xf32, #tpu.memory_space<vmem>>, vector<1x1x16x8xf32>
    %129 = vector.shape_cast %128 : vector<1x1x16x8xf32> to vector<16x8xf32>
    %cst_81 = arith.constant dense<0.000000e+00> : vector<16x128xf32>
    %130 = tpu.matmul %129, %127, %cst_81 {dimension_numbers = #tpu.dot_dimension_numbers<[1], [0], [0], [1], [0, 0, 1, 1], [], []>} : vector<16x8xf32>, vector<8x128xf32>, vector<16x128xf32> -> vector<16x128xf32>
    %131 = arith.addf %123, %130 : vector<16x128xf32>
    %c8_i32_82 = arith.constant 8 : i32
    %132 = tpu.dynamic_rotate %97 by %c8_i32_82 dim 1 : vector<8x128xf32>, i32 -> vector<8x128xf32>
    %133 = vector.broadcast %117 : vector<1x128xf32> to vector<8x128xf32>
    %134 = arith.mulf %132, %133 : vector<8x128xf32>
    %c0_83 = arith.constant 0 : index
    %c1_84 = arith.constant 1 : index
    %c0_85 = arith.constant 0 : index
    %c0_86 = arith.constant 0 : index
    %135 = vector.load %arg5[%c0_83, %c1_84, %c0_85, %c0_86] : memref<3x3x16x8xf32, #tpu.memory_space<vmem>>, vector<1x1x16x8xf32>
    %136 = vector.shape_cast %135 : vector<1x1x16x8xf32> to vector<16x8xf32>
    %cst_87 = arith.constant dense<0.000000e+00> : vector<16x128xf32>
    %137 = tpu.matmul %136, %134, %cst_87 {dimension_numbers = #tpu.dot_dimension_numbers<[1], [0], [0], [1], [0, 0, 1, 1], [], []>} : vector<16x8xf32>, vector<8x128xf32>, vector<16x128xf32> -> vector<16x128xf32>
    %138 = arith.addf %131, %137 : vector<16x128xf32>
    %c7_i32_88 = arith.constant 7 : i32
    %139 = tpu.dynamic_rotate %97 by %c7_i32_88 dim 1 : vector<8x128xf32>, i32 -> vector<8x128xf32>
    %140 = arith.mulf %117, %112 : vector<1x128xf32>
    %141 = vector.broadcast %140 : vector<1x128xf32> to vector<8x128xf32>
    %142 = arith.mulf %139, %141 : vector<8x128xf32>
    %c0_89 = arith.constant 0 : index
    %c2_90 = arith.constant 2 : index
    %c0_91 = arith.constant 0 : index
    %c0_92 = arith.constant 0 : index
    %143 = vector.load %arg5[%c0_89, %c2_90, %c0_91, %c0_92] : memref<3x3x16x8xf32, #tpu.memory_space<vmem>>, vector<1x1x16x8xf32>
    %144 = vector.shape_cast %143 : vector<1x1x16x8xf32> to vector<16x8xf32>
    %cst_93 = arith.constant dense<0.000000e+00> : vector<16x128xf32>
    %145 = tpu.matmul %144, %142, %cst_93 {dimension_numbers = #tpu.dot_dimension_numbers<[1], [0], [0], [1], [0, 0, 1, 1], [], []>} : vector<16x8xf32>, vector<8x128xf32>, vector<16x128xf32> -> vector<16x128xf32>
    %146 = arith.addf %138, %145 : vector<16x128xf32>
    %c1_i32_94 = arith.constant 1 : i32
    %147 = tpu.dynamic_rotate %97 by %c1_i32_94 dim 1 : vector<8x128xf32>, i32 -> vector<8x128xf32>
    %148 = vector.broadcast %107 : vector<1x128xf32> to vector<8x128xf32>
    %149 = arith.mulf %147, %148 : vector<8x128xf32>
    %c1_95 = arith.constant 1 : index
    %c0_96 = arith.constant 0 : index
    %c0_97 = arith.constant 0 : index
    %c0_98 = arith.constant 0 : index
    %150 = vector.load %arg5[%c1_95, %c0_96, %c0_97, %c0_98] : memref<3x3x16x8xf32, #tpu.memory_space<vmem>>, vector<1x1x16x8xf32>
    %151 = vector.shape_cast %150 : vector<1x1x16x8xf32> to vector<16x8xf32>
    %cst_99 = arith.constant dense<0.000000e+00> : vector<16x128xf32>
    %152 = tpu.matmul %151, %149, %cst_99 {dimension_numbers = #tpu.dot_dimension_numbers<[1], [0], [0], [1], [0, 0, 1, 1], [], []>} : vector<16x8xf32>, vector<8x128xf32>, vector<16x128xf32> -> vector<16x128xf32>
    %153 = arith.addf %146, %152 : vector<16x128xf32>
    %c1_100 = arith.constant 1 : index
    %c1_101 = arith.constant 1 : index
    %c0_102 = arith.constant 0 : index
    %c0_103 = arith.constant 0 : index
    %154 = vector.load %arg5[%c1_100, %c1_101, %c0_102, %c0_103] : memref<3x3x16x8xf32, #tpu.memory_space<vmem>>, vector<1x1x16x8xf32>
    %155 = vector.shape_cast %154 : vector<1x1x16x8xf32> to vector<16x8xf32>
    %cst_104 = arith.constant dense<0.000000e+00> : vector<16x128xf32>
    %156 = tpu.matmul %155, %97, %cst_104 {dimension_numbers = #tpu.dot_dimension_numbers<[1], [0], [0], [1], [0, 0, 1, 1], [], []>} : vector<16x8xf32>, vector<8x128xf32>, vector<16x128xf32> -> vector<16x128xf32>
    %157 = arith.addf %153, %156 : vector<16x128xf32>
    %c127_i32 = arith.constant 127 : i32
    %158 = tpu.dynamic_rotate %97 by %c127_i32 dim 1 : vector<8x128xf32>, i32 -> vector<8x128xf32>
    %159 = vector.broadcast %112 : vector<1x128xf32> to vector<8x128xf32>
    %160 = arith.mulf %158, %159 : vector<8x128xf32>
    %c1_105 = arith.constant 1 : index
    %c2_106 = arith.constant 2 : index
    %c0_107 = arith.constant 0 : index
    %c0_108 = arith.constant 0 : index
    %161 = vector.load %arg5[%c1_105, %c2_106, %c0_107, %c0_108] : memref<3x3x16x8xf32, #tpu.memory_space<vmem>>, vector<1x1x16x8xf32>
    %162 = vector.shape_cast %161 : vector<1x1x16x8xf32> to vector<16x8xf32>
    %cst_109 = arith.constant dense<0.000000e+00> : vector<16x128xf32>
    %163 = tpu.matmul %162, %160, %cst_109 {dimension_numbers = #tpu.dot_dimension_numbers<[1], [0], [0], [1], [0, 0, 1, 1], [], []>} : vector<16x8xf32>, vector<8x128xf32>, vector<16x128xf32> -> vector<16x128xf32>
    %164 = arith.addf %157, %163 : vector<16x128xf32>
    %c121_i32 = arith.constant 121 : i32
    %165 = tpu.dynamic_rotate %97 by %c121_i32 dim 1 : vector<8x128xf32>, i32 -> vector<8x128xf32>
    %166 = arith.mulf %122, %107 : vector<1x128xf32>
    %167 = vector.broadcast %166 : vector<1x128xf32> to vector<8x128xf32>
    %168 = arith.mulf %165, %167 : vector<8x128xf32>
    %c2_110 = arith.constant 2 : index
    %c0_111 = arith.constant 0 : index
    %c0_112 = arith.constant 0 : index
    %c0_113 = arith.constant 0 : index
    %169 = vector.load %arg5[%c2_110, %c0_111, %c0_112, %c0_113] : memref<3x3x16x8xf32, #tpu.memory_space<vmem>>, vector<1x1x16x8xf32>
    %170 = vector.shape_cast %169 : vector<1x1x16x8xf32> to vector<16x8xf32>
    %cst_114 = arith.constant dense<0.000000e+00> : vector<16x128xf32>
    %171 = tpu.matmul %170, %168, %cst_114 {dimension_numbers = #tpu.dot_dimension_numbers<[1], [0], [0], [1], [0, 0, 1, 1], [], []>} : vector<16x8xf32>, vector<8x128xf32>, vector<16x128xf32> -> vector<16x128xf32>
    %172 = arith.addf %164, %171 : vector<16x128xf32>
    %c120_i32 = arith.constant 120 : i32
    %173 = tpu.dynamic_rotate %97 by %c120_i32 dim 1 : vector<8x128xf32>, i32 -> vector<8x128xf32>
    %174 = vector.broadcast %122 : vector<1x128xf32> to vector<8x128xf32>
    %175 = arith.mulf %173, %174 : vector<8x128xf32>
    %c2_115 = arith.constant 2 : index
    %c1_116 = arith.constant 1 : index
    %c0_117 = arith.constant 0 : index
    %c0_118 = arith.constant 0 : index
    %176 = vector.load %arg5[%c2_115, %c1_116, %c0_117, %c0_118] : memref<3x3x16x8xf32, #tpu.memory_space<vmem>>, vector<1x1x16x8xf32>
    %177 = vector.shape_cast %176 : vector<1x1x16x8xf32> to vector<16x8xf32>
    %cst_119 = arith.constant dense<0.000000e+00> : vector<16x128xf32>
    %178 = tpu.matmul %177, %175, %cst_119 {dimension_numbers = #tpu.dot_dimension_numbers<[1], [0], [0], [1], [0, 0, 1, 1], [], []>} : vector<16x8xf32>, vector<8x128xf32>, vector<16x128xf32> -> vector<16x128xf32>
    %179 = arith.addf %172, %178 : vector<16x128xf32>
    %c119_i32 = arith.constant 119 : i32
    %180 = tpu.dynamic_rotate %97 by %c119_i32 dim 1 : vector<8x128xf32>, i32 -> vector<8x128xf32>
    %181 = arith.mulf %122, %112 : vector<1x128xf32>
    %182 = vector.broadcast %181 : vector<1x128xf32> to vector<8x128xf32>
    %183 = arith.mulf %180, %182 : vector<8x128xf32>
    %c2_120 = arith.constant 2 : index
    %c2_121 = arith.constant 2 : index
    %c0_122 = arith.constant 0 : index
    %c0_123 = arith.constant 0 : index
    %184 = vector.load %arg5[%c2_120, %c2_121, %c0_122, %c0_123] : memref<3x3x16x8xf32, #tpu.memory_space<vmem>>, vector<1x1x16x8xf32>
    %185 = vector.shape_cast %184 : vector<1x1x16x8xf32> to vector<16x8xf32>
    %cst_124 = arith.constant dense<0.000000e+00> : vector<16x128xf32>
    %186 = tpu.matmul %185, %183, %cst_124 {dimension_numbers = #tpu.dot_dimension_numbers<[1], [0], [0], [1], [0, 0, 1, 1], [], []>} : vector<16x8xf32>, vector<8x128xf32>, vector<16x128xf32> -> vector<16x128xf32>
    %187 = arith.addf %179, %186 : vector<16x128xf32>
    %c0_125 = arith.constant 0 : index
    %c0_126 = arith.constant 0 : index
    %188 = vector.load %arg6[%c0_125, %c0_126] : memref<16x1xf32, #tpu.memory_space<vmem>>, vector<16x1xf32>
    %189 = vector.broadcast %188 : vector<16x1xf32> to vector<16x128xf32>
    %190 = arith.addf %187, %189 : vector<16x128xf32>
    %cst_127 = arith.constant 0.000000e+00 : f32
    %191 = vector.broadcast %cst_127 : f32 to vector<16x128xf32>
    %192 = arith.maximumf %190, %191 : vector<16x128xf32>
    %c127_i32_128 = arith.constant 127 : i32
    %193 = tpu.dynamic_rotate %192 by %c127_i32_128 dim 1 : vector<16x128xf32>, i32 -> vector<16x128xf32>
    %194 = arith.maximumf %192, %193 : vector<16x128xf32>
    %c120_i32_129 = arith.constant 120 : i32
    %195 = tpu.dynamic_rotate %192 by %c120_i32_129 dim 1 : vector<16x128xf32>, i32 -> vector<16x128xf32>
    %c119_i32_130 = arith.constant 119 : i32
    %196 = tpu.dynamic_rotate %192 by %c119_i32_130 dim 1 : vector<16x128xf32>, i32 -> vector<16x128xf32>
    %197 = arith.maximumf %195, %196 : vector<16x128xf32>
    %198 = arith.maximumf %194, %197 : vector<16x128xf32>
    %c0_131 = arith.constant 0 : index
    %c0_132 = arith.constant 0 : index
    %199 = vector.load %arg7[%c0_131, %c0_132] : memref<128x128xbf16, #tpu.memory_space<vmem>>, vector<128x128xbf16>
    %200 = arith.extf %199 : vector<128x128xbf16> to vector<128x128xf32>
    %cst_133 = arith.constant dense<0.000000e+00> : vector<16x128xf32>
    %201 = tpu.matmul %198, %200, %cst_133 {dimension_numbers = #tpu.dot_dimension_numbers<[1], [0], [0], [1], [0, 0, 1, 1], [], []>} : vector<16x128xf32>, vector<128x128xf32>, vector<16x128xf32> -> vector<16x128xf32>
    %202 = tpu.iota {dimensions = array<i32: 1>} : vector<1x128xi32>
    %c3_i32 = arith.constant 3 : i32
    %203 = vector.broadcast %c3_i32 : i32 to vector<1x128xi32>
    %204 = arith.andi %202, %203 : vector<1x128xi32>
    %c15_i32_134 = arith.constant 15 : i32
    %205 = vector.broadcast %c15_i32_134 : i32 to vector<1x128xi32>
    %206 = arith.andi %202, %205 : vector<1x128xi32>
    %c1_i32_135 = arith.constant 1 : i32
    %207 = vector.broadcast %c1_i32_135 : i32 to vector<1x128xi32>
    %208 = arith.cmpi sge, %204, %207 : vector<1x128xi32>
    %cst_136 = arith.constant 1.000000e+00 : f32
    %cst_137 = arith.constant 0.000000e+00 : f32
    %209 = vector.broadcast %cst_136 : f32 to vector<1x128xf32>
    %210 = vector.broadcast %cst_137 : f32 to vector<1x128xf32>
    %211 = arith.select %208, %209, %210 : vector<1x128xi1>, vector<1x128xf32>
    %c2_i32 = arith.constant 2 : i32
    %212 = vector.broadcast %c2_i32 : i32 to vector<1x128xi32>
    %213 = arith.cmpi sle, %204, %212 : vector<1x128xi32>
    %cst_138 = arith.constant 1.000000e+00 : f32
    %cst_139 = arith.constant 0.000000e+00 : f32
    %214 = vector.broadcast %cst_138 : f32 to vector<1x128xf32>
    %215 = vector.broadcast %cst_139 : f32 to vector<1x128xf32>
    %216 = arith.select %213, %214, %215 : vector<1x128xi1>, vector<1x128xf32>
    %c4_i32 = arith.constant 4 : i32
    %217 = vector.broadcast %c4_i32 : i32 to vector<1x128xi32>
    %218 = arith.cmpi sge, %206, %217 : vector<1x128xi32>
    %cst_140 = arith.constant 1.000000e+00 : f32
    %cst_141 = arith.constant 0.000000e+00 : f32
    %219 = vector.broadcast %cst_140 : f32 to vector<1x128xf32>
    %220 = vector.broadcast %cst_141 : f32 to vector<1x128xf32>
    %221 = arith.select %218, %219, %220 : vector<1x128xi1>, vector<1x128xf32>
    %c12_i32 = arith.constant 12 : i32
    %222 = vector.broadcast %c12_i32 : i32 to vector<1x128xi32>
    %223 = arith.cmpi slt, %206, %222 : vector<1x128xi32>
    %cst_142 = arith.constant 1.000000e+00 : f32
    %cst_143 = arith.constant 0.000000e+00 : f32
    %224 = vector.broadcast %cst_142 : f32 to vector<1x128xf32>
    %225 = vector.broadcast %cst_143 : f32 to vector<1x128xf32>
    %226 = arith.select %223, %224, %225 : vector<1x128xi1>, vector<1x128xf32>
    %cst_144 = arith.constant 0.000000e+00 : f32
    %227 = vector.broadcast %cst_144 : f32 to vector<32x128xf32>
    %c5_i32 = arith.constant 5 : i32
    %228 = tpu.dynamic_rotate %201 by %c5_i32 dim 1 : vector<16x128xf32>, i32 -> vector<16x128xf32>
    %229 = arith.mulf %221, %211 : vector<1x128xf32>
    %230 = vector.broadcast %229 : vector<1x128xf32> to vector<16x128xf32>
    %231 = arith.mulf %228, %230 : vector<16x128xf32>
    %c0_145 = arith.constant 0 : index
    %c0_146 = arith.constant 0 : index
    %c0_147 = arith.constant 0 : index
    %c0_148 = arith.constant 0 : index
    %232 = vector.load %arg8[%c0_145, %c0_146, %c0_147, %c0_148] : memref<3x3x32x16xf32, #tpu.memory_space<vmem>>, vector<1x1x32x16xf32>
    %233 = vector.shape_cast %232 : vector<1x1x32x16xf32> to vector<32x16xf32>
    %cst_149 = arith.constant dense<0.000000e+00> : vector<32x128xf32>
    %234 = tpu.matmul %233, %231, %cst_149 {dimension_numbers = #tpu.dot_dimension_numbers<[1], [0], [0], [1], [0, 0, 1, 1], [], []>} : vector<32x16xf32>, vector<16x128xf32>, vector<32x128xf32> -> vector<32x128xf32>
    %235 = arith.addf %227, %234 : vector<32x128xf32>
    %c4_i32_150 = arith.constant 4 : i32
    %236 = tpu.dynamic_rotate %201 by %c4_i32_150 dim 1 : vector<16x128xf32>, i32 -> vector<16x128xf32>
    %237 = vector.broadcast %221 : vector<1x128xf32> to vector<16x128xf32>
    %238 = arith.mulf %236, %237 : vector<16x128xf32>
    %c0_151 = arith.constant 0 : index
    %c1_152 = arith.constant 1 : index
    %c0_153 = arith.constant 0 : index
    %c0_154 = arith.constant 0 : index
    %239 = vector.load %arg8[%c0_151, %c1_152, %c0_153, %c0_154] : memref<3x3x32x16xf32, #tpu.memory_space<vmem>>, vector<1x1x32x16xf32>
    %240 = vector.shape_cast %239 : vector<1x1x32x16xf32> to vector<32x16xf32>
    %cst_155 = arith.constant dense<0.000000e+00> : vector<32x128xf32>
    %241 = tpu.matmul %240, %238, %cst_155 {dimension_numbers = #tpu.dot_dimension_numbers<[1], [0], [0], [1], [0, 0, 1, 1], [], []>} : vector<32x16xf32>, vector<16x128xf32>, vector<32x128xf32> -> vector<32x128xf32>
    %242 = arith.addf %235, %241 : vector<32x128xf32>
    %c3_i32_156 = arith.constant 3 : i32
    %243 = tpu.dynamic_rotate %201 by %c3_i32_156 dim 1 : vector<16x128xf32>, i32 -> vector<16x128xf32>
    %244 = arith.mulf %221, %216 : vector<1x128xf32>
    %245 = vector.broadcast %244 : vector<1x128xf32> to vector<16x128xf32>
    %246 = arith.mulf %243, %245 : vector<16x128xf32>
    %c0_157 = arith.constant 0 : index
    %c2_158 = arith.constant 2 : index
    %c0_159 = arith.constant 0 : index
    %c0_160 = arith.constant 0 : index
    %247 = vector.load %arg8[%c0_157, %c2_158, %c0_159, %c0_160] : memref<3x3x32x16xf32, #tpu.memory_space<vmem>>, vector<1x1x32x16xf32>
    %248 = vector.shape_cast %247 : vector<1x1x32x16xf32> to vector<32x16xf32>
    %cst_161 = arith.constant dense<0.000000e+00> : vector<32x128xf32>
    %249 = tpu.matmul %248, %246, %cst_161 {dimension_numbers = #tpu.dot_dimension_numbers<[1], [0], [0], [1], [0, 0, 1, 1], [], []>} : vector<32x16xf32>, vector<16x128xf32>, vector<32x128xf32> -> vector<32x128xf32>
    %250 = arith.addf %242, %249 : vector<32x128xf32>
    %c1_i32_162 = arith.constant 1 : i32
    %251 = tpu.dynamic_rotate %201 by %c1_i32_162 dim 1 : vector<16x128xf32>, i32 -> vector<16x128xf32>
    %252 = vector.broadcast %211 : vector<1x128xf32> to vector<16x128xf32>
    %253 = arith.mulf %251, %252 : vector<16x128xf32>
    %c1_163 = arith.constant 1 : index
    %c0_164 = arith.constant 0 : index
    %c0_165 = arith.constant 0 : index
    %c0_166 = arith.constant 0 : index
    %254 = vector.load %arg8[%c1_163, %c0_164, %c0_165, %c0_166] : memref<3x3x32x16xf32, #tpu.memory_space<vmem>>, vector<1x1x32x16xf32>
    %255 = vector.shape_cast %254 : vector<1x1x32x16xf32> to vector<32x16xf32>
    %cst_167 = arith.constant dense<0.000000e+00> : vector<32x128xf32>
    %256 = tpu.matmul %255, %253, %cst_167 {dimension_numbers = #tpu.dot_dimension_numbers<[1], [0], [0], [1], [0, 0, 1, 1], [], []>} : vector<32x16xf32>, vector<16x128xf32>, vector<32x128xf32> -> vector<32x128xf32>
    %257 = arith.addf %250, %256 : vector<32x128xf32>
    %c1_168 = arith.constant 1 : index
    %c1_169 = arith.constant 1 : index
    %c0_170 = arith.constant 0 : index
    %c0_171 = arith.constant 0 : index
    %258 = vector.load %arg8[%c1_168, %c1_169, %c0_170, %c0_171] : memref<3x3x32x16xf32, #tpu.memory_space<vmem>>, vector<1x1x32x16xf32>
    %259 = vector.shape_cast %258 : vector<1x1x32x16xf32> to vector<32x16xf32>
    %cst_172 = arith.constant dense<0.000000e+00> : vector<32x128xf32>
    %260 = tpu.matmul %259, %201, %cst_172 {dimension_numbers = #tpu.dot_dimension_numbers<[1], [0], [0], [1], [0, 0, 1, 1], [], []>} : vector<32x16xf32>, vector<16x128xf32>, vector<32x128xf32> -> vector<32x128xf32>
    %261 = arith.addf %257, %260 : vector<32x128xf32>
    %c127_i32_173 = arith.constant 127 : i32
    %262 = tpu.dynamic_rotate %201 by %c127_i32_173 dim 1 : vector<16x128xf32>, i32 -> vector<16x128xf32>
    %263 = vector.broadcast %216 : vector<1x128xf32> to vector<16x128xf32>
    %264 = arith.mulf %262, %263 : vector<16x128xf32>
    %c1_174 = arith.constant 1 : index
    %c2_175 = arith.constant 2 : index
    %c0_176 = arith.constant 0 : index
    %c0_177 = arith.constant 0 : index
    %265 = vector.load %arg8[%c1_174, %c2_175, %c0_176, %c0_177] : memref<3x3x32x16xf32, #tpu.memory_space<vmem>>, vector<1x1x32x16xf32>
    %266 = vector.shape_cast %265 : vector<1x1x32x16xf32> to vector<32x16xf32>
    %cst_178 = arith.constant dense<0.000000e+00> : vector<32x128xf32>
    %267 = tpu.matmul %266, %264, %cst_178 {dimension_numbers = #tpu.dot_dimension_numbers<[1], [0], [0], [1], [0, 0, 1, 1], [], []>} : vector<32x16xf32>, vector<16x128xf32>, vector<32x128xf32> -> vector<32x128xf32>
    %268 = arith.addf %261, %267 : vector<32x128xf32>
    %c125_i32 = arith.constant 125 : i32
    %269 = tpu.dynamic_rotate %201 by %c125_i32 dim 1 : vector<16x128xf32>, i32 -> vector<16x128xf32>
    %270 = arith.mulf %226, %211 : vector<1x128xf32>
    %271 = vector.broadcast %270 : vector<1x128xf32> to vector<16x128xf32>
    %272 = arith.mulf %269, %271 : vector<16x128xf32>
    %c2_179 = arith.constant 2 : index
    %c0_180 = arith.constant 0 : index
    %c0_181 = arith.constant 0 : index
    %c0_182 = arith.constant 0 : index
    %273 = vector.load %arg8[%c2_179, %c0_180, %c0_181, %c0_182] : memref<3x3x32x16xf32, #tpu.memory_space<vmem>>, vector<1x1x32x16xf32>
    %274 = vector.shape_cast %273 : vector<1x1x32x16xf32> to vector<32x16xf32>
    %cst_183 = arith.constant dense<0.000000e+00> : vector<32x128xf32>
    %275 = tpu.matmul %274, %272, %cst_183 {dimension_numbers = #tpu.dot_dimension_numbers<[1], [0], [0], [1], [0, 0, 1, 1], [], []>} : vector<32x16xf32>, vector<16x128xf32>, vector<32x128xf32> -> vector<32x128xf32>
    %276 = arith.addf %268, %275 : vector<32x128xf32>
    %c124_i32 = arith.constant 124 : i32
    %277 = tpu.dynamic_rotate %201 by %c124_i32 dim 1 : vector<16x128xf32>, i32 -> vector<16x128xf32>
    %278 = vector.broadcast %226 : vector<1x128xf32> to vector<16x128xf32>
    %279 = arith.mulf %277, %278 : vector<16x128xf32>
    %c2_184 = arith.constant 2 : index
    %c1_185 = arith.constant 1 : index
    %c0_186 = arith.constant 0 : index
    %c0_187 = arith.constant 0 : index
    %280 = vector.load %arg8[%c2_184, %c1_185, %c0_186, %c0_187] : memref<3x3x32x16xf32, #tpu.memory_space<vmem>>, vector<1x1x32x16xf32>
    %281 = vector.shape_cast %280 : vector<1x1x32x16xf32> to vector<32x16xf32>
    %cst_188 = arith.constant dense<0.000000e+00> : vector<32x128xf32>
    %282 = tpu.matmul %281, %279, %cst_188 {dimension_numbers = #tpu.dot_dimension_numbers<[1], [0], [0], [1], [0, 0, 1, 1], [], []>} : vector<32x16xf32>, vector<16x128xf32>, vector<32x128xf32> -> vector<32x128xf32>
    %283 = arith.addf %276, %282 : vector<32x128xf32>
    %c123_i32 = arith.constant 123 : i32
    %284 = tpu.dynamic_rotate %201 by %c123_i32 dim 1 : vector<16x128xf32>, i32 -> vector<16x128xf32>
    %285 = arith.mulf %226, %216 : vector<1x128xf32>
    %286 = vector.broadcast %285 : vector<1x128xf32> to vector<16x128xf32>
    %287 = arith.mulf %284, %286 : vector<16x128xf32>
    %c2_189 = arith.constant 2 : index
    %c2_190 = arith.constant 2 : index
    %c0_191 = arith.constant 0 : index
    %c0_192 = arith.constant 0 : index
    %288 = vector.load %arg8[%c2_189, %c2_190, %c0_191, %c0_192] : memref<3x3x32x16xf32, #tpu.memory_space<vmem>>, vector<1x1x32x16xf32>
    %289 = vector.shape_cast %288 : vector<1x1x32x16xf32> to vector<32x16xf32>
    %cst_193 = arith.constant dense<0.000000e+00> : vector<32x128xf32>
    %290 = tpu.matmul %289, %287, %cst_193 {dimension_numbers = #tpu.dot_dimension_numbers<[1], [0], [0], [1], [0, 0, 1, 1], [], []>} : vector<32x16xf32>, vector<16x128xf32>, vector<32x128xf32> -> vector<32x128xf32>
    %291 = arith.addf %283, %290 : vector<32x128xf32>
    %c0_194 = arith.constant 0 : index
    %c0_195 = arith.constant 0 : index
    %292 = vector.load %arg9[%c0_194, %c0_195] : memref<32x1xf32, #tpu.memory_space<vmem>>, vector<32x1xf32>
    %293 = vector.broadcast %292 : vector<32x1xf32> to vector<32x128xf32>
    %294 = arith.addf %291, %293 : vector<32x128xf32>
    %cst_196 = arith.constant 0.000000e+00 : f32
    %295 = vector.broadcast %cst_196 : f32 to vector<32x128xf32>
    %296 = arith.maximumf %294, %295 : vector<32x128xf32>
    %c0_197 = arith.constant 0 : index
    %c0_198 = arith.constant 0 : index
    %297 = vector.load %arg10[%c0_197, %c0_198] : memref<128x128xbf16, #tpu.memory_space<vmem>>, vector<128x128xbf16>
    %298 = arith.extf %297 : vector<128x128xbf16> to vector<128x128xf32>
    %cst_199 = arith.constant dense<0.000000e+00> : vector<32x128xf32>
    %299 = tpu.matmul %296, %298, %cst_199 {dimension_numbers = #tpu.dot_dimension_numbers<[1], [0], [0], [1], [0, 0, 1, 1], [], []>} : vector<32x128xf32>, vector<128x128xf32>, vector<32x128xf32> -> vector<32x128xf32>
    %c0_200 = arith.constant 0 : index
    %c0_201 = arith.constant 0 : index
    %300 = vector.load %arg11[%c0_200, %c0_201] : memref<16x32xf32, #tpu.memory_space<vmem>>, vector<16x32xf32>
    %cst_202 = arith.constant dense<0.000000e+00> : vector<16x128xf32>
    %301 = tpu.matmul %300, %299, %cst_202 {dimension_numbers = #tpu.dot_dimension_numbers<[1], [0], [0], [1], [0, 0, 1, 1], [], []>} : vector<16x32xf32>, vector<32x128xf32>, vector<16x128xf32> -> vector<16x128xf32>
    %c0_203 = arith.constant 0 : index
    %c0_204 = arith.constant 0 : index
    %302 = vector.load %arg12[%c0_203, %c0_204] : memref<16x1xf32, #tpu.memory_space<vmem>>, vector<16x1xf32>
    %303 = vector.broadcast %302 : vector<16x1xf32> to vector<16x128xf32>
    %304 = arith.addf %301, %303 : vector<16x128xf32>
    %305 = tpu.concatenate %192, %304 in 0 : vector<16x128xf32>, vector<16x128xf32> -> vector<32x128xf32>
    %306 = tpu.iota {dimensions = array<i32: 1>} : vector<1x128xi32>
    %c7_i32_205 = arith.constant 7 : i32
    %307 = vector.broadcast %c7_i32_205 : i32 to vector<1x128xi32>
    %308 = arith.andi %306, %307 : vector<1x128xi32>
    %c63_i32_206 = arith.constant 63 : i32
    %309 = vector.broadcast %c63_i32_206 : i32 to vector<1x128xi32>
    %310 = arith.andi %306, %309 : vector<1x128xi32>
    %c1_i32_207 = arith.constant 1 : i32
    %311 = vector.broadcast %c1_i32_207 : i32 to vector<1x128xi32>
    %312 = arith.cmpi sge, %308, %311 : vector<1x128xi32>
    %cst_208 = arith.constant 1.000000e+00 : f32
    %cst_209 = arith.constant 0.000000e+00 : f32
    %313 = vector.broadcast %cst_208 : f32 to vector<1x128xf32>
    %314 = vector.broadcast %cst_209 : f32 to vector<1x128xf32>
    %315 = arith.select %312, %313, %314 : vector<1x128xi1>, vector<1x128xf32>
    %c6_i32_210 = arith.constant 6 : i32
    %316 = vector.broadcast %c6_i32_210 : i32 to vector<1x128xi32>
    %317 = arith.cmpi sle, %308, %316 : vector<1x128xi32>
    %cst_211 = arith.constant 1.000000e+00 : f32
    %cst_212 = arith.constant 0.000000e+00 : f32
    %318 = vector.broadcast %cst_211 : f32 to vector<1x128xf32>
    %319 = vector.broadcast %cst_212 : f32 to vector<1x128xf32>
    %320 = arith.select %317, %318, %319 : vector<1x128xi1>, vector<1x128xf32>
    %c8_i32_213 = arith.constant 8 : i32
    %321 = vector.broadcast %c8_i32_213 : i32 to vector<1x128xi32>
    %322 = arith.cmpi sge, %310, %321 : vector<1x128xi32>
    %cst_214 = arith.constant 1.000000e+00 : f32
    %cst_215 = arith.constant 0.000000e+00 : f32
    %323 = vector.broadcast %cst_214 : f32 to vector<1x128xf32>
    %324 = vector.broadcast %cst_215 : f32 to vector<1x128xf32>
    %325 = arith.select %322, %323, %324 : vector<1x128xi1>, vector<1x128xf32>
    %c56_i32_216 = arith.constant 56 : i32
    %326 = vector.broadcast %c56_i32_216 : i32 to vector<1x128xi32>
    %327 = arith.cmpi slt, %310, %326 : vector<1x128xi32>
    %cst_217 = arith.constant 1.000000e+00 : f32
    %cst_218 = arith.constant 0.000000e+00 : f32
    %328 = vector.broadcast %cst_217 : f32 to vector<1x128xf32>
    %329 = vector.broadcast %cst_218 : f32 to vector<1x128xf32>
    %330 = arith.select %327, %328, %329 : vector<1x128xi1>, vector<1x128xf32>
    %cst_219 = arith.constant 0.000000e+00 : f32
    %331 = vector.broadcast %cst_219 : f32 to vector<16x128xf32>
    %c9_i32_220 = arith.constant 9 : i32
    %332 = tpu.dynamic_rotate %305 by %c9_i32_220 dim 1 : vector<32x128xf32>, i32 -> vector<32x128xf32>
    %333 = arith.mulf %325, %315 : vector<1x128xf32>
    %334 = vector.broadcast %333 : vector<1x128xf32> to vector<32x128xf32>
    %335 = arith.mulf %332, %334 : vector<32x128xf32>
    %c0_221 = arith.constant 0 : index
    %c0_222 = arith.constant 0 : index
    %c0_223 = arith.constant 0 : index
    %c0_224 = arith.constant 0 : index
    %336 = vector.load %arg13[%c0_221, %c0_222, %c0_223, %c0_224] : memref<3x3x16x32xf32, #tpu.memory_space<vmem>>, vector<1x1x16x32xf32>
    %337 = vector.shape_cast %336 : vector<1x1x16x32xf32> to vector<16x32xf32>
    %cst_225 = arith.constant dense<0.000000e+00> : vector<16x128xf32>
    %338 = tpu.matmul %337, %335, %cst_225 {dimension_numbers = #tpu.dot_dimension_numbers<[1], [0], [0], [1], [0, 0, 1, 1], [], []>} : vector<16x32xf32>, vector<32x128xf32>, vector<16x128xf32> -> vector<16x128xf32>
    %339 = arith.addf %331, %338 : vector<16x128xf32>
    %c8_i32_226 = arith.constant 8 : i32
    %340 = tpu.dynamic_rotate %305 by %c8_i32_226 dim 1 : vector<32x128xf32>, i32 -> vector<32x128xf32>
    %341 = vector.broadcast %325 : vector<1x128xf32> to vector<32x128xf32>
    %342 = arith.mulf %340, %341 : vector<32x128xf32>
    %c0_227 = arith.constant 0 : index
    %c1_228 = arith.constant 1 : index
    %c0_229 = arith.constant 0 : index
    %c0_230 = arith.constant 0 : index
    %343 = vector.load %arg13[%c0_227, %c1_228, %c0_229, %c0_230] : memref<3x3x16x32xf32, #tpu.memory_space<vmem>>, vector<1x1x16x32xf32>
    %344 = vector.shape_cast %343 : vector<1x1x16x32xf32> to vector<16x32xf32>
    %cst_231 = arith.constant dense<0.000000e+00> : vector<16x128xf32>
    %345 = tpu.matmul %344, %342, %cst_231 {dimension_numbers = #tpu.dot_dimension_numbers<[1], [0], [0], [1], [0, 0, 1, 1], [], []>} : vector<16x32xf32>, vector<32x128xf32>, vector<16x128xf32> -> vector<16x128xf32>
    %346 = arith.addf %339, %345 : vector<16x128xf32>
    %c7_i32_232 = arith.constant 7 : i32
    %347 = tpu.dynamic_rotate %305 by %c7_i32_232 dim 1 : vector<32x128xf32>, i32 -> vector<32x128xf32>
    %348 = arith.mulf %325, %320 : vector<1x128xf32>
    %349 = vector.broadcast %348 : vector<1x128xf32> to vector<32x128xf32>
    %350 = arith.mulf %347, %349 : vector<32x128xf32>
    %c0_233 = arith.constant 0 : index
    %c2_234 = arith.constant 2 : index
    %c0_235 = arith.constant 0 : index
    %c0_236 = arith.constant 0 : index
    %351 = vector.load %arg13[%c0_233, %c2_234, %c0_235, %c0_236] : memref<3x3x16x32xf32, #tpu.memory_space<vmem>>, vector<1x1x16x32xf32>
    %352 = vector.shape_cast %351 : vector<1x1x16x32xf32> to vector<16x32xf32>
    %cst_237 = arith.constant dense<0.000000e+00> : vector<16x128xf32>
    %353 = tpu.matmul %352, %350, %cst_237 {dimension_numbers = #tpu.dot_dimension_numbers<[1], [0], [0], [1], [0, 0, 1, 1], [], []>} : vector<16x32xf32>, vector<32x128xf32>, vector<16x128xf32> -> vector<16x128xf32>
    %354 = arith.addf %346, %353 : vector<16x128xf32>
    %c1_i32_238 = arith.constant 1 : i32
    %355 = tpu.dynamic_rotate %305 by %c1_i32_238 dim 1 : vector<32x128xf32>, i32 -> vector<32x128xf32>
    %356 = vector.broadcast %315 : vector<1x128xf32> to vector<32x128xf32>
    %357 = arith.mulf %355, %356 : vector<32x128xf32>
    %c1_239 = arith.constant 1 : index
    %c0_240 = arith.constant 0 : index
    %c0_241 = arith.constant 0 : index
    %c0_242 = arith.constant 0 : index
    %358 = vector.load %arg13[%c1_239, %c0_240, %c0_241, %c0_242] : memref<3x3x16x32xf32, #tpu.memory_space<vmem>>, vector<1x1x16x32xf32>
    %359 = vector.shape_cast %358 : vector<1x1x16x32xf32> to vector<16x32xf32>
    %cst_243 = arith.constant dense<0.000000e+00> : vector<16x128xf32>
    %360 = tpu.matmul %359, %357, %cst_243 {dimension_numbers = #tpu.dot_dimension_numbers<[1], [0], [0], [1], [0, 0, 1, 1], [], []>} : vector<16x32xf32>, vector<32x128xf32>, vector<16x128xf32> -> vector<16x128xf32>
    %361 = arith.addf %354, %360 : vector<16x128xf32>
    %c1_244 = arith.constant 1 : index
    %c1_245 = arith.constant 1 : index
    %c0_246 = arith.constant 0 : index
    %c0_247 = arith.constant 0 : index
    %362 = vector.load %arg13[%c1_244, %c1_245, %c0_246, %c0_247] : memref<3x3x16x32xf32, #tpu.memory_space<vmem>>, vector<1x1x16x32xf32>
    %363 = vector.shape_cast %362 : vector<1x1x16x32xf32> to vector<16x32xf32>
    %cst_248 = arith.constant dense<0.000000e+00> : vector<16x128xf32>
    %364 = tpu.matmul %363, %305, %cst_248 {dimension_numbers = #tpu.dot_dimension_numbers<[1], [0], [0], [1], [0, 0, 1, 1], [], []>} : vector<16x32xf32>, vector<32x128xf32>, vector<16x128xf32> -> vector<16x128xf32>
    %365 = arith.addf %361, %364 : vector<16x128xf32>
    %c127_i32_249 = arith.constant 127 : i32
    %366 = tpu.dynamic_rotate %305 by %c127_i32_249 dim 1 : vector<32x128xf32>, i32 -> vector<32x128xf32>
    %367 = vector.broadcast %320 : vector<1x128xf32> to vector<32x128xf32>
    %368 = arith.mulf %366, %367 : vector<32x128xf32>
    %c1_250 = arith.constant 1 : index
    %c2_251 = arith.constant 2 : index
    %c0_252 = arith.constant 0 : index
    %c0_253 = arith.constant 0 : index
    %369 = vector.load %arg13[%c1_250, %c2_251, %c0_252, %c0_253] : memref<3x3x16x32xf32, #tpu.memory_space<vmem>>, vector<1x1x16x32xf32>
    %370 = vector.shape_cast %369 : vector<1x1x16x32xf32> to vector<16x32xf32>
    %cst_254 = arith.constant dense<0.000000e+00> : vector<16x128xf32>
    %371 = tpu.matmul %370, %368, %cst_254 {dimension_numbers = #tpu.dot_dimension_numbers<[1], [0], [0], [1], [0, 0, 1, 1], [], []>} : vector<16x32xf32>, vector<32x128xf32>, vector<16x128xf32> -> vector<16x128xf32>
    %372 = arith.addf %365, %371 : vector<16x128xf32>
    %c121_i32_255 = arith.constant 121 : i32
    %373 = tpu.dynamic_rotate %305 by %c121_i32_255 dim 1 : vector<32x128xf32>, i32 -> vector<32x128xf32>
    %374 = arith.mulf %330, %315 : vector<1x128xf32>
    %375 = vector.broadcast %374 : vector<1x128xf32> to vector<32x128xf32>
    %376 = arith.mulf %373, %375 : vector<32x128xf32>
    %c2_256 = arith.constant 2 : index
    %c0_257 = arith.constant 0 : index
    %c0_258 = arith.constant 0 : index
    %c0_259 = arith.constant 0 : index
    %377 = vector.load %arg13[%c2_256, %c0_257, %c0_258, %c0_259] : memref<3x3x16x32xf32, #tpu.memory_space<vmem>>, vector<1x1x16x32xf32>
    %378 = vector.shape_cast %377 : vector<1x1x16x32xf32> to vector<16x32xf32>
    %cst_260 = arith.constant dense<0.000000e+00> : vector<16x128xf32>
    %379 = tpu.matmul %378, %376, %cst_260 {dimension_numbers = #tpu.dot_dimension_numbers<[1], [0], [0], [1], [0, 0, 1, 1], [], []>} : vector<16x32xf32>, vector<32x128xf32>, vector<16x128xf32> -> vector<16x128xf32>
    %380 = arith.addf %372, %379 : vector<16x128xf32>
    %c120_i32_261 = arith.constant 120 : i32
    %381 = tpu.dynamic_rotate %305 by %c120_i32_261 dim 1 : vector<32x128xf32>, i32 -> vector<32x128xf32>
    %382 = vector.broadcast %330 : vector<1x128xf32> to vector<32x128xf32>
    %383 = arith.mulf %381, %382 : vector<32x128xf32>
    %c2_262 = arith.constant 2 : index
    %c1_263 = arith.constant 1 : index
    %c0_264 = arith.constant 0 : index
    %c0_265 = arith.constant 0 : index
    %384 = vector.load %arg13[%c2_262, %c1_263, %c0_264, %c0_265] : memref<3x3x16x32xf32, #tpu.memory_space<vmem>>, vector<1x1x16x32xf32>
    %385 = vector.shape_cast %384 : vector<1x1x16x32xf32> to vector<16x32xf32>
    %cst_266 = arith.constant dense<0.000000e+00> : vector<16x128xf32>
    %386 = tpu.matmul %385, %383, %cst_266 {dimension_numbers = #tpu.dot_dimension_numbers<[1], [0], [0], [1], [0, 0, 1, 1], [], []>} : vector<16x32xf32>, vector<32x128xf32>, vector<16x128xf32> -> vector<16x128xf32>
    %387 = arith.addf %380, %386 : vector<16x128xf32>
    %c119_i32_267 = arith.constant 119 : i32
    %388 = tpu.dynamic_rotate %305 by %c119_i32_267 dim 1 : vector<32x128xf32>, i32 -> vector<32x128xf32>
    %389 = arith.mulf %330, %320 : vector<1x128xf32>
    %390 = vector.broadcast %389 : vector<1x128xf32> to vector<32x128xf32>
    %391 = arith.mulf %388, %390 : vector<32x128xf32>
    %c2_268 = arith.constant 2 : index
    %c2_269 = arith.constant 2 : index
    %c0_270 = arith.constant 0 : index
    %c0_271 = arith.constant 0 : index
    %392 = vector.load %arg13[%c2_268, %c2_269, %c0_270, %c0_271] : memref<3x3x16x32xf32, #tpu.memory_space<vmem>>, vector<1x1x16x32xf32>
    %393 = vector.shape_cast %392 : vector<1x1x16x32xf32> to vector<16x32xf32>
    %cst_272 = arith.constant dense<0.000000e+00> : vector<16x128xf32>
    %394 = tpu.matmul %393, %391, %cst_272 {dimension_numbers = #tpu.dot_dimension_numbers<[1], [0], [0], [1], [0, 0, 1, 1], [], []>} : vector<16x32xf32>, vector<32x128xf32>, vector<16x128xf32> -> vector<16x128xf32>
    %395 = arith.addf %387, %394 : vector<16x128xf32>
    %c0_273 = arith.constant 0 : index
    %c0_274 = arith.constant 0 : index
    %396 = vector.load %arg14[%c0_273, %c0_274] : memref<16x1xf32, #tpu.memory_space<vmem>>, vector<16x1xf32>
    %397 = vector.broadcast %396 : vector<16x1xf32> to vector<16x128xf32>
    %398 = arith.addf %395, %397 : vector<16x128xf32>
    %cst_275 = arith.constant 0.000000e+00 : f32
    %399 = vector.broadcast %cst_275 : f32 to vector<16x128xf32>
    %400 = arith.maximumf %398, %399 : vector<16x128xf32>
    %c0_276 = arith.constant 0 : index
    %c0_277 = arith.constant 0 : index
    %401 = vector.load %arg15[%c0_276, %c0_277] : memref<128x256xbf16, #tpu.memory_space<vmem>>, vector<128x256xbf16>
    %402 = arith.extf %401 : vector<128x256xbf16> to vector<128x256xf32>
    %cst_278 = arith.constant dense<0.000000e+00> : vector<16x256xf32>
    %403 = tpu.matmul %400, %402, %cst_278 {dimension_numbers = #tpu.dot_dimension_numbers<[1], [0], [0], [1], [0, 0, 1, 1], [], []>} : vector<16x128xf32>, vector<128x256xf32>, vector<16x256xf32> -> vector<16x256xf32>
    %c0_279 = arith.constant 0 : index
    %c0_280 = arith.constant 0 : index
    %404 = vector.load %arg16[%c0_279, %c0_280] : memref<8x16xf32, #tpu.memory_space<vmem>>, vector<8x16xf32>
    %cst_281 = arith.constant dense<0.000000e+00> : vector<8x256xf32>
    %405 = tpu.matmul %404, %403, %cst_281 {dimension_numbers = #tpu.dot_dimension_numbers<[1], [0], [0], [1], [0, 0, 1, 1], [], []>} : vector<8x16xf32>, vector<16x256xf32>, vector<8x256xf32> -> vector<8x256xf32>
    %c0_282 = arith.constant 0 : index
    %c0_283 = arith.constant 0 : index
    %406 = vector.load %arg17[%c0_282, %c0_283] : memref<8x1xf32, #tpu.memory_space<vmem>>, vector<8x1xf32>
    %407 = vector.broadcast %406 : vector<8x1xf32> to vector<8x256xf32>
    %408 = arith.addf %405, %407 : vector<8x256xf32>
    %409 = tpu.concatenate %88, %408 in 0 : vector<8x256xf32>, vector<8x256xf32> -> vector<16x256xf32>
    %410 = tpu.iota {dimensions = array<i32: 1>} : vector<1x256xi32>
    %c15_i32_284 = arith.constant 15 : i32
    %411 = vector.broadcast %c15_i32_284 : i32 to vector<1x256xi32>
    %412 = arith.andi %410, %411 : vector<1x256xi32>
    %c255_i32_285 = arith.constant 255 : i32
    %413 = vector.broadcast %c255_i32_285 : i32 to vector<1x256xi32>
    %414 = arith.andi %410, %413 : vector<1x256xi32>
    %c1_i32_286 = arith.constant 1 : i32
    %415 = vector.broadcast %c1_i32_286 : i32 to vector<1x256xi32>
    %416 = arith.cmpi sge, %412, %415 : vector<1x256xi32>
    %cst_287 = arith.constant 1.000000e+00 : f32
    %cst_288 = arith.constant 0.000000e+00 : f32
    %417 = vector.broadcast %cst_287 : f32 to vector<1x256xf32>
    %418 = vector.broadcast %cst_288 : f32 to vector<1x256xf32>
    %419 = arith.select %416, %417, %418 : vector<1x256xi1>, vector<1x256xf32>
    %c14_i32_289 = arith.constant 14 : i32
    %420 = vector.broadcast %c14_i32_289 : i32 to vector<1x256xi32>
    %421 = arith.cmpi sle, %412, %420 : vector<1x256xi32>
    %cst_290 = arith.constant 1.000000e+00 : f32
    %cst_291 = arith.constant 0.000000e+00 : f32
    %422 = vector.broadcast %cst_290 : f32 to vector<1x256xf32>
    %423 = vector.broadcast %cst_291 : f32 to vector<1x256xf32>
    %424 = arith.select %421, %422, %423 : vector<1x256xi1>, vector<1x256xf32>
    %c16_i32_292 = arith.constant 16 : i32
    %425 = vector.broadcast %c16_i32_292 : i32 to vector<1x256xi32>
    %426 = arith.cmpi sge, %414, %425 : vector<1x256xi32>
    %cst_293 = arith.constant 1.000000e+00 : f32
    %cst_294 = arith.constant 0.000000e+00 : f32
    %427 = vector.broadcast %cst_293 : f32 to vector<1x256xf32>
    %428 = vector.broadcast %cst_294 : f32 to vector<1x256xf32>
    %429 = arith.select %426, %427, %428 : vector<1x256xi1>, vector<1x256xf32>
    %c240_i32_295 = arith.constant 240 : i32
    %430 = vector.broadcast %c240_i32_295 : i32 to vector<1x256xi32>
    %431 = arith.cmpi slt, %414, %430 : vector<1x256xi32>
    %cst_296 = arith.constant 1.000000e+00 : f32
    %cst_297 = arith.constant 0.000000e+00 : f32
    %432 = vector.broadcast %cst_296 : f32 to vector<1x256xf32>
    %433 = vector.broadcast %cst_297 : f32 to vector<1x256xf32>
    %434 = arith.select %431, %432, %433 : vector<1x256xi1>, vector<1x256xf32>
    %cst_298 = arith.constant 0.000000e+00 : f32
    %435 = vector.broadcast %cst_298 : f32 to vector<8x256xf32>
    %c17_i32_299 = arith.constant 17 : i32
    %436 = tpu.dynamic_rotate %409 by %c17_i32_299 dim 1 : vector<16x256xf32>, i32 -> vector<16x256xf32>
    %437 = arith.mulf %429, %419 : vector<1x256xf32>
    %438 = vector.broadcast %437 : vector<1x256xf32> to vector<16x256xf32>
    %439 = arith.mulf %436, %438 : vector<16x256xf32>
    %c0_300 = arith.constant 0 : index
    %c0_301 = arith.constant 0 : index
    %c0_302 = arith.constant 0 : index
    %c0_303 = arith.constant 0 : index
    %440 = vector.load %arg18[%c0_300, %c0_301, %c0_302, %c0_303] : memref<3x3x8x16xf32, #tpu.memory_space<vmem>>, vector<1x1x8x16xf32>
    %441 = vector.shape_cast %440 : vector<1x1x8x16xf32> to vector<8x16xf32>
    %cst_304 = arith.constant dense<0.000000e+00> : vector<8x256xf32>
    %442 = tpu.matmul %441, %439, %cst_304 {dimension_numbers = #tpu.dot_dimension_numbers<[1], [0], [0], [1], [0, 0, 1, 1], [], []>} : vector<8x16xf32>, vector<16x256xf32>, vector<8x256xf32> -> vector<8x256xf32>
    %443 = arith.addf %435, %442 : vector<8x256xf32>
    %c16_i32_305 = arith.constant 16 : i32
    %444 = tpu.dynamic_rotate %409 by %c16_i32_305 dim 1 : vector<16x256xf32>, i32 -> vector<16x256xf32>
    %445 = vector.broadcast %429 : vector<1x256xf32> to vector<16x256xf32>
    %446 = arith.mulf %444, %445 : vector<16x256xf32>
    %c0_306 = arith.constant 0 : index
    %c1_307 = arith.constant 1 : index
    %c0_308 = arith.constant 0 : index
    %c0_309 = arith.constant 0 : index
    %447 = vector.load %arg18[%c0_306, %c1_307, %c0_308, %c0_309] : memref<3x3x8x16xf32, #tpu.memory_space<vmem>>, vector<1x1x8x16xf32>
    %448 = vector.shape_cast %447 : vector<1x1x8x16xf32> to vector<8x16xf32>
    %cst_310 = arith.constant dense<0.000000e+00> : vector<8x256xf32>
    %449 = tpu.matmul %448, %446, %cst_310 {dimension_numbers = #tpu.dot_dimension_numbers<[1], [0], [0], [1], [0, 0, 1, 1], [], []>} : vector<8x16xf32>, vector<16x256xf32>, vector<8x256xf32> -> vector<8x256xf32>
    %450 = arith.addf %443, %449 : vector<8x256xf32>
    %c15_i32_311 = arith.constant 15 : i32
    %451 = tpu.dynamic_rotate %409 by %c15_i32_311 dim 1 : vector<16x256xf32>, i32 -> vector<16x256xf32>
    %452 = arith.mulf %429, %424 : vector<1x256xf32>
    %453 = vector.broadcast %452 : vector<1x256xf32> to vector<16x256xf32>
    %454 = arith.mulf %451, %453 : vector<16x256xf32>
    %c0_312 = arith.constant 0 : index
    %c2_313 = arith.constant 2 : index
    %c0_314 = arith.constant 0 : index
    %c0_315 = arith.constant 0 : index
    %455 = vector.load %arg18[%c0_312, %c2_313, %c0_314, %c0_315] : memref<3x3x8x16xf32, #tpu.memory_space<vmem>>, vector<1x1x8x16xf32>
    %456 = vector.shape_cast %455 : vector<1x1x8x16xf32> to vector<8x16xf32>
    %cst_316 = arith.constant dense<0.000000e+00> : vector<8x256xf32>
    %457 = tpu.matmul %456, %454, %cst_316 {dimension_numbers = #tpu.dot_dimension_numbers<[1], [0], [0], [1], [0, 0, 1, 1], [], []>} : vector<8x16xf32>, vector<16x256xf32>, vector<8x256xf32> -> vector<8x256xf32>
    %458 = arith.addf %450, %457 : vector<8x256xf32>
    %c1_i32_317 = arith.constant 1 : i32
    %459 = tpu.dynamic_rotate %409 by %c1_i32_317 dim 1 : vector<16x256xf32>, i32 -> vector<16x256xf32>
    %460 = vector.broadcast %419 : vector<1x256xf32> to vector<16x256xf32>
    %461 = arith.mulf %459, %460 : vector<16x256xf32>
    %c1_318 = arith.constant 1 : index
    %c0_319 = arith.constant 0 : index
    %c0_320 = arith.constant 0 : index
    %c0_321 = arith.constant 0 : index
    %462 = vector.load %arg18[%c1_318, %c0_319, %c0_320, %c0_321] : memref<3x3x8x16xf32, #tpu.memory_space<vmem>>, vector<1x1x8x16xf32>
    %463 = vector.shape_cast %462 : vector<1x1x8x16xf32> to vector<8x16xf32>
    %cst_322 = arith.constant dense<0.000000e+00> : vector<8x256xf32>
    %464 = tpu.matmul %463, %461, %cst_322 {dimension_numbers = #tpu.dot_dimension_numbers<[1], [0], [0], [1], [0, 0, 1, 1], [], []>} : vector<8x16xf32>, vector<16x256xf32>, vector<8x256xf32> -> vector<8x256xf32>
    %465 = arith.addf %458, %464 : vector<8x256xf32>
    %c1_323 = arith.constant 1 : index
    %c1_324 = arith.constant 1 : index
    %c0_325 = arith.constant 0 : index
    %c0_326 = arith.constant 0 : index
    %466 = vector.load %arg18[%c1_323, %c1_324, %c0_325, %c0_326] : memref<3x3x8x16xf32, #tpu.memory_space<vmem>>, vector<1x1x8x16xf32>
    %467 = vector.shape_cast %466 : vector<1x1x8x16xf32> to vector<8x16xf32>
    %cst_327 = arith.constant dense<0.000000e+00> : vector<8x256xf32>
    %468 = tpu.matmul %467, %409, %cst_327 {dimension_numbers = #tpu.dot_dimension_numbers<[1], [0], [0], [1], [0, 0, 1, 1], [], []>} : vector<8x16xf32>, vector<16x256xf32>, vector<8x256xf32> -> vector<8x256xf32>
    %469 = arith.addf %465, %468 : vector<8x256xf32>
    %c255_i32_328 = arith.constant 255 : i32
    %470 = tpu.dynamic_rotate %409 by %c255_i32_328 dim 1 : vector<16x256xf32>, i32 -> vector<16x256xf32>
    %471 = vector.broadcast %424 : vector<1x256xf32> to vector<16x256xf32>
    %472 = arith.mulf %470, %471 : vector<16x256xf32>
    %c1_329 = arith.constant 1 : index
    %c2_330 = arith.constant 2 : index
    %c0_331 = arith.constant 0 : index
    %c0_332 = arith.constant 0 : index
    %473 = vector.load %arg18[%c1_329, %c2_330, %c0_331, %c0_332] : memref<3x3x8x16xf32, #tpu.memory_space<vmem>>, vector<1x1x8x16xf32>
    %474 = vector.shape_cast %473 : vector<1x1x8x16xf32> to vector<8x16xf32>
    %cst_333 = arith.constant dense<0.000000e+00> : vector<8x256xf32>
    %475 = tpu.matmul %474, %472, %cst_333 {dimension_numbers = #tpu.dot_dimension_numbers<[1], [0], [0], [1], [0, 0, 1, 1], [], []>} : vector<8x16xf32>, vector<16x256xf32>, vector<8x256xf32> -> vector<8x256xf32>
    %476 = arith.addf %469, %475 : vector<8x256xf32>
    %c241_i32_334 = arith.constant 241 : i32
    %477 = tpu.dynamic_rotate %409 by %c241_i32_334 dim 1 : vector<16x256xf32>, i32 -> vector<16x256xf32>
    %478 = arith.mulf %434, %419 : vector<1x256xf32>
    %479 = vector.broadcast %478 : vector<1x256xf32> to vector<16x256xf32>
    %480 = arith.mulf %477, %479 : vector<16x256xf32>
    %c2_335 = arith.constant 2 : index
    %c0_336 = arith.constant 0 : index
    %c0_337 = arith.constant 0 : index
    %c0_338 = arith.constant 0 : index
    %481 = vector.load %arg18[%c2_335, %c0_336, %c0_337, %c0_338] : memref<3x3x8x16xf32, #tpu.memory_space<vmem>>, vector<1x1x8x16xf32>
    %482 = vector.shape_cast %481 : vector<1x1x8x16xf32> to vector<8x16xf32>
    %cst_339 = arith.constant dense<0.000000e+00> : vector<8x256xf32>
    %483 = tpu.matmul %482, %480, %cst_339 {dimension_numbers = #tpu.dot_dimension_numbers<[1], [0], [0], [1], [0, 0, 1, 1], [], []>} : vector<8x16xf32>, vector<16x256xf32>, vector<8x256xf32> -> vector<8x256xf32>
    %484 = arith.addf %476, %483 : vector<8x256xf32>
    %c240_i32_340 = arith.constant 240 : i32
    %485 = tpu.dynamic_rotate %409 by %c240_i32_340 dim 1 : vector<16x256xf32>, i32 -> vector<16x256xf32>
    %486 = vector.broadcast %434 : vector<1x256xf32> to vector<16x256xf32>
    %487 = arith.mulf %485, %486 : vector<16x256xf32>
    %c2_341 = arith.constant 2 : index
    %c1_342 = arith.constant 1 : index
    %c0_343 = arith.constant 0 : index
    %c0_344 = arith.constant 0 : index
    %488 = vector.load %arg18[%c2_341, %c1_342, %c0_343, %c0_344] : memref<3x3x8x16xf32, #tpu.memory_space<vmem>>, vector<1x1x8x16xf32>
    %489 = vector.shape_cast %488 : vector<1x1x8x16xf32> to vector<8x16xf32>
    %cst_345 = arith.constant dense<0.000000e+00> : vector<8x256xf32>
    %490 = tpu.matmul %489, %487, %cst_345 {dimension_numbers = #tpu.dot_dimension_numbers<[1], [0], [0], [1], [0, 0, 1, 1], [], []>} : vector<8x16xf32>, vector<16x256xf32>, vector<8x256xf32> -> vector<8x256xf32>
    %491 = arith.addf %484, %490 : vector<8x256xf32>
    %c239_i32_346 = arith.constant 239 : i32
    %492 = tpu.dynamic_rotate %409 by %c239_i32_346 dim 1 : vector<16x256xf32>, i32 -> vector<16x256xf32>
    %493 = arith.mulf %434, %424 : vector<1x256xf32>
    %494 = vector.broadcast %493 : vector<1x256xf32> to vector<16x256xf32>
    %495 = arith.mulf %492, %494 : vector<16x256xf32>
    %c2_347 = arith.constant 2 : index
    %c2_348 = arith.constant 2 : index
    %c0_349 = arith.constant 0 : index
    %c0_350 = arith.constant 0 : index
    %496 = vector.load %arg18[%c2_347, %c2_348, %c0_349, %c0_350] : memref<3x3x8x16xf32, #tpu.memory_space<vmem>>, vector<1x1x8x16xf32>
    %497 = vector.shape_cast %496 : vector<1x1x8x16xf32> to vector<8x16xf32>
    %cst_351 = arith.constant dense<0.000000e+00> : vector<8x256xf32>
    %498 = tpu.matmul %497, %495, %cst_351 {dimension_numbers = #tpu.dot_dimension_numbers<[1], [0], [0], [1], [0, 0, 1, 1], [], []>} : vector<8x16xf32>, vector<16x256xf32>, vector<8x256xf32> -> vector<8x256xf32>
    %499 = arith.addf %491, %498 : vector<8x256xf32>
    %c0_352 = arith.constant 0 : index
    %c0_353 = arith.constant 0 : index
    %500 = vector.load %arg19[%c0_352, %c0_353] : memref<8x1xf32, #tpu.memory_space<vmem>>, vector<8x1xf32>
    %501 = vector.broadcast %500 : vector<8x1xf32> to vector<8x256xf32>
    %502 = arith.addf %499, %501 : vector<8x256xf32>
    %cst_354 = arith.constant 0.000000e+00 : f32
    %503 = vector.broadcast %cst_354 : f32 to vector<8x256xf32>
    %504 = arith.maximumf %502, %503 : vector<8x256xf32>
    %c0_355 = arith.constant 0 : index
    %c0_356 = arith.constant 0 : index
    %505 = vector.load %arg20[%c0_355, %c0_356] : memref<2x8xf32, #tpu.memory_space<vmem>>, vector<2x8xf32>
    %cst_357 = arith.constant dense<0.000000e+00> : vector<2x256xf32>
    %506 = tpu.matmul %505, %504, %cst_357 {dimension_numbers = #tpu.dot_dimension_numbers<[1], [0], [0], [1], [0, 0, 1, 1], [], []>} : vector<2x8xf32>, vector<8x256xf32>, vector<2x256xf32> -> vector<2x256xf32>
    %c0_358 = arith.constant 0 : index
    %c0_359 = arith.constant 0 : index
    %507 = vector.load %arg21[%c0_358, %c0_359] : memref<2x1xf32, #tpu.memory_space<vmem>>, vector<2x1xf32>
    %508 = vector.broadcast %507 : vector<2x1xf32> to vector<2x256xf32>
    %509 = arith.addf %506, %508 : vector<2x256xf32>
    %cst_360 = arith.constant 0.000000e+00 : f32
    %510 = vector.broadcast %cst_360 : f32 to vector<2x256xf32>
    %511 = arith.maximumf %509, %510 : vector<2x256xf32>
    %c0_361 = arith.constant 0 : index
    %c0_362 = arith.constant 0 : index
    %c0_363 = arith.constant 0 : index
    %512 = vector.load %arg22[%c0_361, %c0_362, %c0_363] : memref<1x2x256xf32, #tpu.memory_space<vmem>>, vector<1x2x256xf32>
    %513 = vector.shape_cast %512 : vector<1x2x256xf32> to vector<2x256xf32>
    %514 = vector.shape_cast %511 : vector<2x256xf32> to vector<1x2x256xf32>
    tpu.vector_store %arg22[%c0_361, %c0_362, %c0_363], %514 {strides = array<i32>} : memref<1x2x256xf32, #tpu.memory_space<vmem>>, vector<1x2x256xf32>,
    return
  }
  func.func @transform_0(%arg0: i32) -> (i32, i32, i32) {
    %c0_i32 = arith.constant 0 : i32
    %c0_i32_0 = arith.constant 0 : i32
    %c0_i32_1 = arith.constant 0 : i32
    return %arg0, %c0_i32, %c0_i32_0 : i32, i32, i32
  }
  func.func @transform_1(%arg0: i32) -> (i32, i32, i32, i32) {
    %c0_i32 = arith.constant 0 : i32
    %c0_i32_0 = arith.constant 0 : i32
    %c0_i32_1 = arith.constant 0 : i32
    %c0_i32_2 = arith.constant 0 : i32
    %c0_i32_3 = arith.constant 0 : i32
    return %c0_i32, %c0_i32_0, %c0_i32_1, %c0_i32_2 : i32, i32, i32, i32
  }
  func.func @transform_2(%arg0: i32) -> (i32, i32) {
    %c0_i32 = arith.constant 0 : i32
    %c0_i32_0 = arith.constant 0 : i32
    %c0_i32_1 = arith.constant 0 : i32
    return %c0_i32, %c0_i32_0 : i32, i32
  }
  func.func @transform_3(%arg0: i32) -> (i32, i32) {
    %c0_i32 = arith.constant 0 : i32
    %c0_i32_0 = arith.constant 0 : i32
    %c0_i32_1 = arith.constant 0 : i32
    return %c0_i32, %c0_i32_0 : i32, i32
  }
  func.func @transform_4(%arg0: i32) -> (i32, i32, i32, i32) {
    %c0_i32 = arith.constant 0 : i32
    %c0_i32_0 = arith.constant 0 : i32
    %c0_i32_1 = arith.constant 0 : i32
    %c0_i32_2 = arith.constant 0 : i32
    %c0_i32_3 = arith.constant 0 : i32
    return %c0_i32, %c0_i32_0, %c0_i32_1, %c0_i32_2 : i32, i32, i32, i32
  }
  func.func @transform_5(%arg0: i32) -> (i32, i32) {
    %c0_i32 = arith.constant 0 : i32
    %c0_i32_0 = arith.constant 0 : i32
    %c0_i32_1 = arith.constant 0 : i32
    return %c0_i32, %c0_i32_0 : i32, i32
  }
  func.func @transform_6(%arg0: i32) -> (i32, i32) {
    %c0_i32 = arith.constant 0 : i32
    %c0_i32_0 = arith.constant 0 : i32
    %c0_i32_1 = arith.constant 0 : i32
    return %c0_i32, %c0_i32_0 : i32, i32
  }
  func.func @transform_7(%arg0: i32) -> (i32, i32, i32, i32) {
    %c0_i32 = arith.constant 0 : i32
    %c0_i32_0 = arith.constant 0 : i32
    %c0_i32_1 = arith.constant 0 : i32
    %c0_i32_2 = arith.constant 0 : i32
    %c0_i32_3 = arith.constant 0 : i32
    return %c0_i32, %c0_i32_0, %c0_i32_1, %c0_i32_2 : i32, i32, i32, i32
  }
  func.func @transform_8(%arg0: i32) -> (i32, i32) {
    %c0_i32 = arith.constant 0 : i32
    %c0_i32_0 = arith.constant 0 : i32
    %c0_i32_1 = arith.constant 0 : i32
    return %c0_i32, %c0_i32_0 : i32, i32
  }
  func.func @transform_9(%arg0: i32) -> (i32, i32) {
    %c0_i32 = arith.constant 0 : i32
    %c0_i32_0 = arith.constant 0 : i32
    %c0_i32_1 = arith.constant 0 : i32
    return %c0_i32, %c0_i32_0 : i32, i32
  }
  func.func @transform_10(%arg0: i32) -> (i32, i32) {
    %c0_i32 = arith.constant 0 : i32
    %c0_i32_0 = arith.constant 0 : i32
    %c0_i32_1 = arith.constant 0 : i32
    return %c0_i32, %c0_i32_0 : i32, i32
  }
  func.func @transform_11(%arg0: i32) -> (i32, i32) {
    %c0_i32 = arith.constant 0 : i32
    %c0_i32_0 = arith.constant 0 : i32
    %c0_i32_1 = arith.constant 0 : i32
    return %c0_i32, %c0_i32_0 : i32, i32
  }
  func.func @transform_12(%arg0: i32) -> (i32, i32, i32, i32) {
    %c0_i32 = arith.constant 0 : i32
    %c0_i32_0 = arith.constant 0 : i32
    %c0_i32_1 = arith.constant 0 : i32
    %c0_i32_2 = arith.constant 0 : i32
    %c0_i32_3 = arith.constant 0 : i32
    return %c0_i32, %c0_i32_0, %c0_i32_1, %c0_i32_2 : i32, i32, i32, i32
  }
  func.func @transform_13(%arg0: i32) -> (i32, i32) {
    %c0_i32 = arith.constant 0 : i32
    %c0_i32_0 = arith.constant 0 : i32
    %c0_i32_1 = arith.constant 0 : i32
    return %c0_i32, %c0_i32_0 : i32, i32
  }
  func.func @transform_14(%arg0: i32) -> (i32, i32) {
    %c0_i32 = arith.constant 0 : i32
    %c0_i32_0 = arith.constant 0 : i32
    %c0_i32_1 = arith.constant 0 : i32
    return %c0_i32, %c0_i32_0 : i32, i32
  }
  func.func @transform_15(%arg0: i32) -> (i32, i32) {
    %c0_i32 = arith.constant 0 : i32
    %c0_i32_0 = arith.constant 0 : i32
    %c0_i32_1 = arith.constant 0 : i32
    return %c0_i32, %c0_i32_0 : i32, i32
  }
  func.func @transform_16(%arg0: i32) -> (i32, i32) {
    %c0_i32 = arith.constant 0 : i32
    %c0_i32_0 = arith.constant 0 : i32
    %c0_i32_1 = arith.constant 0 : i32
    return %c0_i32, %c0_i32_0 : i32, i32
  }
  func.func @transform_17(%arg0: i32) -> (i32, i32, i32, i32) {
    %c0_i32 = arith.constant 0 : i32
    %c0_i32_0 = arith.constant 0 : i32
    %c0_i32_1 = arith.constant 0 : i32
    %c0_i32_2 = arith.constant 0 : i32
    %c0_i32_3 = arith.constant 0 : i32
    return %c0_i32, %c0_i32_0, %c0_i32_1, %c0_i32_2 : i32, i32, i32, i32
  }
  func.func @transform_18(%arg0: i32) -> (i32, i32) {
    %c0_i32 = arith.constant 0 : i32
    %c0_i32_0 = arith.constant 0 : i32
    %c0_i32_1 = arith.constant 0 : i32
    return %c0_i32, %c0_i32_0 : i32, i32
  }
  func.func @transform_19(%arg0: i32) -> (i32, i32) {
    %c0_i32 = arith.constant 0 : i32
    %c0_i32_0 = arith.constant 0 : i32
    %c0_i32_1 = arith.constant 0 : i32
    return %c0_i32, %c0_i32_0 : i32, i32
  }
  func.func @transform_20(%arg0: i32) -> (i32, i32) {
    %c0_i32 = arith.constant 0 : i32
    %c0_i32_0 = arith.constant 0 : i32
    %c0_i32_1 = arith.constant 0 : i32
    return %c0_i32, %c0_i32_0 : i32, i32
  }
  func.func @transform_21(%arg0: i32) -> (i32, i32, i32) {
    %c0_i32 = arith.constant 0 : i32
    %c0_i32_0 = arith.constant 0 : i32
    %c0_i32_1 = arith.constant 0 : i32
    return %arg0, %c0_i32, %c0_i32_0 : i32, i32, i32
  }
}

</mosaic_0001>

<bundles_post_ra>
// kernel: unet_forward.1
= control target key start
LH: loop header
LB: loop body
LE: loop exit
PB: predicated region body
PF: predicated region fallthrough
CT: control target
= control target key end

     0   :  { %s8563_s0 = inlined_call_operand.vmem [shape: f32[2,1,256], index: 0, kind: input, shape index: {}]   ;;  %s8564_s1 = inlined_call_operand.vmem [shape: f32[3,3,8,1], index: 1, kind: input, shape index: {}]   ;;  %s8565_s2 = inlined_call_operand.vmem [shape: f32[8,1], index: 2, kind: input, shape index: {}]   ;;  %s8566_s3 = inlined_call_operand.vmem [shape: bf16[256,128], index: 3, kind: input, shape index: {}]   ;;  %s8567_s4 = inlined_call_operand.vmem [shape: f32[3,3,16,8], index: 4, kind: input, shape index: {}]   ;;  %s8568_s5 = inlined_call_operand.vmem [shape: f32[16,1], index: 5, kind: input, shape index: {}]   ;;  %s8569_s6 = inlined_call_operand.vmem [shape: bf16[128,128], index: 6, kind: input, shape index: {}]   ;;  %s8570_s7 = inlined_call_operand.vmem [shape: f32[3,3,32,16], index: 7, kind: input, shape index: {}]   ;;  %s8571_s8 = inlined_call_operand.vmem [shape: f32[32,1], index: 8, kind: input, shape index: {}]   ;;  %s8572_s9 = inlined_call_operand.vmem [shape: bf16[128,128], index: 9, kind: input, shape index: {}]   ;;  %s8573_s10 = inlined_call_operand.vmem [shape: f32[16,32], index: 10, kind: input, shape index: {}]   ;;  %s8574_s11 = inlined_call_operand.vmem [shape: f32[16,1], index: 11, kind: input, shape index: {}]   ;;  %s8575_s12 = inlined_call_operand.vmem [shape: f32[3,3,16,32], index: 12, kind: input, shape index: {}]   ;;  %s8576_s13 = inlined_call_operand.vmem [shape: f32[16,1], index: 13, kind: input, shape index: {}]   ;;  %s8577_s14 = inlined_call_operand.vmem [shape: bf16[128,256], index: 14, kind: input, shape index: {}]   ;;  %s8578_s15 = inlined_call_operand.vmem [shape: f32[8,16], index: 15, kind: input, shape index: {}]   ;;  %s8579_s16 = inlined_call_operand.vmem [shape: f32[8,1], index: 16, kind: input, shape index: {}]   ;;  %s8580_s17 = inlined_call_operand.vmem [shape: f32[3,3,8,16], index: 17, kind: input, shape index: {}]   ;;  %s8581_s18 = inlined_call_operand.vmem [shape: f32[8,1], index: 18, kind: input, shape index: {}]   ;;  %s8582_s19 = inlined_call_operand.vmem [shape: f32[2,8], index: 19, kind: input, shape index: {}]   ;;  %s8583_s20 = inlined_call_operand.vmem [shape: f32[2,1], index: 20, kind: input, shape index: {}]   ;;  %s8584_s21 = inlined_call_operand.vmem [shape: f32[2,2,256], index: 21, kind: output, shape index: {}]  }
   0x1   :  { %8622 = sst [smem:[#allocation3_spill]] %s8563_s0 }
   0x2   :  { %8623 = sst [smem:[#allocation4_spill]] %s8564_s1 }
   0x3   :  { %8624 = sst [smem:[#allocation5_spill]] %s8565_s2  ;;  %s7416_s2 = smov 0  }
   0x4   :  { %8625 = sst [smem:[#allocation6_spill]] %s8566_s3 }
   0x5   :  { %8626 = sst [smem:[#allocation7_spill]] %s8567_s4 }
   0x6   :  { %8627 = sst [smem:[#allocation8_spill]] %s8568_s5 }
   0x7   :  { %8628 = sst [smem:[#allocation9_spill]] %s8569_s6 }
   0x8   :  { %8629 = sst [smem:[#allocation10_spill]] %s8570_s7 }
   0x9 LB: > { %8630 = sst [smem:[#allocation2_spill]] %s7282_s2  ;;  %s5931_s25 = sadd.s32 4294967295, %s7282_s2   ;;  %s7282_s2 = sphi %s7416_s2, %s31_s2  }
   0xa   : > { %p5935_p0 = scmp.ge.s32.totalorder %s7282_s2, 1  ;;  %p586_p1 = scmp.lt.s32.totalorder %s7282_s2, 3 }
   0xc   : > { %p587_p2 = pnand %p5935_p0, %p586_p1 }
   0xd   : > { %p645_p3 = scmp.lt.s32.totalorder (!%p587_p2), %s5931_s25, 1  ;;  %v655_v0 = vlaneseq (!%p587_p2)  ;;  %v7284_v1 = vmov (!%p587_p2), 0.0   ;;  %s8631_s28 = sld [smem:[#allocation3_spill]] (!%p587_p2)  ;;  %v7293_v9 = vmov (!%p587_p2), 0   ;;  %vm716_vm5 = vcmask (!%p587_p2), 1040384  }
   0xe   : > { %590 = sbr.rel (%p587_p2) target bundleno = 3819 (0xeeb), region = 104  ;;  %787 = vmatprep.mubr.f32.mxu0 (!%p587_p2), %v7284_v1  ;;  %s8595_s0 = smov (!%p587_p2), 16   ;;  %7250 = vset.pattern.permute.xlu0 (!%p587_p2), %v7293_v9  ;;  %vm712_vm6 = vcmask (!%p587_p2), 7168  }
   0xf   : > { %v680_v2 = vshrl.u32 (!%p587_p2), %v655_v0, 7  ;;  %s8593_s4 = smov (!%p587_p2), 17   ;;  %s8591_s30 = smov (!%p587_p2), 15   ;;  %7251 = vset.pattern.permute.xlu1 (!%p587_p2), %v7293_v9  ;;  %v7470_v10 = vand.u32 (!%p587_p2), 127, %v655_v0 }
  0x10   : > { %s8597_s5 = smov (!%p587_p2), 1   ;;  %s8601_s22 = smov (!%p587_p2), 127  }
  0x11   : > { %v681_v3 = vsub.s32 (!%p587_p2), 0, %v680_v2  ;;  %v685_v4 = vsub.s32 (!%p587_p2), 1, %v680_v2  ;;  %s8589_s23 = smov (!%p587_p2), 113   ;;  %s8603_s1 = smov (!%p587_p2), 112   ;;  %v7473_v11 = vadd.s32 (!%p587_p2), 128, %v7470_v10  ;;  %v7476_v12 = vand.u32 (!%p587_p2), 15, %v7470_v10 }
  0x12   : > { %s8599_s24 = smov (!%p587_p2), 111   ;;  %s8632_s3 = sld [smem:[#allocation5_spill]] (!%p587_p2)  ;;  %v660_v13 = vand.u32 (!%p587_p2), 255, %v7470_v10  ;;  %vm705_vm3 = vcmp.lt.s32.totalorder (!%p587_p2), %v7470_v10, 16  ;;  %vm693_vm4 = vcmp.lt.s32.totalorder (!%p587_p2), %v7470_v10, 17  ;;  %vm878_vm9 = vcmp.lt.s32.totalorder (!%p587_p2), %v7470_v10, 15 }
  0x13   : > { %v659_v14 = vand.u32 (!%p587_p2), 15, %v7473_v11  ;;  %vm662_vm0 = vcmp.ge.s32.totalorder (!%p587_p2), %v7476_v12, 1  ;;  %vm666_vm7 = vcmp.le.s32.totalorder (!%p587_p2), %v7476_v12, 14  ;;  %vm973_vm10 = vcmp.lt.s32.totalorder (!%p587_p2), %v7470_v10, 1  ;;  %s8614_s27 = smov (!%p587_p2), 119   ;;  %s8640_s6 = sld [smem:[#allocation9_spill]] (!%p587_p2) }
  0x14   : > { %vm670_vm1 = vcmp.ge.s32.totalorder (!%p587_p2), %v660_v13, 16  ;;  %v7482_v15 = vsel (!%p587_p2), %vm662_vm0, 1.0, %v7284_v1  ;;  %v7514_v31 = vsel (!%p587_p2), %vm666_vm7, 1.0, %v7284_v1  ;;  %vm1148_vm11 = vcmp.lt.s32.totalorder (!%p587_p2), %v7470_v10, 127  ;;  %s8643_s7 = sld [smem:[#allocation10_spill]] (!%p587_p2)  ;;  %s8644_s2 = smov (!%p587_p2), 8  }
  0x15   : > { %s8655_s25 = smov (!%p645_p3, %s5931_s25), 1  ;;  %v7485_v16 = vsel %vm670_vm1, 1.0, %v7284_v1  ;;  %vm663_vm2 = vcmp.ge.s32.totalorder %v659_v14, 1  ;;  %vm667_vm8 = vcmp.le.s32.totalorder %v659_v14, 14  ;;  %v661_v50 = vand.u32 255, %v7473_v11 }
  0x16   : > { %s5936_s26 = sshll.u32 %s8655_s25, 1  ;;  %v7491_v19 = vmul.f32 %v7485_v16, %v7482_v15  ;;  %v7494_v20 = vsel %vm663_vm2, 1.0, %v7284_v1  ;;  %v7517_v32 = vsel %vm667_vm8, 1.0, %v7284_v1  ;;  %v7528_v36 = vmul.f32 %v7485_v16, %v7514_v31 }
  0x17   : > { %s648_s29 = scalar_lea.vmem %s8631_s28, %s5936_s26  ;;  %s8633_s26 = sld [smem:[#allocation4_spill]]  ;;  %vm675_vm12 = vcmp.lt.s32.totalorder %v661_v50, 240  ;;  %vm1241_vm13 = vcmp.lt.s32.totalorder %v7470_v10, 113  ;;  %vm1336_vm14 = vcmp.lt.s32.totalorder %v7470_v10, 112  ;;  %vm1429_vm15 = vcmp.lt.s32.totalorder %v7470_v10, 111 }
  0x18   : > { %v654_v5 = vld [vmem:[%s648_s29] sm:$0x3]  ;;  %v7566_v54 = vsel %vm675_vm12, 1.0, %v7284_v1  ;;  %s8635_s28 = smov 127   ;;  %vm1710_vm0 = vcmask 64512   ;;  %s8607_s29 = smov 8  }
  0x19   : > { %v7431_v6 = vrot.slane %v654_v5, %v681_v3  ;;  %v7437_v7 = vrot.slane %v654_v5, %v685_v4  ;;  %v1520_v8 = vld [vmem:[%s8632_s3] sm:$0xff]  ;;  %v7578_v58 = vmul.f32 %v7566_v54, %v7494_v20  ;;  %v7608_v9 = vmul.f32 %v7566_v54, %v7517_v32  ;;  %s8616_s3 = smov 120  }
  0x1a   : > { %vm2668_vm7 = vcmask 130048   ;;  %vm2642_vm12 = vcmp.ge.s32.totalorder %v7476_v12, 4 }
  0x1b   : > { %701 = vrot.lane.b32.xlu0 %v7431_v6, %s8595_s0  ;;  %689 = vrot.lane.b32.xlu1 %v7431_v6, %s8593_s4 }
  0x1d   : > { %v5939_v30 = vld [vmem:[%s8633_s26 + $0x8] sm:$0xff]  ;;  %v700_v43 = vld [vmem:[%s8633_s26] sm:$0xff]  ;;  %v5946_v47 = vld [vmem:[%s8633_s26 + $0x10] sm:$0xff] }
  0x1e   : > { %v5950_v52 = vld [vmem:[%s8633_s26 + $0x18] sm:$0xff]  ;;  %v5954_v61 = vld [vmem:[%s8633_s26 + $0x20] sm:$0xff]  ;;  %v5958_v5 = vld [vmem:[%s8633_s26 + $0x28] sm:$0xff] }
  0x1f   : > { %703 = vrot.lane.b32.xlu0 %v7437_v7, %s8595_s0  ;;  %691 = vrot.lane.b32.xlu1 %v7437_v7, %s8593_s4  ;;  %v5962_v13 = vld [vmem:[%s8633_s26 + $0x30] sm:$0xff]  ;;  %s8634_s4 = sld [smem:[#allocation6_spill]]  ;;  %s8609_s0 = smov 7  }
  0x23   : > { %876 = vrot.lane.b32.xlu1 %v7437_v7, %s8591_s30  ;;  %874 = vrot.lane.b32.xlu0 %v7431_v6, %s8591_s30  ;;  %s8638_s30 = smov 1  }
  0x27   : > { %971 = vrot.lane.b32.xlu1 %v7437_v7, %s8597_s5  ;;  %969 = vrot.lane.b32.xlu0 %v7431_v6, %s8597_s5  ;;  %s8612_s5 = smov 121  }
  0x2b   : > { %1146 = vrot.lane.b32.xlu1 %v7437_v7, %s8601_s22  ;;  %1144 = vrot.lane.b32.xlu0 %v7431_v6, %s8601_s22  ;;  %s8605_s22 = smov 9  }
  0x2f   : > { %1239 = vrot.lane.b32.xlu1 %v7437_v7, %s8589_s23  ;;  %1237 = vrot.lane.b32.xlu0 %v7431_v6, %s8589_s23  ;;  %s8636_s23 = smov 111  }
  0x33   : > { %1334 = vrot.lane.b32.xlu1 %v7437_v7, %s8603_s1  ;;  %1332 = vrot.lane.b32.xlu0 %v7431_v6, %s8603_s1 }
  0x37   : > { %1427 = vrot.lane.b32.xlu1 %v7437_v7, %s8599_s24  ;;  %1425 = vrot.lane.b32.xlu0 %v7431_v6, %s8599_s24  ;;  %s8637_s24 = sld [smem:[#allocation7_spill]] }
  0x3b   : > { %1523 = vperm.xlu0 %7250, %v1520_v8  }
  0x8d   : > { %v702_v17 = vpop.permute.xlu0 %701  ;;  %v690_v18 = vpop.permute.xlu1 %689 }
  0x91   : > { %v704_v21 = vpop.permute.xlu0 %703  ;;  %v692_v22 = vpop.permute.xlu1 %691 }
  0x92   : > { %v707_v23 = vsel %vm705_vm3, %v704_v21, %v702_v17  ;;  %v694_v24 = vsel %vm693_vm4, %v690_v18, %v692_v22  ;;  %v695_v25 = vsel %vm693_vm4, %v692_v22, %v690_v18  ;;  %v706_v26 = vsel %vm705_vm3, %v702_v17, %v704_v21  ;;  %v5966_v22 = vld [vmem:[%s8633_s26 + $0x38] sm:$0xff] }
  0x93   : > { %v698_v27 = vmul.f32 %v7491_v19, %v695_v25  ;;  %v699_v28 = vmul.f32 %v694_v24, %v7494_v20  ;;  %5940 = vmatprep.subr.msk.mxu0 %vm716_vm5, %v706_v26  ;;  %v708_v29 = vmul.f32 %v707_v23, %v7485_v16  ;;  %v5970_v23 = vld [vmem:[%s8633_s26 + $0x40] sm:$0xff]  ;;  %v6271_v26 = vld [vmem:[%s8634_s4 + $0x48] sm:$0xff]   ;;  %s7302_s26 = smov 4  }
  0x94   : > { %v6270_v24 = vld [vmem:[%s8634_s4 + $0x40] sm:$0xff]  }
  0x95   : > { %5941 = vmatpush1.msk.msra.mxu0 %vm716_vm5, %v708_v29  ;;  %v877_v33 = vpop.permute.xlu1 %876  ;;  %v875_v34 = vpop.permute.xlu0 %874  ;;  %v6136_v25 = vld [vmem:[%s8634_s4] sm:$0xff]   ;;  %6825 = vmatprep.subr.bf16.mxu1 %v6270_v24  ;;  %v6264_v29 = vld [vmem:[%s8634_s4 + $0x10] sm:$0xff]  }
  0x96   : > { %5942 = vmatmul.mubr.msk.f32.vlgmr.msra.gmra.mrb[0].mxu0 %vm712_vm6, %v5939_v30  ;;  %5943 = vmatprep.subr.msk.mxu0 %vm716_vm5, %v699_v28  ;;  %v879_v35 = vsel %vm878_vm9, %v875_v34, %v877_v33  ;;  %v880_v38 = vsel %vm878_vm9, %v877_v33, %v875_v34  ;;  %v6272_v28 = vld [vmem:[%s8634_s4 + $0x50] sm:$0xff]   ;;  %v6273_v30 = vld [vmem:[%s8634_s4 + $0x58] sm:$0xff]   ;;  %v6274_v34 = vld [vmem:[%s8634_s4 + $0x60] sm:$0xff]  }
  0x97   : > { %5944 = vmatpush1.msk.msra.mxu0 %vm716_vm5, %v698_v27  ;;  %867 = vmatprep.mubr.f32.mxu0 %v7284_v1  ;;  %v884_v37 = vmul.f32 %v879_v35, %v7517_v32  ;;  %v883_v42 = vmul.f32 %v7528_v36, %v880_v38  ;;  %v6263_v27 = vld [vmem:[%s8634_s4 + $0x8] sm:$0xff]   ;;  %v6265_v33 = vld [vmem:[%s8634_s4 + $0x18] sm:$0xff]   ;;  %v6266_v35 = vld [vmem:[%s8634_s4 + $0x20] sm:$0xff]  }
  0x98   : > { %6827 = vmatpush3.bf16.msra.mxu1 %v6136_v25  ;;  %v6267_v38 = vld [vmem:[%s8634_s4 + $0x28] sm:$0xff]  }
  0x99   : > { %5947 = vmatprep.subr.msk.mxu0 %vm716_vm5, %v884_v37  ;;  %v972_v39 = vpop.permute.xlu1 %971  ;;  %v970_v40 = vpop.permute.xlu0 %969  ;;  %6829 = vmatprep.subr.bf16.mxu1 %v6271_v26  ;;  %v6275_v37 = vld [vmem:[%s8634_s4 + $0x68] sm:$0xff]  }
  0x9a   : > { %v974_v41 = vsel %vm973_vm10, %v970_v40, %v972_v39  ;;  %v975_v45 = vsel %vm973_vm10, %v972_v39, %v970_v40 }
  0x9b   : > { %v977_v44 = vmul.f32 %v974_v41, %v7494_v20  ;;  %v976_v46 = vmul.f32 %v975_v45, %v7482_v15 }
  0x9c   : > { %6831 = vmatpush3.bf16.msra.mxu1 %v6263_v27 }
  0x9d   : > { %v1147_v48 = vpop.permute.xlu1 %1146  ;;  %v1145_v49 = vpop.permute.xlu0 %1144  ;;  %6833 = vmatprep.subr.bf16.mxu1 %v6272_v28 }
  0x9e   : > { %5945 = vmatmul.mubr.msk.f32.vlgmr.msra.gmra.mrb[0].mxu0 %vm712_vm6, %v700_v43  ;;  %v1150_v51 = vsel %vm1148_vm11, %v1147_v48, %v1145_v49  ;;  %v1149_v57 = vsel %vm1148_vm11, %v1145_v49, %v1147_v48  ;;  %v6276_v43 = vld [vmem:[%s8634_s4 + $0x70] sm:$0xff]   ;;  %v6269_v48 = vld [vmem:[%s8634_s4 + $0x38] sm:$0xff]  }
  0x9f   : > { %5948 = vmatpush1.msk.msra.mxu0 %vm716_vm5, %v883_v42  ;;  %960 = vmatprep.mubr.f32.mxu0 %v7284_v1  ;;  %v1152_v53 = vmul.f32 %v1150_v51, %v7517_v32  ;;  %v1151_v60 = vmul.f32 %v1149_v57, %v7514_v31 }
  0xa0   : > { %5951 = vmatprep.subr.msk.mxu0 %vm716_vm5, %v977_v44  ;;  %6835 = vmatpush3.bf16.msra.mxu1 %v6264_v29  ;;  %v6268_v44 = vld [vmem:[%s8634_s4 + $0x30] sm:$0xff]  }
  0xa1   : > { %v1240_v55 = vpop.permute.xlu1 %1239  ;;  %v1238_v56 = vpop.permute.xlu0 %1237  ;;  %6837 = vmatprep.subr.bf16.mxu1 %v6273_v30  ;;  %v5975_v30 = vld [vmem:[%s8637_s24 + $0x18] sm:$0xff] }
  0xa2   : > { %v1243_v59 = vsel %vm1241_vm13, %v1240_v55, %v1238_v56  ;;  %v1242_v2 = vsel %vm1241_vm13, %v1238_v56, %v1240_v55 }
  0xa3   : > { %v1247_v62 = vmul.f32 %v7578_v58, %v1243_v59  ;;  %v1246_v4 = vmul.f32 %v1242_v2, %v7482_v15 }
  0xa4   : > { %6839 = vmatpush3.bf16.msra.mxu1 %v6265_v33 }
  0xa5   : > { %v1335_v63 = vpop.permute.xlu1 %1334  ;;  %v1333_v0 = vpop.permute.xlu0 %1332  ;;  %6841 = vmatprep.subr.bf16.mxu1 %v6274_v34  ;;  %v1702_v34 = vld [vmem:[%s8637_s24] sm:$0xff] }
  0xa6   : > { %5949 = vmatmul.mubr.msk.f32.vlgmr.msra.gmra.mrb[0].mxu0 %vm712_vm6, %v5946_v47  ;;  %v1338_v3 = vsel %vm1336_vm14, %v1335_v63, %v1333_v0  ;;  %v1337_v14 = vsel %vm1336_vm14, %v1333_v0, %v1335_v63  ;;  %v6277_v47 = vld [vmem:[%s8634_s4 + $0x78] sm:$0xff]   ;;  %s7300_s4 = smov 3  }
  0xa7   : > { %5952 = vmatpush1.msk.msra.mxu0 %vm716_vm5, %v976_v46  ;;  %1053 = vmatprep.mubr.f32.mxu0 %v7284_v1 }
  0xa8   : > { %5955 = vmatprep.subr.msk.mxu0 %vm716_vm5, %v7437_v7  ;;  %6843 = vmatpush3.bf16.msra.mxu1 %v6266_v35 }
  0xa9   : > { %v1428_v7 = vpop.permute.xlu1 %1427  ;;  %v1426_v8 = vpop.permute.xlu0 %1425  ;;  %6845 = vmatprep.subr.bf16.mxu1 %v6275_v37 }
  0xaa   : > { %v1431_v11 = vsel %vm1429_vm15, %v1428_v7, %v1426_v8  ;;  %v1430_v18 = vsel %vm1429_vm15, %v1426_v8, %v1428_v7  ;;  %v5974_v7 = vld [vmem:[%s8637_s24 + $0x10] sm:$0xff] }
  0xab   : > { %v1435_v17 = vmul.f32 %v7608_v9, %v1431_v11  ;;  %v1434_v21 = vmul.f32 %v1430_v18, %v7514_v31  ;;  %v1688_v18 = vand.u32 7, %v7470_v10 }
  0xac   : > { %6847 = vmatpush3.bf16.msra.mxu1 %v6267_v38 }
  0xad   : > { %6849 = vmatprep.subr.bf16.mxu1 %v6276_v43  ;;  %vm1690_vm1 = vcmp.ge.s32.totalorder %v1688_v18, 1  ;;  %v5984_v43 = vld [vmem:[%s8637_s24 + $0x30] sm:$0xff] }
  0xae   : > { %5953 = vmatmul.mubr.msk.f32.vlgmr.msra.gmra.mrb[0].mxu0 %vm712_vm6, %v5950_v52 }
  0xaf   : > { %5956 = vmatpush1.msk.msra.mxu0 %vm716_vm5, %v7431_v6  ;;  %1135 = vmatprep.mubr.f32.mxu0 %v7284_v1  ;;  %v1340_v6 = vmul.f32 %v1338_v3, %v7566_v54 }
  0xb0   : > { %5959 = vmatprep.subr.msk.mxu0 %vm716_vm5, %v1152_v53  ;;  %6851 = vmatpush3.bf16.msra.mxu1 %v6268_v44 }
  0xb1   : > { %6853 = vmatprep.subr.bf16.mxu1 %v6277_v47  ;;  %v5988_v47 = vld [vmem:[%s8637_s24 + $0x40] sm:$0xff] }
  0xb4   : > { %6855 = vmatpush3.bf16.msra.mxu1 %v6269_v48 }
  0xb6   : > { %5957 = vmatmul.mubr.msk.f32.vlgmr.msra.gmra.mrb[0].mxu0 %vm712_vm6, %v5954_v61 }
  0xb7   : > { %5960 = vmatpush1.msk.msra.mxu0 %vm716_vm5, %v1151_v60  ;;  %1228 = vmatprep.mubr.f32.mxu0 %v7284_v1 }
  0xb8   : > { %5963 = vmatprep.subr.msk.mxu0 %vm716_vm5, %v1247_v62 }
  0xba   : > { %v1524_v39 = vpop.permute.xlu0 %1523 }
  0xbe   : > { %5961 = vmatmul.mubr.msk.f32.vlgmr.msra.gmra.mrb[0].mxu0 %vm712_vm6, %v5958_v5 }
  0xbf   : > { %5964 = vmatpush1.msk.msra.mxu0 %vm716_vm5, %v1246_v4  ;;  %1323 = vmatprep.mubr.f32.mxu0 %v7284_v1 }
  0xc0   : > { %5967 = vmatprep.subr.msk.mxu0 %vm716_vm5, %v1340_v6 }
  0xc6   : > { %5965 = vmatmul.mubr.msk.f32.vlgmr.msra.gmra.mrb[0].mxu0 %vm712_vm6, %v5962_v13 }
  0xc7   : > { %5968 = vmatpush1.msk.msra.mxu0 %vm716_vm5, %v1337_v14  ;;  %1416 = vmatprep.mubr.f32.mxu0 %v7284_v1 }
  0xc8   : > { %5971 = vmatprep.subr.msk.mxu0 %vm716_vm5, %v1435_v17 }
  0xce   : > { %5969 = vmatmul.mubr.msk.f32.vlgmr.msra.gmra.mrb[0].mxu0 %vm712_vm6, %v5966_v22  ;;  %v7762_v22 = vsel %vm1690_vm1, 1.0, %v7284_v1 }
  0xcf   : > { %5972 = vmatpush1.msk.msra.mxu0 %vm716_vm5, %v1434_v21  ;;  %1511 = vmatprep.mubr.f32.mxu0 %v7284_v1  ;;  %v1689_v21 = vand.u32 63, %v7470_v10  ;;  %vm1692_vm5 = vcmp.le.s32.totalorder %v1688_v18, 6  ;;  %v6200_v18 = vld [vmem:[%s8640_s6] sm:$0xff]  }
  0xd0   : > { %v7768_v24 = vsel %vm1692_vm5, 1.0, %v7284_v1  ;;  %6857 = vmatprep.subr.bf16.mxu0 %v6200_v18  ;;  %vm3807_vm5 = vcmask 261120  }
  0xd1   : > { %vm1694_vm2 = vcmp.ge.s32.totalorder %v1689_v21, 8 }
  0xd6   : > { %5973 = vmatmul.mubr.msk.f32.vlgmr.msra.gmra.mrb[0].mxu0 %vm712_vm6, %v5970_v23  ;;  %v7765_v23 = vsel %vm1694_vm2, 1.0, %v7284_v1  ;;  %vm1696_vm6 = vcmp.lt.s32.totalorder %v1689_v21, 56  ;;  %v6278_v21 = vld [vmem:[%s8640_s6 + $0x8] sm:$0xff]   ;;  %vm2644_vm2 = vcmp.lt.s32.totalorder %v7476_v12, 12 }
  0xd7   : > { %v7772_v25 = vmul.f32 %v7765_v23, %v7762_v22  ;;  %v7777_v29 = vmul.f32 %v7765_v23, %v7768_v24  ;;  %6859 = vmatpush3.bf16.msra.mxu0 %v6200_v18  ;;  %v6008_v18 = vld [vmem:[%s8643_s7 + $0x20] sm:$0xff]  ;;  %v6029_v12 = vld [vmem:[%s8643_s7 + $0x68] sm:$0xff] }
  0xd8   : > { %6861 = vmatprep.subr.bf16.mxu0 %v6278_v21 }
  0xdb   : > { %6863 = vmatpush3.bf16.msra.mxu0 %v6278_v21  ;;  %v3645_v21 = vld [vmem:[%s8571_s8 + $0x8] sm:$0xff] }
 0x1a9   : > { %v1513_v40 = vpop.f32.mrb[0].mxu0 }
 0x1aa   : > { %v1526_v41 = vadd.f32 %v1524_v39, %v1513_v40  ;;  %v1515_v42 = vpop.f32.mrb[1].mxu0  ;;  %v5980_v40 = vld [vmem:[%s8637_s24 + $0x20] sm:$0xff] }
 0x1ab   : > { %v1527_v46 = vadd.f32 %v1524_v39, %v1515_v42  ;;  %v1703_v39 = vld [vmem:[%s8637_s24 + $0x8] sm:$0xff] }
 0x1ac   : > { %v7677_v45 = vmax.f32 %v1526_v41, 0.0  ;;  %v5981_v42 = vld [vmem:[%s8637_s24 + $0x28] sm:$0xff] }
 0x1ad   : > { %v7689_v49 = vmax.f32 %v1527_v46, 0.0  ;;  %v5985_v46 = vld [vmem:[%s8637_s24 + $0x38] sm:$0xff] }
 0x1ae   : > { %1538 = vrot.lane.b32.xlu0 %v7677_v45, %s8603_s1  ;;  %1530 = vrot.lane.b32.xlu1 %v7677_v45, %s8635_s28 }
 0x1b2   : > { %1544 = vrot.lane.b32.xlu0 %v7677_v45, %s8636_s23  ;;  %1532 = vrot.lane.b32.xlu1 %v7689_v49, %s8635_s28 }
 0x1b6   : > { %1540 = vrot.lane.b32.xlu1 %v7689_v49, %s8603_s1  ;;  %s7301_s1 = smov 125  }
 0x1ba   : > { %1546 = vrot.lane.b32.xlu1 %v7689_v49, %s8636_s23 }
 0x220   : > { %v1531_v50 = vpop.permute.xlu1 %1530  ;;  %v1539_v52 = vpop.permute.xlu0 %1538 }
 0x224   : > { %v1533_v51 = vpop.permute.xlu1 %1532  ;;  %v1545_v57 = vpop.permute.xlu0 %1544 }
 0x225   : > { %v7701_v55 = vsel %vm1148_vm11, %v1531_v50, %v1533_v51  ;;  %v7705_v56 = vsel %vm1148_vm11, %v1533_v51, %v1531_v50  ;;  %v7816_v50 = vsel %vm1696_vm6, 1.0, %v7284_v1 }
 0x226   : > { %v1536_v0 = vmax.f32 %v7677_v45, %v7701_v55  ;;  %v1537_v3 = vmax.f32 %v7689_v49, %v7705_v56  ;;  %v7822_v51 = vmul.f32 %v7816_v50, %v7762_v22 }
 0x228   : > { %v1541_v53 = vpop.permute.xlu1 %1540 }
 0x229   : > { %v7709_v60 = vsel %vm1336_vm14, %v1539_v52, %v1541_v53  ;;  %v7713_v61 = vsel %vm1336_vm14, %v1541_v53, %v1539_v52  ;;  %v5989_v53 = vld [vmem:[%s8637_s24 + $0x48] sm:$0xff] }
 0x22c   : > { %v1547_v59 = vpop.permute.xlu1 %1546 }
 0x22d   : > { %v7717_v62 = vsel %vm1429_vm15, %v1545_v57, %v1547_v59  ;;  %v7721_v63 = vsel %vm1429_vm15, %v1547_v59, %v1545_v57  ;;  %v5992_v57 = vld [vmem:[%s8637_s24 + $0x50] sm:$0xff] }
 0x22e   : > { %v1550_v2 = vmax.f32 %v7709_v60, %v7717_v62  ;;  %v1551_v4 = vmax.f32 %v7713_v61, %v7721_v63 }
 0x230   : > { %v1553_v5 = vmax.f32 %v1537_v3, %v1551_v4  ;;  %v1552_v6 = vmax.f32 %v1536_v0, %v1550_v2  ;;  %v5993_v2 = vld [vmem:[%s8637_s24 + $0x58] sm:$0xff]  ;;  %v5996_v3 = vld [vmem:[%s8637_s24 + $0x60] sm:$0xff] }
 0x232   : > { %1682 = vmatprep.mubr.f32.mxu1 %v1553_v5  ;;  %v7844_v5 = vmul.f32 %v7816_v50, %v7768_v24 }
 0x233   : > { %1683 = vmatmul.mubr.f32.vlgmr.msra.gmra.mrb[0].mxu1 %v1552_v6 }
 0x234   : > { %6508 = vmatprep.mubr.msk.f32.mxu1 %vm1710_vm0, %v5974_v7  ;;  %v5997_v7 = vld [vmem:[%s8637_s24 + $0x68] sm:$0xff] }
 0x306   : > { %v6324_v8 = vpop.f32.mrb[0].mxu1 }
 0x307   : > { %v6325_v11 = vpop.f32.mrb[1].mxu1 }
 0x308   : > { %v7735_v13 = vadd.f32 %v6325_v11, %v6324_v8  ;;  %v6000_v8 = vld [vmem:[%s8637_s24 + $0x70] sm:$0xff] }
 0x30a   : > { %1698 = vrot.lane.b32.xlu1 %v7735_v13, %s8605_s22  ;;  %1704 = vrot.lane.b32.xlu0 %v7735_v13, %s8607_s29  ;;  %s8639_s29 = sld [smem:[#allocation8_spill]]  ;;  %s8641_s22 = smov 120  }
 0x30e   : > { %1963 = vrot.lane.b32.xlu1 %v7735_v13, %s8638_s30  ;;  %1873 = vrot.lane.b32.xlu0 %v7735_v13, %s8609_s0  ;;  %s8642_s0 = smov 119  }
 0x310   : > { %v2496_v14 = vld [vmem:[%s8639_s29] sm:$0xff]  ;;  %v2497_v17 = vld [vmem:[%s8639_s29 + $0x8] sm:$0xff]  ;;  %s8645_s29 = smov 9  }
 0x312   : > { %2227 = vrot.lane.b32.xlu1 %v7735_v13, %s8612_s5  ;;  %2138 = vrot.lane.b32.xlu0 %v7735_v13, %s8635_s28 }
 0x316   : > { %2406 = vrot.lane.b32.xlu1 %v7735_v13, %s8614_s27  ;;  %2317 = vrot.lane.b32.xlu0 %v7735_v13, %s8616_s3  ;;  %s7303_s27 = smov 124  }
 0x31a   : > { %2500 = vperm.xlu0 %7250, %v2496_v14   ;;  %2505 = vperm.xlu1 %7251, %v2497_v17   ;;  %v6004_v14 = vld [vmem:[%s8637_s24 + $0x80] sm:$0xff]  ;;  %v6005_v17 = vld [vmem:[%s8637_s24 + $0x88] sm:$0xff] }
 0x37c   : > { %v1699_v26 = vpop.permute.xlu1 %1698  ;;  %v1705_v27 = vpop.permute.xlu0 %1704 }
 0x37d   : > { %v1706_v28 = vmul.f32 %v1705_v27, %v7765_v23  ;;  %v1701_v33 = vmul.f32 %v7772_v25, %v1699_v26  ;;  %v6279_v26 = vld [vmem:[%s8640_s6 + $0x10] sm:$0xff]   ;;  %v6280_v27 = vld [vmem:[%s8640_s6 + $0x18] sm:$0xff]  }
 0x37e   : > { %6865 = vmatprep.subr.bf16.mxu0 %v6279_v26 }
 0x37f   : > { %6506 = vmatprep.subr.mxu1 %v1706_v28  ;;  %6867 = vmatpush3.bf16.msra.mxu0 %v6279_v26  ;;  %v3644_v26 = vld [vmem:[%s8571_s8] sm:$0xff] }
 0x380   : > { %6507 = vmatpush3.msra.mxu1 %v1706_v28  ;;  %v1874_v35 = vpop.permute.xlu0 %1873  ;;  %v1964_v38 = vpop.permute.xlu1 %1963  ;;  %6869 = vmatprep.subr.bf16.mxu0 %v6280_v27  ;;  %v6281_v28 = vld [vmem:[%s8640_s6 + $0x20] sm:$0xff]  }
 0x381   : > { %v1876_v37 = vmul.f32 %v7777_v29, %v1874_v35  ;;  %6509 = vmatmul.mubr.msk.f32.vlgmr.msra.gmra.mrb[2].mxu1 %vm1710_vm0, %v5975_v30  ;;  %6511 = vmatprep.subr.mxu1 %v1701_v33  ;;  %v1965_v41 = vmul.f32 %v1964_v38, %v7762_v22  ;;  %v6282_v30 = vld [vmem:[%s8640_s6 + $0x28] sm:$0xff]  }
 0x382   : > { %6512 = vmatpush3.msra.mxu1 %v1701_v33  ;;  %6513 = vmatprep.mubr.msk.f32.mxu1 %vm1710_vm0, %v1702_v34  ;;  %v6283_v33 = vld [vmem:[%s8640_s6 + $0x30] sm:$0xff]  }
 0x383   : > { %6516 = vmatprep.subr.mxu1 %v1876_v37  ;;  %6871 = vmatpush3.bf16.msra.mxu0 %v6280_v27  ;;  %v3647_v27 = vld [vmem:[%s8571_s8 + $0x18] sm:$0xff] }
 0x384   : > { %v2139_v44 = vpop.permute.xlu0 %2138  ;;  %v2228_v52 = vpop.permute.xlu1 %2227  ;;  %6873 = vmatprep.subr.bf16.mxu0 %v6281_v28 }
 0x385   : > { %v2140_v48 = vmul.f32 %v2139_v44, %v7768_v24  ;;  %v2230_v59 = vmul.f32 %v7822_v51, %v2228_v52 }
 0x387   : > { %6875 = vmatpush3.bf16.msra.mxu0 %v6281_v28  ;;  %v3646_v28 = vld [vmem:[%s8571_s8 + $0x10] sm:$0xff] }
 0x388   : > { %v2318_v0 = vpop.permute.xlu0 %2317  ;;  %v2407_v6 = vpop.permute.xlu1 %2406  ;;  %6877 = vmatprep.subr.bf16.mxu0 %v6282_v30 }
 0x389   : > { %6514 = vmatmul.mubr.msk.f32.vlgmr.msra.gmra.mrb[2].mxu1 %vm1710_vm0, %v1703_v39  ;;  %v2319_v4 = vmul.f32 %v2318_v0, %v7816_v50  ;;  %v2409_v11 = vmul.f32 %v7844_v5, %v2407_v6 }
 0x38a   : > { %6517 = vmatpush3.msra.mxu1 %v1876_v37  ;;  %6518 = vmatprep.mubr.msk.f32.mxu1 %vm1710_vm0, %v5980_v40  ;;  %v6284_v40 = vld [vmem:[%s8640_s6 + $0x38] sm:$0xff]   ;;  %s7305_s6 = smov 123  }
 0x38b   : > { %6521 = vmatprep.subr.mxu1 %v1965_v41  ;;  %6879 = vmatpush3.bf16.msra.mxu0 %v6282_v30  ;;  %v3796_v30 = vld [vmem:[%s8574_s11 + $0x8] sm:$0xff] }
 0x38c   : > { %6881 = vmatprep.subr.bf16.mxu0 %v6283_v33 }
 0x38f   : > { %6883 = vmatpush3.bf16.msra.mxu0 %v6283_v33  ;;  %v3795_v33 = vld [vmem:[%s8574_s11] sm:$0xff] }
 0x390   : > { %6885 = vmatprep.subr.bf16.mxu0 %v6284_v40 }
 0x391   : > { %6519 = vmatmul.mubr.msk.f32.vlgmr.msra.gmra.mrb[2].mxu1 %vm1710_vm0, %v5981_v42 }
 0x392   : > { %6522 = vmatpush3.msra.mxu1 %v1965_v41  ;;  %6523 = vmatprep.mubr.msk.f32.mxu1 %vm1710_vm0, %v5984_v43 }
 0x393   : > { %6526 = vmatprep.subr.mxu1 %v7735_v13  ;;  %6887 = vmatpush3.bf16.msra.mxu0 %v6284_v40 }
 0x399   : > { %6524 = vmatmul.mubr.msk.f32.vlgmr.msra.gmra.mrb[2].mxu1 %vm1710_vm0, %v5985_v46  ;;  %v2506_v34 = vpop.permute.xlu1 %2505  ;;  %v2501_v37 = vpop.permute.xlu0 %2500 }
 0x39a   : > { %6527 = vmatpush3.msra.mxu1 %v7735_v13  ;;  %6528 = vmatprep.mubr.msk.f32.mxu1 %vm1710_vm0, %v5988_v47  ;;  %v6001_v13 = vld [vmem:[%s8637_s24 + $0x78] sm:$0xff]  ;;  %s8652_s24 = smov 112  }
 0x39b   : > { %6531 = vmatprep.subr.mxu1 %v2140_v48 }
 0x3a1   : > { %6529 = vmatmul.mubr.msk.f32.vlgmr.msra.gmra.mrb[2].mxu1 %vm1710_vm0, %v5989_v53 }
 0x3a2   : > { %6532 = vmatpush3.msra.mxu1 %v2140_v48  ;;  %6533 = vmatprep.mubr.msk.f32.mxu1 %vm1710_vm0, %v5992_v57 }
 0x3a3   : > { %6536 = vmatprep.subr.mxu1 %v2230_v59 }
 0x3a9   : > { %6534 = vmatmul.mubr.msk.f32.vlgmr.msra.gmra.mrb[2].mxu1 %vm1710_vm0, %v5993_v2 }
 0x3aa   : > { %6537 = vmatpush3.msra.mxu1 %v2230_v59  ;;  %6538 = vmatprep.mubr.msk.f32.mxu1 %vm1710_vm0, %v5996_v3 }
 0x3ab   : > { %6541 = vmatprep.subr.mxu1 %v2319_v4 }
 0x3b1   : > { %6539 = vmatmul.mubr.msk.f32.vlgmr.msra.gmra.mrb[2].mxu1 %vm1710_vm0, %v5997_v7 }
 0x3b2   : > { %6542 = vmatpush3.msra.mxu1 %v2319_v4  ;;  %6543 = vmatprep.mubr.msk.f32.mxu1 %vm1710_vm0, %v6000_v8 }
 0x3b3   : > { %6546 = vmatprep.subr.mxu1 %v2409_v11 }
 0x3b9   : > { %6544 = vmatmul.mubr.msk.f32.vlgmr.msra.gmra.mrb[2].mxu1 %vm1710_vm0, %v6001_v13 }
 0x3ba   : > { %6547 = vmatpush3.msra.mxu1 %v2409_v11  ;;  %6548 = vmatprep.mubr.msk.f32.mxu1 %vm1710_vm0, %v6004_v14  ;;  %v6020_v11 = vld [vmem:[%s8643_s7 + $0x40] sm:$0xff] }
 0x3c1   : > { %6549 = vmatmul.mubr.msk.f32.vlgmr.msra.gmra.mrb[2].mxu1 %vm1710_vm0, %v6005_v17 }
 0x3c2   : > { %6590 = vmatprep.mubr.msk.f32.mxu1 %vm2668_vm7, %v6008_v18 }
 0x494   : > { %v6550_v35 = vpop.f32.mrb[2].mxu1 }
 0x495   : > { %v2509_v38 = vadd.f32 %v6550_v35, %v2506_v34  ;;  %v2485_v39 = vpop.f32.mrb[3].mxu1  ;;  %v2637_v34 = vand.u32 3, %v7470_v10  ;;  %v6128_v10 = vld [vmem:[%s8580_s17 + $0x40] sm:$0xff] }
 0x496   : > { %v2508_v41 = vadd.f32 %v2501_v37, %v2485_v39  ;;  %v2643_v37 = vsel %vm2642_vm12, 1.0, %v7284_v1 }
 0x497   : > { %v7891_v42 = vmax.f32 %v2509_v38, 0.0  ;;  %vm2640_vm8 = vcmp.le.s32.totalorder %v2637_v34, 2  ;;  %vm2638_vm1 = vcmp.ge.s32.totalorder %v2637_v34, 1  ;;  %v6030_v34 = vld [vmem:[%s8643_s7 + $0x70] sm:$0xff] }
 0x498   : > { %v7893_v43 = vmax.f32 %v2508_v41, 0.0  ;;  %v7964_v35 = vsel %vm2640_vm8, 1.0, %v7284_v1 }
 0x499   : > { %2514 = vrot.lane.b32.xlu1 %v7891_v42, %s8635_s28  ;;  %v2867_v38 = vmul.f32 %v2643_v37, %v7964_v35 }
 0x49a   : > { %2512 = vrot.lane.b32.xlu0 %v7893_v43, %s8635_s28 }
 0x49d   : > { %2518 = vrot.lane.b32.xlu1 %v7893_v43, %s8641_s22 }
 0x49e   : > { %2522 = vrot.lane.b32.xlu0 %v7893_v43, %s8642_s0 }
 0x4a1   : > { %2524 = vrot.lane.b32.xlu1 %v7891_v42, %s8642_s0 }
 0x4a2   : > { %2520 = vrot.lane.b32.xlu0 %v7891_v42, %s8641_s22 }
 0x50b   : > { %v2515_v44 = vpop.permute.xlu1 %2514 }
 0x50c   : > { %v4367_v46 = vmul.f32 %v2515_v44, %v7768_v24  ;;  %v2513_v47 = vpop.permute.xlu0 %2512  ;;  %v2517_v6 = vmax.f32 %v7891_v42, %v2515_v44 }
 0x50d   : > { %v4366_v48 = vmul.f32 %v2513_v47, %v7768_v24  ;;  %v2516_v59 = vmax.f32 %v7893_v43, %v2513_v47 }
 0x50f   : > { %v7909_v52 = vpack.c.bf16 %v4367_v46, %v4366_v48  ;;  %v7911_v53 = vpop.permute.xlu1 %2518  ;;  %v2639_v46 = vsel %vm2638_vm1, 1.0, %v7284_v1 }
 0x510   : > { %v7913_v57 = vpop.permute.xlu0 %2522 }
 0x511   : > { %v2526_v0 = vmax.f32 %v7911_v53, %v7913_v57 }
 0x513   : > { %v2528_v2 = vmax.f32 %v2516_v59, %v2526_v0  ;;  %v7918_v3 = vpop.permute.xlu1 %2524 }
 0x514   : > { %v7920_v4 = vpop.permute.xlu0 %2520 }
 0x515   : > { %v2527_v7 = vmax.f32 %v7920_v4, %v7918_v3  ;;  %6583 = vmatprep.mubr.f32.mxu0 %v2528_v2 }
 0x517   : > { %v2529_v8 = vmax.f32 %v2517_v6, %v2527_v7  ;;  %v6021_v6 = vld [vmem:[%s8643_s7 + $0x48] sm:$0xff] }
 0x519   : > { %6584 = vmatmul.mubr.f32.vlgmr.msra.gmra.mrb[2].mxu0 %v2529_v8 }
 0x51a   : > { %6610 = vmatprep.mubr.msk.f32.mxu0 %vm2668_vm7, %v6020_v11  ;;  %v6022_v11 = vld [vmem:[%s8643_s7 + $0x50] sm:$0xff] }
 0x5ec   : > { %v6585_v13 = vpop.f32.mrb[2].mxu0 }
 0x5ed   : > { %2865 = vrot.lane.b32.xlu1 %v6585_v13, %s7300_s4  ;;  %v2628_v14 = vpop.f32.mrb[3].mxu0 }
 0x5ee   : > { %2863 = vrot.lane.b32.xlu0 %v2628_v14, %s7300_s4  ;;  %v7929_v17 = vpack.c.bf16 %v6585_v13, %v2628_v14  ;;  %s7304_s4 = smov 5  }
 0x5f1   : > { %2978 = vrot.lane.b32.xlu1 %v6585_v13, %s8638_s30 }
 0x5f2   : > { %2976 = vrot.lane.b32.xlu0 %v2628_v14, %s8638_s30 }
 0x5f5   : > { %3196 = vrot.lane.b32.xlu1 %v6585_v13, %s8635_s28 }
 0x5f6   : > { %3194 = vrot.lane.b32.xlu0 %v2628_v14, %s8635_s28 }
 0x5f9   : > { %3308 = vrot.lane.b32.xlu1 %v6585_v13, %s7301_s1 }
 0x5fa   : > { %3306 = vrot.lane.b32.xlu0 %v2628_v14, %s7301_s1  ;;  %s8648_s1 = smov 16  }
 0x5fd   : > { %2659 = vrot.lane.b32.xlu1 %v6585_v13, %s7302_s26 }
 0x5fe   : > { %2657 = vrot.lane.b32.xlu0 %v2628_v14, %s7302_s26  ;;  %s8646_s26 = smov 7  }
 0x601   : > { %3421 = vrot.lane.b32.xlu1 %v6585_v13, %s7303_s27 }
 0x602   : > { %3419 = vrot.lane.b32.xlu0 %v2628_v14, %s7303_s27 }
 0x605   : > { %2648 = vrot.lane.b32.xlu1 %v6585_v13, %s7304_s4 }
 0x606   : > { %2646 = vrot.lane.b32.xlu0 %v2628_v14, %s7304_s4 }
 0x609   : > { %3533 = vrot.lane.b32.xlu1 %v6585_v13, %s7305_s6 }
 0x60a   : > { %3531 = vrot.lane.b32.xlu0 %v2628_v14, %s7305_s6  ;;  %v6023_v14 = vld [vmem:[%s8643_s7 + $0x58] sm:$0xff] }
 0x60d   : > { %3655 = vperm.xlu1 %7251, %v3645_v21   ;;  %v6028_v21 = vld [vmem:[%s8643_s7 + $0x60] sm:$0xff] }
 0x60e   : > { %3650 = vperm.xlu0 %7250, %v3644_v26  }
 0x611   : > { %3665 = vperm.xlu1 %7251, %v3647_v27  }
 0x612   : > { %3660 = vperm.xlu0 %7250, %v3646_v28  }
 0x615   : > { %3804 = vperm.xlu1 %7251, %v3796_v30   ;;  %v2645_v30 = vsel %vm2644_vm2, 1.0, %v7284_v1 }
 0x616   : > { %3799 = vperm.xlu0 %7250, %v3795_v33  }
 0x619   : > { %3905 = vrot.lane.b32.xlu1 %v7891_v42, %s8644_s2 }
 0x61a   : > { %3903 = vrot.lane.b32.xlu0 %v7893_v43, %s8644_s2 }
 0x65f   : > { %v2866_v39 = vpop.permute.xlu1 %2865 }
 0x660   : > { %v2869_v40 = vmul.f32 %v2867_v38, %v2866_v39  ;;  %v2864_v41 = vpop.permute.xlu0 %2863 }
 0x661   : > { %v2868_v44 = vmul.f32 %v2867_v38, %v2864_v41  ;;  %v3310_v41 = vmul.f32 %v2645_v30, %v2639_v46 }
 0x663   : > { %v6896_v47 = vpack.c.bf16 %v2869_v40, %v2868_v44  ;;  %v2979_v48 = vpop.permute.xlu1 %2978 }
 0x664   : > { %v2981_v59 = vmul.f32 %v2979_v48, %v2639_v46  ;;  %v2977_v0 = vpop.permute.xlu0 %2976 }
 0x665   : > { %v2980_v2 = vmul.f32 %v2977_v0, %v2639_v46  ;;  %6897 = vmatprep.subr.bf16.mxu0 %v6896_v47  ;;  %v6036_v0 = vld [vmem:[%s8643_s7 + $0x80] sm:$0xff] }
 0x666   : > { %6899 = vmatpush3.bf16.msra.mxu0 %v6896_v47  ;;  %v6031_v47 = vld [vmem:[%s8643_s7 + $0x78] sm:$0xff] }
 0x667   : > { %v6900_v7 = vpack.c.bf16 %v2981_v59, %v2980_v2  ;;  %v3197_v8 = vpop.permute.xlu1 %3196 }
 0x668   : > { %v3195_v13 = vpop.permute.xlu0 %3194  ;;  %v3199_v27 = vmul.f32 %v3197_v8, %v7964_v35 }
 0x669   : > { %6611 = vmatmul.mubr.msk.f32.vlgmr.msra.gmra.mrb[4].mxu0 %vm2668_vm7, %v6021_v6  ;;  %6901 = vmatprep.subr.bf16.mxu0 %v6900_v7  ;;  %v3198_v28 = vmul.f32 %v3195_v13, %v7964_v35  ;;  %v2650_v6 = vmul.f32 %v2643_v37, %v2639_v46 }
 0x66a   : > { %6903 = vmatpush3.bf16.msra.mxu0 %v6900_v7  ;;  %6613 = vmatprep.mubr.msk.f32.mxu0 %vm2668_vm7, %v6022_v11  ;;  %v6009_v11 = vld [vmem:[%s8643_s7 + $0x28] sm:$0xff] }
 0x66b   : > { %v3309_v18 = vpop.permute.xlu1 %3308  ;;  %6905 = vmatprep.subr.bf16.mxu0 %v7929_v17  ;;  %v6908_v40 = vpack.c.bf16 %v3199_v27, %v3198_v28  ;;  %v6039_v27 = vld [vmem:[%s8643_s7 + $0x98] sm:$0xff] }
 0x66c   : > { %v3307_v26 = vpop.permute.xlu0 %3306  ;;  %v3312_v7 = vmul.f32 %v3310_v41, %v3309_v18  ;;  %v6010_v18 = vld [vmem:[%s8643_s7 + $0x30] sm:$0xff] }
 0x66d   : > { %6614 = vmatmul.mubr.msk.f32.gmra.mrb[6].mxu0 %vm2668_vm7, %v6023_v14  ;;  %v3311_v8 = vmul.f32 %v3310_v41, %v3307_v26  ;;  %v6045_v41 = vld [vmem:[%s8643_s7 + $0xa8] sm:$0xff] }
 0x66e   : > { %6620 = vmatprep.mubr.msk.f32.mxu0 %vm2668_vm7, %v6028_v21 }
 0x66f   : > { %v2660_v33 = vpop.permute.xlu1 %2659  ;;  %v6912_v21 = vpack.c.bf16 %v3312_v7, %v3311_v8  ;;  %v6047_v7 = vld [vmem:[%s8643_s7 + $0xb8] sm:$0xff]  ;;  %v6285_v8 = vld [vmem:[%s8572_s9 + $0x8] sm:$0xff]  }
 0x670   : > { %v2662_v38 = vmul.f32 %v2660_v33, %v2643_v37  ;;  %v2658_v39 = vpop.permute.xlu0 %2657  ;;  %v6011_v33 = vld [vmem:[%s8643_s7 + $0x38] sm:$0xff] }
 0x671   : > { %v2661_v44 = vmul.f32 %v2658_v39, %v2643_v37  ;;  %6621 = vmatmul.mubr.msk.f32.vlgmr.msra.gmra.mrb[4].mxu0 %vm2668_vm7, %v6029_v12  ;;  %v6038_v37 = vld [vmem:[%s8643_s7 + $0x90] sm:$0xff]  ;;  %v6044_v12 = vld [vmem:[%s8643_s7 + $0xa0] sm:$0xff] }
 0x672   : > { %6907 = vmatpush3.bf16.msra.mxu0 %v7929_v17  ;;  %6623 = vmatprep.mubr.msk.f32.mxu0 %vm2668_vm7, %v6030_v34  ;;  %v6037_v17 = vld [vmem:[%s8643_s7 + $0x88] sm:$0xff]  ;;  %v6232_v34 = vld [vmem:[%s8572_s9] sm:$0xff]  }
 0x673   : > { %v6888_v48 = vpack.c.bf16 %v2662_v38, %v2661_v44  ;;  %6909 = vmatprep.subr.bf16.mxu0 %v6908_v40  ;;  %v3422_v59 = vpop.permute.xlu1 %3421  ;;  %v6046_v44 = vld [vmem:[%s8643_s7 + $0xb0] sm:$0xff] }
 0x674   : > { %v3420_v2 = vpop.permute.xlu0 %3419  ;;  %v3424_v38 = vmul.f32 %v3422_v59, %v2645_v30  ;;  %v3535_v59 = vmul.f32 %v2645_v30, %v7964_v35  ;;  %v6052_v35 = vld [vmem:[%s8643_s7 + $0xc0] sm:$0xff] }
 0x675   : > { %6889 = vmatprep.subr.bf16.mxu1 %v6888_v48  ;;  %6624 = vmatmul.mubr.msk.f32.gmra.mrb[6].mxu0 %vm2668_vm7, %v6031_v47  ;;  %v3423_v39 = vmul.f32 %v3420_v2, %v2645_v30  ;;  %v2654_v47 = vld [vmem:[%s8643_s7 + $0x8] sm:$0xff]  ;;  %v2656_v30 = vld [vmem:[%s8643_s7 + $0x18] sm:$0xff] }
 0x676   : > { %6891 = vmatpush3.bf16.msra.mxu1 %v6888_v48  ;;  %6630 = vmatprep.mubr.msk.f32.mxu0 %vm2668_vm7, %v6036_v0  ;;  %v2655_v0 = vld [vmem:[%s8643_s7 + $0x10] sm:$0xff] }
 0x677   : > { %v2649_v13 = vpop.permute.xlu1 %2648  ;;  %v6916_v48 = vpack.c.bf16 %v3424_v38, %v3423_v39  ;;  %v6070_v38 = vld [vmem:[%s8643_s7 + $0x110] sm:$0xff]  ;;  %v6071_v39 = vld [vmem:[%s8643_s7 + $0x118] sm:$0xff] }
 0x678   : > { %v2652_v46 = vmul.f32 %v2650_v6, %v2649_v13  ;;  %v2647_v14 = vpop.permute.xlu0 %2646  ;;  %v6053_v13 = vld [vmem:[%s8643_s7 + $0xc8] sm:$0xff] }
 0x679   : > { %v2651_v26 = vmul.f32 %v2650_v6, %v2647_v14  ;;  %6631 = vmatmul.mubr.msk.f32.vlgmr.msra.gmra.mrb[4].mxu0 %vm2668_vm7, %v6037_v17  ;;  %6591 = vmatmul.mubr.msk.f32.vlgmr.msra.gmra.mrb[4].mxu1 %vm2668_vm7, %v6009_v11 }
 0x67a   : > { %6911 = vmatpush3.bf16.msra.mxu0 %v6908_v40  ;;  %6633 = vmatprep.mubr.msk.f32.mxu0 %vm2668_vm7, %v6038_v37  ;;  %v2653_v40 = vld [vmem:[%s8643_s7] sm:$0xff]  ;;  %v6286_v37 = vld [vmem:[%s8572_s9 + $0x10] sm:$0xff]  }
 0x67b   : > { %v6892_v28 = vpack.c.bf16 %v2652_v46, %v2651_v26  ;;  %6913 = vmatprep.subr.bf16.mxu0 %v6912_v21  ;;  %6593 = vmatprep.mubr.msk.f32.mxu1 %vm2668_vm7, %v6010_v18  ;;  %v3534_v2 = vpop.permute.xlu1 %3533  ;;  %v6054_v46 = vld [vmem:[%s8643_s7 + $0xd0] sm:$0xff]  ;;  %v6055_v18 = vld [vmem:[%s8643_s7 + $0xd8] sm:$0xff]  ;;  %v6060_v26 = vld [vmem:[%s8643_s7 + $0xe0] sm:$0xff] }
 0x67c   : > { %v3532_v6 = vpop.permute.xlu0 %3531  ;;  %v3537_v17 = vmul.f32 %v3535_v59, %v3534_v2 }
 0x67d   : > { %6893 = vmatprep.subr.bf16.mxu1 %v6892_v28  ;;  %6634 = vmatmul.mubr.msk.f32.gmra.mrb[6].mxu0 %vm2668_vm7, %v6039_v27  ;;  %v3536_v11 = vmul.f32 %v3535_v59, %v3532_v6  ;;  %v6061_v27 = vld [vmem:[%s8643_s7 + $0xe8] sm:$0xff] }
 0x67e   : > { %6895 = vmatpush3.bf16.msra.mxu1 %v6892_v28  ;;  %6640 = vmatprep.mubr.msk.f32.mxu0 %vm2668_vm7, %v6044_v12  ;;  %v6062_v28 = vld [vmem:[%s8643_s7 + $0xf0] sm:$0xff]  ;;  %v6063_v12 = vld [vmem:[%s8643_s7 + $0xf8] sm:$0xff] }
 0x67f   : > { %6594 = vmatmul.mubr.msk.f32.gmra.mrb[6].mxu1 %vm2668_vm7, %v6011_v33  ;;  %6925 = vmatprep.subr.bf16.mxu1 %v6232_v34  ;;  %v6920_v14 = vpack.c.bf16 %v3537_v17, %v3536_v11  ;;  %v6068_v33 = vld [vmem:[%s8643_s7 + $0x100] sm:$0xff] }
 0x680   : > { %6600 = vmatprep.mubr.msk.f32.mxu1 %vm2668_vm7, %v2653_v40  ;;  %v6288_v40 = vld [vmem:[%s8572_s9 + $0x20] sm:$0xff]  }
 0x681   : > { %6641 = vmatmul.mubr.msk.f32.vlgmr.msra.gmra.mrb[4].mxu0 %vm2668_vm7, %v6045_v41  ;;  %v6289_v41 = vld [vmem:[%s8572_s9 + $0x28] sm:$0xff]  }
 0x682   : > { %6915 = vmatpush3.bf16.msra.mxu0 %v6912_v21  ;;  %6643 = vmatprep.mubr.msk.f32.mxu0 %vm2668_vm7, %v6046_v44  ;;  %v6287_v21 = vld [vmem:[%s8572_s9 + $0x18] sm:$0xff]   ;;  %v6290_v44 = vld [vmem:[%s8572_s9 + $0x30] sm:$0xff]  }
 0x683   : > { %6917 = vmatprep.subr.bf16.mxu0 %v6916_v48  ;;  %6601 = vmatmul.mubr.msk.f32.vlgmr.msra.gmra.mrb[4].mxu1 %vm2668_vm7, %v2654_v47  ;;  %v6291_v47 = vld [vmem:[%s8572_s9 + $0x38] sm:$0xff]  }
 0x684   : > { %6603 = vmatprep.mubr.msk.f32.mxu1 %vm2668_vm7, %v2655_v0  ;;  %6927 = vmatpush3.bf16.msra.mxu1 %v6232_v34  ;;  %v6069_v34 = vld [vmem:[%s8643_s7 + $0x108] sm:$0xff]  ;;  %s8651_s7 = smov 113  }
 0x685   : > { %6644 = vmatmul.mubr.msk.f32.gmra.mrb[6].mxu0 %vm2668_vm7, %v6047_v7  ;;  %6929 = vmatprep.subr.bf16.mxu1 %v6285_v8 }
 0x686   : > { %6650 = vmatprep.mubr.msk.f32.mxu0 %vm2668_vm7, %v6052_v35 }
 0x687   : > { %6604 = vmatmul.mubr.msk.f32.gmra.mrb[6].mxu1 %vm2668_vm7, %v2656_v30 }
 0x688   : > { %6931 = vmatpush3.bf16.msra.mxu1 %v6285_v8 }
 0x689   : > { %6651 = vmatmul.mubr.msk.f32.vlgmr.msra.gmra.mrb[4].mxu0 %vm2668_vm7, %v6053_v13  ;;  %6933 = vmatprep.subr.bf16.mxu1 %v6286_v37 }
 0x68a   : > { %6919 = vmatpush3.bf16.msra.mxu0 %v6916_v48  ;;  %6653 = vmatprep.mubr.msk.f32.mxu0 %vm2668_vm7, %v6054_v46 }
 0x68b   : > { %6921 = vmatprep.subr.bf16.mxu0 %v6920_v14 }
 0x68c   : > { %6935 = vmatpush3.bf16.msra.mxu1 %v6286_v37  ;;  %v3656_v6 = vpop.permute.xlu1 %3655 }
 0x68d   : > { %6654 = vmatmul.mubr.msk.f32.gmra.mrb[6].mxu0 %vm2668_vm7, %v6055_v18  ;;  %6937 = vmatprep.subr.bf16.mxu1 %v6287_v21  ;;  %v3651_v8 = vpop.permute.xlu0 %3650 }
 0x68e   : > { %6660 = vmatprep.mubr.msk.f32.mxu0 %vm2668_vm7, %v6060_v26 }
 0x690   : > { %6939 = vmatpush3.bf16.msra.mxu1 %v6287_v21  ;;  %v3666_v18 = vpop.permute.xlu1 %3665 }
 0x691   : > { %6661 = vmatmul.mubr.msk.f32.vlgmr.msra.gmra.mrb[4].mxu0 %vm2668_vm7, %v6061_v27  ;;  %6941 = vmatprep.subr.bf16.mxu1 %v6288_v40  ;;  %v3661_v27 = vpop.permute.xlu0 %3660 }
 0x692   : > { %6923 = vmatpush3.bf16.msra.mxu0 %v6920_v14  ;;  %6663 = vmatprep.mubr.msk.f32.mxu0 %vm2668_vm7, %v6062_v28 }
 0x694   : > { %6943 = vmatpush3.bf16.msra.mxu1 %v6288_v40  ;;  %v3805_v40 = vpop.permute.xlu1 %3804 }
 0x695   : > { %6664 = vmatmul.mubr.msk.f32.gmra.mrb[6].mxu0 %vm2668_vm7, %v6063_v12  ;;  %6945 = vmatprep.subr.bf16.mxu1 %v6289_v41 }
 0x696   : > { %6670 = vmatprep.mubr.msk.f32.mxu0 %vm2668_vm7, %v6068_v33 }
 0x698   : > { %6947 = vmatpush3.bf16.msra.mxu1 %v6289_v41  ;;  %v3800_v41 = vpop.permute.xlu0 %3799 }
 0x699   : > { %6671 = vmatmul.mubr.msk.f32.vlgmr.msra.gmra.mrb[4].mxu0 %vm2668_vm7, %v6069_v34  ;;  %6949 = vmatprep.subr.bf16.mxu1 %v6290_v44 }
 0x69a   : > { %6673 = vmatprep.mubr.msk.f32.mxu0 %vm2668_vm7, %v6070_v38 }
 0x69c   : > { %6951 = vmatpush3.bf16.msra.mxu1 %v6290_v44  ;;  %v3906_v44 = vpop.permute.xlu1 %3905 }
 0x69d   : > { %6674 = vmatmul.mubr.msk.f32.gmra.mrb[6].mxu0 %vm2668_vm7, %v6071_v39  ;;  %6953 = vmatprep.subr.bf16.mxu1 %v6291_v47  ;;  %v3793_v39 = vld [vmem:[%s8573_s10] sm:$0xff] }
 0x69e   : > { %4870 = vmatprep.mubr.f32.mxu0 %v7284_v1 }
 0x6a0   : > { %6955 = vmatpush3.bf16.msra.mxu1 %v6291_v47 }
 0x756   : > { %v6602_v48 = vpop.f32.mrb[4].mxu1 }
 0x757   : > { %v2844_v59 = vpop.f32.mrb[5].mxu1 }
 0x75a   : > { %v6605_v0 = vpop.f32.mrb[6].mxu1 }
 0x75b   : > { %v2854_v2 = vpop.f32.mrb[7].mxu1 }
 0x76c   : > { %v6672_v7 = vpop.f32.mrb[4].mxu0 }
 0x76d   : > { %v7108_v35 = vadd.f32 %v6672_v7, %v6602_v48  ;;  %v3621_v30 = vpop.f32.mrb[5].mxu0  ;;  %v3904_v48 = vpop.permute.xlu0 %3903 }
 0x76e   : > { %v7109_v17 = vadd.f32 %v3621_v30, %v2844_v59 }
 0x76f   : > { %v3669_v11 = vadd.f32 %v7108_v35, %v3656_v6  ;;  %v3911_v6 = vmul.f32 %v3904_v48, %v7765_v23  ;;  %v7267_v48 = vld [vmem:[%s8577_s14 + $0x54] ss:$8 sps:$4 sm:$0xff]  }
 0x770   : > { %v3668_v13 = vadd.f32 %v7109_v17, %v3651_v8  ;;  %v6675_v37 = vpop.f32.mrb[6].mxu0  ;;  %v3794_v17 = vld [vmem:[%s8573_s10 + $0x8] sm:$0xff] }
 0x771   : > { %v7110_v46 = vadd.f32 %v6675_v37, %v6605_v0  ;;  %v3631_v14 = vpop.f32.mrb[7].mxu0  ;;  %v3673_v28 = vmax.f32 %v3669_v11, 0.0  ;;  %v6078_v11 = vld [vmem:[%s8575_s12 + $0x10] sm:$0xff] }
 0x772   : > { %v3672_v21 = vmax.f32 %v3668_v13, 0.0  ;;  %v7111_v26 = vadd.f32 %v3631_v14, %v2854_v2  ;;  %v3912_v2 = vmul.f32 %v3906_v44, %v7765_v23  ;;  %v7264_v44 = vld [vmem:[%s8577_s14 + $0x44] ss:$8 sps:$4 sm:$0xff]  }
 0x773   : > { %v3671_v12 = vadd.f32 %v7110_v46, %v3666_v18 }
 0x774   : > { %v3670_v33 = vadd.f32 %v7111_v26, %v3661_v27  ;;  %6708 = vmatprep.mubr.f32.mxu1 %v3672_v21  ;;  %v6964_v30 = vpack.c.bf16 %v3912_v2, %v3911_v6  ;;  %v4743_v21 = vld [vmem:[%s8576_s13 + $0x8] sm:$0xff]  ;;  %v4742_v26 = vld [vmem:[%s8576_s13] sm:$0xff] }
 0x775   : > { %6709 = vmatmul.mubr.f32.vlgmr.msra.gmra.mrb[8].mxu1 %v3673_v28  ;;  %v3675_v38 = vmax.f32 %v3671_v12, 0.0  ;;  %v4884_v27 = vld [vmem:[%s8579_s16] sm:$0xff] }
 0x776   : > { %v3674_v34 = vmax.f32 %v3670_v33, 0.0  ;;  %v7252_v28 = vld [vmem:[%s8577_s14 + $0x4] ss:$8 sps:$4 sm:$0xff]   ;;  %v7254_v12 = vld [vmem:[%s8577_s14] ss:$8 sps:$4 sm:$0xff]  }
 0x777   : > { %v7255_v33 = vld [vmem:[%s8577_s14 + $0x14] ss:$8 sps:$4 sm:$0xff]   ;;  %7037 = vmatprep.subr.bf16.mxu0 %v7252_v28  ;;  %v7272_v2 = vld [vmem:[%s8577_s14 + $0x60] ss:$8 sps:$4 sm:$0xff]  }
 0x778   : > { %6711 = vmatprep.mubr.f32.mxu1 %v3674_v34  ;;  %7039 = vmatpush1.bf16.msra.mxu0 %v7254_v12  ;;  %v7257_v34 = vld [vmem:[%s8577_s14 + $0x10] ss:$8 sps:$4 sm:$0xff]  }
 0x779   : > { %6712 = vmatmul.mubr.f32.gmra.mrb[10].mxu1 %v3675_v38  ;;  %7041 = vmatprep.subr.bf16.mxu0 %v7255_v33  ;;  %v7258_v38 = vld [vmem:[%s8577_s14 + $0x24] ss:$8 sps:$4 sm:$0xff]  }
 0x77a   : > { %6722 = vmatprep.mubr.msk.f32.mxu1 %vm3807_vm5, %v3793_v39  ;;  %v7260_v39 = vld [vmem:[%s8577_s14 + $0x20] ss:$8 sps:$4 sm:$0xff]  }
 0x77c   : > { %7043 = vmatpush1.bf16.msra.mxu0 %v7257_v34 }
 0x77d   : > { %7045 = vmatprep.subr.bf16.mxu0 %v7258_v38 }
 0x780   : > { %7047 = vmatpush1.bf16.msra.mxu0 %v7260_v39 }
 0x848   : > { %v6710_v47 = vpop.f32.mrb[8].mxu1 }
 0x849   : > { %v3774_v59 = vpop.f32.mrb[9].mxu1 }
 0x84a   : > { %v6956_v0 = vpack.c.bf16 %v6710_v47, %v3774_v59  ;;  %v7266_v47 = vld [vmem:[%s8577_s14 + $0x40] ss:$8 sps:$4 sm:$0xff]   ;;  %v7269_v59 = vld [vmem:[%s8577_s14 + $0x50] ss:$8 sps:$4 sm:$0xff]  }
 0x84c   : > { %v6713_v7 = vpop.f32.mrb[10].mxu1  ;;  %6957 = vmatprep.subr.bf16.mxu1 %v6956_v0 }
 0x84d   : > { %v3784_v8 = vpop.f32.mrb[11].mxu1  ;;  %6959 = vmatpush3.bf16.msra.mxu1 %v6956_v0  ;;  %v7270_v0 = vld [vmem:[%s8577_s14 + $0x64] ss:$8 sps:$4 sm:$0xff]  }
 0x84e   : > { %v6960_v35 = vpack.c.bf16 %v6713_v7, %v3784_v8 }
 0x850   : > { %6961 = vmatprep.subr.bf16.mxu1 %v6960_v35 }
 0x851   : > { %6963 = vmatpush3.bf16.msra.mxu1 %v6960_v35 }
 0x852   : > { %6965 = vmatprep.subr.bf16.mxu1 %v6964_v30 }
 0x854   : > { %6723 = vmatmul.mubr.msk.f32.vlgmr.msra.gmra.mrb[12].mxu1 %vm3807_vm5, %v3794_v17 }
 0x855   : > { %6967 = vmatpush3.bf16.msra.mxu1 %v6964_v30  ;;  %6733 = vmatprep.mubr.msk.f32.mxu1 %vm3807_vm5, %v6078_v11 }
 0x927   : > { %v6724_v13 = vpop.f32.mrb[12].mxu1 }
 0x928   : > { %v3886_v37 = vadd.f32 %v6724_v13, %v3805_v40  ;;  %v3880_v46 = vpop.f32.mrb[13].mxu1  ;;  %v7261_v40 = vld [vmem:[%s8577_s14 + $0x34] ss:$8 sps:$4 sm:$0xff]  }
 0x929   : > { %v3881_v14 = vadd.f32 %v3880_v46, %v3800_v41  ;;  %v7263_v41 = vld [vmem:[%s8577_s14 + $0x30] ss:$8 sps:$4 sm:$0xff]   ;;  %7049 = vmatprep.subr.bf16.mxu0 %v7261_v40  ;;  %v3902_v40 = vld [vmem:[%s8575_s12 + $0x8] sm:$0xff] }
 0x92a   : > { %3909 = vrot.lane.b32.xlu1 %v3886_v37, %s8644_s2  ;;  %7051 = vmatpush1.bf16.msra.mxu0 %v7263_v41  ;;  %v6079_v46 = vld [vmem:[%s8575_s12 + $0x18] sm:$0xff] }
 0x92b   : > { %3907 = vrot.lane.b32.xlu0 %v3881_v14, %s8644_s2  ;;  %v8153_v18 = vpack.c.bf16 %v3886_v37, %v3881_v14  ;;  %s8647_s2 = smov 121   ;;  %7053 = vmatprep.subr.bf16.mxu0 %v7264_v44  ;;  %v6084_v44 = vld [vmem:[%s8575_s12 + $0x20] sm:$0xff] }
 0x92e   : > { %3891 = vrot.lane.b32.xlu1 %v7891_v42, %s8645_s29  ;;  %7055 = vmatpush1.bf16.msra.mxu0 %v7266_v47 }
 0x92f   : > { %3889 = vrot.lane.b32.xlu0 %v7893_v43, %s8645_s29  ;;  %7057 = vmatprep.subr.bf16.mxu0 %v7267_v48 }
 0x932   : > { %3895 = vrot.lane.b32.xlu1 %v3886_v37, %s8645_s29  ;;  %7059 = vmatpush1.bf16.msra.mxu0 %v7269_v59 }
 0x933   : > { %3893 = vrot.lane.b32.xlu0 %v3881_v14, %s8645_s29  ;;  %7061 = vmatprep.subr.bf16.mxu0 %v7270_v0 }
 0x936   : > { %4082 = vrot.lane.b32.xlu1 %v7891_v42, %s8646_s26  ;;  %7063 = vmatpush1.bf16.msra.mxu0 %v7272_v2 }
 0x937   : > { %4080 = vrot.lane.b32.xlu0 %v7893_v43, %s8646_s26 }
 0x93a   : > { %4086 = vrot.lane.b32.xlu1 %v3886_v37, %s8646_s26 }
 0x93b   : > { %4084 = vrot.lane.b32.xlu0 %v3881_v14, %s8646_s26 }
 0x93e   : > { %4180 = vrot.lane.b32.xlu1 %v7891_v42, %s8638_s30 }
 0x93f   : > { %4178 = vrot.lane.b32.xlu0 %v7893_v43, %s8638_s30 }
 0x942   : > { %4184 = vrot.lane.b32.xlu1 %v3886_v37, %s8638_s30 }
 0x943   : > { %4182 = vrot.lane.b32.xlu0 %v3881_v14, %s8638_s30 }
 0x946   : > { %4364 = vrot.lane.b32.xlu1 %v3886_v37, %s8635_s28 }
 0x947   : > { %4362 = vrot.lane.b32.xlu0 %v3881_v14, %s8635_s28 }
 0x94a   : > { %4458 = vrot.lane.b32.xlu1 %v7891_v42, %s8647_s2 }
 0x94b   : > { %4456 = vrot.lane.b32.xlu0 %v7893_v43, %s8647_s2 }
 0x94e   : > { %4462 = vrot.lane.b32.xlu1 %v3886_v37, %s8647_s2 }
 0x94f   : > { %4460 = vrot.lane.b32.xlu0 %v3881_v14, %s8647_s2  ;;  %s6134_s2 = sshll.u32 %s8655_s25, 2 }
 0x950   : > { %s653_s27 = scalar_lea.vmem %s8584_s21, %s6134_s2 }
 0x952   : > { %4556 = vrot.lane.b32.xlu1 %v3886_v37, %s8641_s22 }
 0x953   : > { %4554 = vrot.lane.b32.xlu0 %v3881_v14, %s8641_s22  ;;  %s8649_s22 = smov 17  }
 0x956   : > { %4650 = vrot.lane.b32.xlu1 %v3886_v37, %s8642_s0 }
 0x957   : > { %4648 = vrot.lane.b32.xlu0 %v3881_v14, %s8642_s0  ;;  %s8650_s0 = smov 15  }
 0x95a   : > { %4751 = vperm.xlu1 %7251, %v4743_v21  }
 0x95b   : > { %4746 = vperm.xlu0 %7250, %v4742_v26   ;;  %v3901_v26 = vld [vmem:[%s8575_s12] sm:$0xff] }
 0x95e   : > { %4981 = vrot.lane.b32.xlu1 %v7677_v45, %s8648_s1 }
 0x95f   : > { %4887 = vperm.xlu0 %7250, %v4884_v27  }
 0x962   : > { %4985 = vrot.lane.b32.xlu1 %v7689_v49, %s8648_s1 }
 0x966   : > { %4964 = vrot.lane.b32.xlu1 %v7677_v45, %s8649_s22 }
 0x96a   : > { %4968 = vrot.lane.b32.xlu1 %v7689_v49, %s8649_s22 }
 0x96e   : > { %5147 = vrot.lane.b32.xlu1 %v7677_v45, %s8650_s0 }
 0x972   : > { %5151 = vrot.lane.b32.xlu1 %v7689_v49, %s8650_s0 }
 0x976   : > { %5241 = vrot.lane.b32.xlu1 %v7677_v45, %s8638_s30 }
 0x97a   : > { %5245 = vrot.lane.b32.xlu1 %v7689_v49, %s8638_s30 }
 0x99c   : > { %v3910_v6 = vpop.permute.xlu1 %3909 }
 0x99d   : > { %v3914_v7 = vmul.f32 %v3910_v6, %v7765_v23  ;;  %v3908_v8 = vpop.permute.xlu0 %3907 }
 0x99e   : > { %v3913_v35 = vmul.f32 %v3908_v8, %v7765_v23 }
 0x9a0   : > { %v6968_v30 = vpack.c.bf16 %v3914_v7, %v3913_v35  ;;  %v3892_v17 = vpop.permute.xlu1 %3891  ;;  %v6085_v35 = vld [vmem:[%s8575_s12 + $0x28] sm:$0xff] }
 0x9a1   : > { %v3898_v11 = vmul.f32 %v3892_v17, %v7772_v25  ;;  %v3890_v13 = vpop.permute.xlu0 %3889  ;;  %v6088_v17 = vld [vmem:[%s8575_s12 + $0x30] sm:$0xff] }
 0x9a2   : > { %v3897_v37 = vmul.f32 %v3890_v13, %v7772_v25  ;;  %6969 = vmatprep.subr.bf16.mxu1 %v6968_v30 }
 0x9a3   : > { %6971 = vmatpush3.bf16.msra.mxu1 %v6968_v30 }
 0x9a4   : > { %v6972_v14 = vpack.c.bf16 %v3898_v11, %v3897_v37  ;;  %v3896_v21 = vpop.permute.xlu1 %3895 }
 0x9a5   : > { %v3900_v23 = vmul.f32 %v3896_v21, %v7772_v25  ;;  %v3894_v27 = vpop.permute.xlu0 %3893 }
 0x9a6   : > { %v3899_v28 = vmul.f32 %v3894_v27, %v7772_v25  ;;  %6734 = vmatmul.mubr.msk.f32.vlgmr.msra.gmra.mrb[14].mxu1 %vm3807_vm5, %v6079_v46  ;;  %6973 = vmatprep.subr.bf16.mxu1 %v6972_v14 }
 0x9a7   : > { %6975 = vmatpush3.bf16.msra.mxu1 %v6972_v14  ;;  %6744 = vmatprep.mubr.msk.f32.mxu1 %vm3807_vm5, %v3901_v26  ;;  %v6996_v14 = vpack.c.bf16 %v7891_v42, %v7893_v43 }
 0x9a8   : > { %v6976_v12 = vpack.c.bf16 %v3900_v23, %v3899_v28  ;;  %v4083_v33 = vpop.permute.xlu1 %4082  ;;  %v6089_v23 = vld [vmem:[%s8575_s12 + $0x38] sm:$0xff] }
 0x9a9   : > { %v4089_v34 = vmul.f32 %v4083_v33, %v7777_v29  ;;  %v4081_v38 = vpop.permute.xlu0 %4080  ;;  %v6096_v33 = vld [vmem:[%s8575_s12 + $0x50] sm:$0xff] }
 0x9aa   : > { %v4088_v39 = vmul.f32 %v4081_v38, %v7777_v29  ;;  %6977 = vmatprep.subr.bf16.mxu1 %v6976_v12 }
 0x9ab   : > { %6979 = vmatpush3.bf16.msra.mxu1 %v6976_v12  ;;  %v6093_v12 = vld [vmem:[%s8575_s12 + $0x48] sm:$0xff] }
 0x9ac   : > { %v6980_v25 = vpack.c.bf16 %v4089_v34, %v4088_v39  ;;  %v4087_v41 = vpop.permute.xlu1 %4086 }
 0x9ad   : > { %v4091_v47 = vmul.f32 %v4087_v41, %v7777_v29  ;;  %v4085_v48 = vpop.permute.xlu0 %4084 }
 0x9ae   : > { %v4090_v59 = vmul.f32 %v4085_v48, %v7777_v29  ;;  %6745 = vmatmul.mubr.msk.f32.vlgmr.msra.gmra.mrb[14].mxu1 %vm3807_vm5, %v3902_v40  ;;  %6981 = vmatprep.subr.bf16.mxu1 %v6980_v25 }
 0x9af   : > { %6983 = vmatpush3.bf16.msra.mxu1 %v6980_v25  ;;  %6755 = vmatprep.mubr.msk.f32.mxu1 %vm3807_vm5, %v6084_v44  ;;  %v6097_v44 = vld [vmem:[%s8575_s12 + $0x58] sm:$0xff] }
 0x9b0   : > { %v6984_v0 = vpack.c.bf16 %v4091_v47, %v4090_v59  ;;  %v4181_v2 = vpop.permute.xlu1 %4180  ;;  %v6100_v47 = vld [vmem:[%s8575_s12 + $0x60] sm:$0xff] }
 0x9b1   : > { %v4187_v6 = vmul.f32 %v4181_v2, %v7762_v22  ;;  %v4179_v7 = vpop.permute.xlu0 %4178 }
 0x9b2   : > { %v4186_v8 = vmul.f32 %v4179_v7, %v7762_v22  ;;  %6985 = vmatprep.subr.bf16.mxu1 %v6984_v0 }
 0x9b3   : > { %6987 = vmatpush3.bf16.msra.mxu1 %v6984_v0 }
 0x9b4   : > { %v6988_v29 = vpack.c.bf16 %v4187_v6, %v4186_v8  ;;  %v4185_v30 = vpop.permute.xlu1 %4184  ;;  %v6104_v8 = vld [vmem:[%s8575_s12 + $0x70] sm:$0xff] }
 0x9b5   : > { %v4189_v11 = vmul.f32 %v4185_v30, %v7762_v22  ;;  %v4183_v13 = vpop.permute.xlu0 %4182 }
 0x9b6   : > { %v4188_v37 = vmul.f32 %v4183_v13, %v7762_v22  ;;  %6756 = vmatmul.mubr.msk.f32.vlgmr.msra.gmra.mrb[14].mxu1 %vm3807_vm5, %v6085_v35  ;;  %6989 = vmatprep.subr.bf16.mxu1 %v6988_v29  ;;  %v6092_v22 = vld [vmem:[%s8575_s12 + $0x40] sm:$0xff]  ;;  %v4653_v35 = vmul.f32 %v7918_v3, %v7844_v5  ;;  %v6105_v3 = vld [vmem:[%s8575_s12 + $0x78] sm:$0xff] }
 0x9b7   : > { %6991 = vmatpush3.bf16.msra.mxu1 %v6988_v29  ;;  %6766 = vmatprep.mubr.msk.f32.mxu1 %vm3807_vm5, %v6088_v17 }
 0x9b8   : > { %v6992_v46 = vpack.c.bf16 %v4189_v11, %v4188_v37  ;;  %v4365_v21 = vpop.permute.xlu1 %4364  ;;  %v6108_v37 = vld [vmem:[%s8575_s12 + $0x80] sm:$0xff] }
 0x9b9   : > { %v4363_v26 = vpop.permute.xlu0 %4362  ;;  %v4369_v27 = vmul.f32 %v4365_v21, %v7768_v24 }
 0x9ba   : > { %6993 = vmatprep.subr.bf16.mxu1 %v6992_v46  ;;  %v4368_v28 = vmul.f32 %v4363_v26, %v7768_v24 }
 0x9bb   : > { %6995 = vmatpush3.bf16.msra.mxu1 %v6992_v46 }
 0x9bc   : > { %6997 = vmatprep.subr.bf16.mxu1 %v6996_v14  ;;  %v4459_v42 = vpop.permute.xlu1 %4458  ;;  %v7008_v34 = vpack.c.bf16 %v4369_v27, %v4368_v28 }
 0x9bd   : > { %v4457_v43 = vpop.permute.xlu0 %4456  ;;  %v4465_v38 = vmul.f32 %v4459_v42, %v7822_v51 }
 0x9be   : > { %6767 = vmatmul.mubr.msk.f32.vlgmr.msra.gmra.mrb[14].mxu1 %vm3807_vm5, %v6089_v23  ;;  %v4464_v39 = vmul.f32 %v4457_v43, %v7822_v51 }
 0x9bf   : > { %6999 = vmatpush3.bf16.msra.mxu1 %v6996_v14  ;;  %6777 = vmatprep.mubr.msk.f32.mxu1 %vm3807_vm5, %v6092_v22  ;;  %v7275_v14 = vld [vmem:[%s8577_s14 + $0x70] ss:$8 sps:$4 sm:$0xff]  }
 0x9c0   : > { %7001 = vmatprep.subr.bf16.mxu1 %v8153_v18  ;;  %v4463_v24 = vpop.permute.xlu1 %4462 }
 0x9c1   : > { %v4461_v40 = vpop.permute.xlu0 %4460  ;;  %v4467_v25 = vmul.f32 %v4463_v24, %v7822_v51 }
 0x9c2   : > { %v4466_v41 = vmul.f32 %v4461_v40, %v7822_v51  ;;  %v4558_v51 = vmul.f32 %v7911_v53, %v7816_v50  ;;  %v4883_v40 = vld [vmem:[%s8578_s15] sm:$0xff] }
 0x9c3   : > { %7003 = vmatpush3.bf16.msra.mxu1 %v8153_v18  ;;  %v7012_v18 = vpack.c.bf16 %v4465_v38, %v4464_v39 }
 0x9c4   : > { %7005 = vmatprep.subr.bf16.mxu1 %v7909_v52  ;;  %v7016_v48 = vpack.c.bf16 %v4467_v25, %v4466_v41  ;;  %v4557_v59 = vpop.permute.xlu1 %4556 }
 0x9c5   : > { %v4555_v0 = vpop.permute.xlu0 %4554  ;;  %v4561_v6 = vmul.f32 %v4557_v59, %v7816_v50 }
 0x9c6   : > { %6778 = vmatmul.mubr.msk.f32.vlgmr.msra.gmra.mrb[14].mxu1 %vm3807_vm5, %v6093_v12  ;;  %v4560_v7 = vmul.f32 %v4555_v0, %v7816_v50 }
 0x9c7   : > { %7007 = vmatpush3.bf16.msra.mxu1 %v7909_v52  ;;  %6788 = vmatprep.mubr.msk.f32.mxu1 %vm3807_vm5, %v6096_v33  ;;  %v4559_v52 = vmul.f32 %v7920_v4, %v7816_v50  ;;  %v6101_v4 = vld [vmem:[%s8575_s12 + $0x68] sm:$0xff]  ;;  %v4652_v50 = vmul.f32 %v7913_v57, %v7844_v5  ;;  %v7273_v57 = vld [vmem:[%s8577_s14 + $0x74] ss:$8 sps:$4 sm:$0xff]  }
 0x9c8   : > { %7009 = vmatprep.subr.bf16.mxu1 %v7008_v34  ;;  %v7024_v53 = vpack.c.bf16 %v4561_v6, %v4560_v7  ;;  %v4651_v29 = vpop.permute.xlu1 %4650  ;;  %7065 = vmatprep.subr.bf16.mxu0 %v7273_v57 }
 0x9c9   : > { %v7020_v2 = vpack.c.bf16 %v4559_v52, %v4558_v51  ;;  %v4649_v30 = vpop.permute.xlu0 %4648  ;;  %v7028_v17 = vpack.c.bf16 %v4653_v35, %v4652_v50  ;;  %v4655_v11 = vmul.f32 %v4651_v29, %v7844_v5  ;;  %7067 = vmatpush1.bf16.msra.mxu0 %v7275_v14  ;;  %v5771_v52 = vld [vmem:[%s8581_s18] sm:$0xff] }
 0x9ca   : > { %v4654_v13 = vmul.f32 %v4649_v30, %v7844_v5  ;;  %v6109_v5 = vld [vmem:[%s8575_s12 + $0x88] sm:$0xff] }
 0x9cb   : > { %7011 = vmatpush3.bf16.msra.mxu1 %v7008_v34 }
 0x9cc   : > { %7013 = vmatprep.subr.bf16.mxu1 %v7012_v18  ;;  %v7032_v46 = vpack.c.bf16 %v4655_v11, %v4654_v13 }
 0x9ce   : > { %6789 = vmatmul.mubr.msk.f32.vlgmr.msra.gmra.mrb[14].mxu1 %vm3807_vm5, %v6097_v44 }
 0x9cf   : > { %7015 = vmatpush3.bf16.msra.mxu1 %v7012_v18  ;;  %6799 = vmatprep.mubr.msk.f32.mxu1 %vm3807_vm5, %v6100_v47 }
 0x9d0   : > { %7017 = vmatprep.subr.bf16.mxu1 %v7016_v48 }
 0x9d3   : > { %7019 = vmatpush3.bf16.msra.mxu1 %v7016_v48  ;;  %v5782_v48 = vld [vmem:[%s8583_s20] sm:$0x3] }
 0x9d4   : > { %7021 = vmatprep.subr.bf16.mxu1 %v7020_v2 }
 0x9d6   : > { %6800 = vmatmul.mubr.msk.f32.vlgmr.msra.gmra.mrb[14].mxu1 %vm3807_vm5, %v6101_v4 }
 0x9d7   : > { %7023 = vmatpush3.bf16.msra.mxu1 %v7020_v2  ;;  %6810 = vmatprep.mubr.msk.f32.mxu1 %vm3807_vm5, %v6104_v8 }
 0x9d8   : > { %7025 = vmatprep.subr.bf16.mxu1 %v7024_v53 }
 0x9d9   : > { %v4752_v42 = vpop.permute.xlu1 %4751 }
 0x9da   : > { %v4747_v26 = vpop.permute.xlu0 %4746 }
 0x9db   : > { %7027 = vmatpush3.bf16.msra.mxu1 %v7024_v53 }
 0x9dc   : > { %7029 = vmatprep.subr.bf16.mxu1 %v7028_v17 }
 0x9dd   : > { %v4982_v59 = vpop.permute.xlu1 %4981 }
 0x9de   : > { %6811 = vmatmul.mubr.msk.f32.vlgmr.msra.gmra.mrb[14].mxu1 %vm3807_vm5, %v6105_v3  ;;  %v4888_v18 = vpop.permute.xlu0 %4887 }
 0x9df   : > { %7031 = vmatpush3.bf16.msra.mxu1 %v7028_v17  ;;  %6821 = vmatprep.mubr.msk.f32.mxu1 %vm3807_vm5, %v6108_v37  ;;  %v6113_v37 = vld [vmem:[%s8580_s17 + $0x8] sm:$0xff] }
 0x9e0   : > { %7033 = vmatprep.subr.bf16.mxu1 %v7032_v46 }
 0x9e1   : > { %v4986_v0 = vpop.permute.xlu1 %4985 }
 0x9e2   : > { %v4991_v4 = vsel %vm705_vm3, %v4986_v0, %v4982_v59  ;;  %v4989_v35 = vsel %vm705_vm3, %v4982_v59, %v4986_v0 }
 0x9e3   : > { %7035 = vmatpush3.bf16.msra.mxu1 %v7032_v46  ;;  %v4993_v30 = vmul.f32 %v4991_v4, %v7485_v16 }
 0x9e5   : > { %v4965_v51 = vpop.permute.xlu1 %4964 }
 0x9e6   : > { %6822 = vmatmul.mubr.msk.f32.vlgmr.msra.gmra.mrb[14].mxu1 %vm3807_vm5, %v6109_v5 }
 0x9e7   : > { %5855 = vmatprep.mubr.f32.mxu1 %v7284_v1 }
 0x9e9   : > { %v4969_v2 = vpop.permute.xlu1 %4968 }
 0x9ea   : > { %v4972_v46 = vsel %vm693_vm4, %v4965_v51, %v4969_v2  ;;  %v4974_v5 = vsel %vm693_vm4, %v4969_v2, %v4965_v51 }
 0x9ed   : > { %v5148_v7 = vpop.permute.xlu1 %5147 }
 0x9f1   : > { %v5152_v11 = vpop.permute.xlu1 %5151 }
 0xab9   : > { %v6823_v21 = vpop.f32.mrb[14].mxu1 }
 0xaba   : > { %v4731_v23 = vpop.f32.mrb[15].mxu1  ;;  %v4755_v43 = vadd.f32 %v6823_v21, %v4752_v42  ;;  %v4976_v21 = vmul.f32 %v4974_v5, %v7491_v19 }
 0xabb   : > { %v4754_v22 = vadd.f32 %v4747_v26, %v4731_v23  ;;  %v4977_v26 = vmul.f32 %v4972_v46, %v7494_v20  ;;  %v5242_v23 = vpop.permute.xlu1 %5241  ;;  %v5420_v46 = vmul.f32 %v7705_v56, %v7517_v32 }
 0xabc   : > { %v4757_v28 = vmax.f32 %v4755_v43, 0.0 }
 0xabd   : > { %v4756_v27 = vmax.f32 %v4754_v22, 0.0 }
 0xabf   : > { %4871 = vmatmul.mubr.f32.vlgmr.msra.gmra.mrb[8].mxu0 %v4756_v27 }
 0xac0   : > { %4876 = vmatprep.mubr.f32.mxu0 %v7284_v1 }
 0xac3   : > { %4877 = vmatmul.mubr.f32.gmra.mrb[10].mxu0 %v4757_v28 }
 0xac4   : > { %4957 = vmatprep.mubr.f32.mxu0 %v7284_v1 }
 0xb92   : > { %v4872_v12 = vpop.f32.mrb[8].mxu0 }
 0xb93   : > { %v4874_v33 = vpop.f32.mrb[9].mxu0 }
 0xb96   : > { %v4878_v34 = vpop.f32.mrb[10].mxu0 }
 0xb97   : > { %v7070_v38 = vpack.c.bf16 %v4878_v34, %v4872_v12  ;;  %v4880_v39 = vpop.f32.mrb[11].mxu0  ;;  %v5155_v12 = vsel %vm878_vm9, %v5148_v7, %v5152_v11  ;;  %v4980_v34 = vld [vmem:[%s8580_s17] sm:$0xff] }
 0xb98   : > { %v7068_v24 = vpack.c.bf16 %v4880_v39, %v4874_v33  ;;  %v5157_v33 = vsel %vm878_vm9, %v5152_v11, %v5148_v7 }
 0xb9a   : > { %7069 = vmatprep.subr.bf16.mxu0 %v7068_v24 }
 0xb9b   : > { %7071 = vmatpush1.bf16.msra.mxu0 %v7070_v38 }
 0xb9e   : > { %6112 = vmatmul.mubr.msk.f32.vlgmr.msra.gmra.mrb[12].mxu0 %vm2668_vm7, %v4883_v40  ;;  %v5159_v40 = vmul.f32 %v5157_v33, %v7528_v36 }
 0xb9f   : > { %5066 = vmatprep.mubr.f32.mxu0 %v7284_v1 }
 0xc71   : > { %v4959_v25 = vpop.f32.mrb[12].mxu0 }
 0xc72   : > { %v8372_v41 = vadd.f32 %v4959_v25, %v4888_v18  ;;  %v4961_v44 = vpop.f32.mrb[13].mxu0 }
 0xc73   : > { %v8378_v47 = vadd.f32 %v4961_v44, %v4888_v18  ;;  %v5160_v18 = vmul.f32 %v5155_v12, %v7517_v32 }
 0xc74   : > { %5413 = vrot.lane.b32.xlu1 %v8372_v41, %s8635_s28  ;;  %4983 = vrot.lane.b32.xlu0 %v8372_v41, %s8648_s1 }
 0xc78   : > { %5501 = vrot.lane.b32.xlu1 %v7677_v45, %s8651_s7  ;;  %4987 = vrot.lane.b32.xlu0 %v8378_v47, %s8648_s1 }
 0xc7c   : > { %5505 = vrot.lane.b32.xlu1 %v7689_v49, %s8651_s7  ;;  %4966 = vrot.lane.b32.xlu0 %v8372_v41, %s8649_s22 }
 0xc80   : > { %5595 = vrot.lane.b32.xlu1 %v8372_v41, %s8652_s24  ;;  %4970 = vrot.lane.b32.xlu0 %v8378_v47, %s8649_s22 }
 0xc84   : > { %5683 = vrot.lane.b32.xlu1 %v8372_v41, %s8636_s23  ;;  %5149 = vrot.lane.b32.xlu0 %v8372_v41, %s8650_s0 }
 0xc88   : > { %5774 = vperm.xlu1 %7251, %v5771_v52   ;;  %5153 = vrot.lane.b32.xlu0 %v8378_v47, %s8650_s0 }
 0xc8c   : > { %5243 = vrot.lane.b32.xlu0 %v8372_v41, %s8638_s30 }
 0xc90   : > { %5247 = vrot.lane.b32.xlu0 %v8378_v47, %s8638_s30 }
 0xc94   : > { %5415 = vrot.lane.b32.xlu0 %v8378_v47, %s8635_s28 }
 0xc98   : > { %5503 = vrot.lane.b32.xlu0 %v8372_v41, %s8651_s7 }
 0xc9c   : > { %5507 = vrot.lane.b32.xlu0 %v8378_v47, %s8651_s7 }
 0xca0   : > { %5597 = vrot.lane.b32.xlu0 %v8378_v47, %s8652_s24 }
 0xca4   : > { %5685 = vrot.lane.b32.xlu0 %v8378_v47, %s8636_s23 }
 0xca8   : > { %5785 = vperm.xlu0 %7250, %v5782_v48  }
 0xce6   : > { %v4984_v6 = vpop.permute.xlu0 %4983 }
 0xcea   : > { %v4988_v8 = vpop.permute.xlu0 %4987 }
 0xceb   : > { %v4990_v53 = vsel %vm705_vm3, %v4984_v6, %v4988_v8  ;;  %v4992_v29 = vsel %vm705_vm3, %v4988_v8, %v4984_v6 }
 0xcec   : > { %v4995_v50 = vmul.f32 %v4992_v29, %v7485_v16  ;;  %v7072_v17 = vpack.c.bf16 %v4990_v53, %v4989_v35 }
 0xcee   : > { %v7074_v13 = vpack.c.bf16 %v4995_v50, %v4993_v30  ;;  %7073 = vmatprep.subr.bf16.mxu0 %v7072_v17  ;;  %v4967_v3 = vpop.permute.xlu0 %4966 }
 0xcf0   : > { %7075 = vmatpush1.bf16.msra.mxu0 %v7074_v13 }
 0xcf2   : > { %v4971_v57 = vpop.permute.xlu0 %4970 }
 0xcf3   : > { %v4973_v16 = vsel %vm693_vm4, %v4967_v3, %v4971_v57  ;;  %v4975_v14 = vsel %vm693_vm4, %v4971_v57, %v4967_v3  ;;  %6114 = vmatmul.mubr.msk.f32.vlgmr.msra.gmra.mrb[14].mxu0 %vm2668_vm7, %v6113_v37  ;;  %v7088_v37 = vpack.c.bf16 %v8378_v47, %v7689_v49 }
 0xcf4   : > { %v4978_v22 = vmul.f32 %v4975_v14, %v7491_v19  ;;  %v4979_v42 = vmul.f32 %v4973_v16, %v7494_v20  ;;  %5140 = vmatprep.mubr.f32.mxu0 %v7284_v1  ;;  %v5246_v19 = vpop.permute.xlu1 %5245  ;;  %v7090_v16 = vpack.c.bf16 %v8372_v41, %v7677_v45 }
 0xcf5   : > { %v5249_v51 = vsel %vm973_vm10, %v5242_v23, %v5246_v19  ;;  %v5251_v2 = vsel %vm973_vm10, %v5246_v19, %v5242_v23  ;;  %v6120_v23 = vld [vmem:[%s8580_s17 + $0x20] sm:$0xff]  ;;  %v6122_v19 = vld [vmem:[%s8580_s17 + $0x28] sm:$0xff] }
 0xcf6   : > { %v7078_v43 = vpack.c.bf16 %v4978_v22, %v4976_v21  ;;  %v5150_v27 = vpop.permute.xlu0 %5149  ;;  %v7076_v28 = vpack.c.bf16 %v4979_v42, %v4977_v26  ;;  %v5253_v8 = vmul.f32 %v5251_v2, %v7482_v15  ;;  %v5254_v35 = vmul.f32 %v5249_v51, %v7494_v20 }
 0xcf7   : > { %v5419_v26 = vmul.f32 %v7701_v55, %v7514_v31  ;;  %v5689_v51 = vmul.f32 %v7717_v62, %v7514_v31 }
 0xcf8   : > { %7077 = vmatprep.subr.bf16.mxu0 %v7076_v28  ;;  %v5414_v52 = vpop.permute.xlu1 %5413 }
 0xcf9   : > { %7079 = vmatpush1.bf16.msra.mxu0 %v7078_v43 }
 0xcfa   : > { %v5154_v38 = vpop.permute.xlu0 %5153 }
 0xcfb   : > { %v5156_v39 = vsel %vm878_vm9, %v5150_v27, %v5154_v38  ;;  %v5158_v24 = vsel %vm878_vm9, %v5154_v38, %v5150_v27  ;;  %v5602_v38 = vmul.f32 %v7713_v61, %v7566_v54  ;;  %v5690_v61 = vmul.f32 %v7721_v63, %v7608_v9 }
 0xcfc   : > { %v5161_v25 = vmul.f32 %v5158_v24, %v7528_v36  ;;  %v5162_v44 = vmul.f32 %v5156_v39, %v7517_v32  ;;  %6115 = vmatmul.mubr.msk.f32.vlgmr.msra.gmra.mrb[14].mxu0 %vm2668_vm7, %v4980_v34  ;;  %v6116_v36 = vld [vmem:[%s8580_s17 + $0x10] sm:$0xff]  ;;  %v5502_v53 = vpop.permute.xlu1 %5501 }
 0xcfd   : > { %5232 = vmatprep.mubr.f32.mxu0 %v7284_v1 }
 0xcfe   : > { %v7082_v48 = vpack.c.bf16 %v5161_v25, %v5159_v40  ;;  %v5244_v59 = vpop.permute.xlu0 %5243  ;;  %v7080_v0 = vpack.c.bf16 %v5162_v44, %v5160_v18 }
 0xd00   : > { %7081 = vmatprep.subr.bf16.mxu0 %v7080_v0  ;;  %v5506_v5 = vpop.permute.xlu1 %5505 }
 0xd01   : > { %7083 = vmatpush1.bf16.msra.mxu0 %v7082_v48  ;;  %v5511_v47 = vsel %vm1241_vm13, %v5506_v5, %v5502_v53 }
 0xd02   : > { %v5248_v6 = vpop.permute.xlu0 %5247  ;;  %v5514_v45 = vmul.f32 %v5511_v47, %v7578_v58 }
 0xd03   : > { %v5250_v7 = vsel %vm973_vm10, %v5244_v59, %v5248_v6  ;;  %v5252_v4 = vsel %vm973_vm10, %v5248_v6, %v5244_v59 }
 0xd04   : > { %v5255_v29 = vmul.f32 %v5252_v4, %v7482_v15  ;;  %v5256_v30 = vmul.f32 %v5250_v7, %v7494_v20  ;;  %6117 = vmatmul.mubr.msk.f32.vlgmr.msra.gmra.mrb[14].mxu0 %vm2668_vm7, %v6116_v36  ;;  %v6118_v20 = vld [vmem:[%s8580_s17 + $0x18] sm:$0xff]  ;;  %v5596_v27 = vpop.permute.xlu1 %5595  ;;  %v5781_v4 = vld [vmem:[%s8582_s19] sm:$0x3] }
 0xd05   : > { %5326 = vmatprep.mubr.f32.mxu0 %v7284_v1 }
 0xd06   : > { %v7086_v50 = vpack.c.bf16 %v5255_v29, %v5253_v8  ;;  %v5416_v17 = vpop.permute.xlu0 %5415  ;;  %v7084_v11 = vpack.c.bf16 %v5256_v30, %v5254_v35 }
 0xd07   : > { %v5418_v13 = vsel %vm1148_vm11, %v5416_v17, %v5414_v52  ;;  %v5417_v14 = vsel %vm1148_vm11, %v5414_v52, %v5416_v17 }
 0xd08   : > { %v5422_v3 = vmul.f32 %v5418_v13, %v7517_v32  ;;  %7085 = vmatprep.subr.bf16.mxu0 %v7084_v11  ;;  %v5421_v32 = vmul.f32 %v5417_v14, %v7514_v31  ;;  %v5684_v40 = vpop.permute.xlu1 %5683 }
 0xd09   : > { %7087 = vmatpush1.bf16.msra.mxu0 %v7086_v50 }
 0xd0a   : > { %7089 = vmatprep.subr.bf16.mxu0 %v7088_v37  ;;  %v5504_v57 = vpop.permute.xlu0 %5503  ;;  %v7092_v49 = vpack.c.bf16 %v5422_v3, %v5420_v46  ;;  %v7094_v43 = vpack.c.bf16 %v5421_v32, %v5419_v26 }
 0xd0c   : > { %6119 = vmatmul.mubr.msk.f32.vlgmr.msra.gmra.mrb[14].mxu0 %vm2668_vm7, %v6118_v20  ;;  %v5775_v63 = vpop.permute.xlu1 %5774 }
 0xd0d   : > { %7091 = vmatpush1.bf16.msra.mxu0 %v7090_v16  ;;  %5404 = vmatprep.mubr.f32.mxu0 %v7284_v1 }
 0xd0e   : > { %v5508_v21 = vpop.permute.xlu0 %5507  ;;  %7093 = vmatprep.subr.bf16.mxu0 %v7092_v49 }
 0xd0f   : > { %v5512_v56 = vsel %vm1241_vm13, %v5508_v21, %v5504_v57  ;;  %v5510_v28 = vsel %vm1241_vm13, %v5504_v57, %v5508_v21 }
 0xd10   : > { %v5516_v41 = vmul.f32 %v5512_v56, %v7578_v58  ;;  %v5509_v58 = vsel %vm1241_vm13, %v5502_v53, %v5506_v5  ;;  %v5515_v55 = vmul.f32 %v5510_v28, %v7482_v15 }
 0xd11   : > { %v5513_v34 = vmul.f32 %v5509_v58, %v7482_v15 }
 0xd12   : > { %v5598_v22 = vpop.permute.xlu0 %5597  ;;  %v7096_v42 = vpack.c.bf16 %v5516_v41, %v5514_v45 }
 0xd13   : > { %v5600_v12 = vsel %vm1336_vm14, %v5598_v22, %v5596_v27  ;;  %v7098_v24 = vpack.c.bf16 %v5515_v55, %v5513_v34  ;;  %v5599_v15 = vsel %vm1336_vm14, %v5596_v27, %v5598_v22 }
 0xd14   : > { %6121 = vmatmul.mubr.msk.f32.vlgmr.msra.gmra.mrb[14].mxu0 %vm2668_vm7, %v6120_v23  ;;  %v5604_v33 = vmul.f32 %v5600_v12, %v7566_v54  ;;  %v6124_v54 = vld [vmem:[%s8580_s17 + $0x30] sm:$0xff]  ;;  %v7102_v52 = vpack.c.bf16 %v5599_v15, %v7709_v60 }
 0xd15   : > { %7095 = vmatpush1.bf16.msra.mxu0 %v7094_v43  ;;  %5492 = vmatprep.mubr.f32.mxu0 %v7284_v1 }
 0xd16   : > { %7097 = vmatprep.subr.bf16.mxu0 %v7096_v42  ;;  %v5686_v39 = vpop.permute.xlu0 %5685  ;;  %v7100_v18 = vpack.c.bf16 %v5604_v33, %v5602_v38 }
 0xd17   : > { %v5688_v25 = vsel %vm1429_vm15, %v5686_v39, %v5684_v40  ;;  %v5687_v48 = vsel %vm1429_vm15, %v5684_v40, %v5686_v39 }
 0xd18   : > { %v5692_v44 = vmul.f32 %v5688_v25, %v7608_v9  ;;  %v5691_v0 = vmul.f32 %v5687_v48, %v7514_v31  ;;  %v6126_v9 = vld [vmem:[%s8580_s17 + $0x38] sm:$0xff] }
 0xd1a   : > { %v7104_v59 = vpack.c.bf16 %v5692_v44, %v5690_v61  ;;  %v7106_v60 = vpack.c.bf16 %v5691_v0, %v5689_v51 }
 0xd1c   : > { %6123 = vmatmul.mubr.msk.f32.vlgmr.msra.gmra.mrb[14].mxu0 %vm2668_vm7, %v6122_v19 }
 0xd1d   : > { %7099 = vmatpush1.bf16.msra.mxu0 %v7098_v24  ;;  %5586 = vmatprep.mubr.f32.mxu0 %v7284_v1 }
 0xd1e   : > { %7101 = vmatprep.subr.bf16.mxu0 %v7100_v18 }
 0xd24   : > { %6125 = vmatmul.mubr.msk.f32.vlgmr.msra.gmra.mrb[14].mxu0 %vm2668_vm7, %v6124_v54 }
 0xd25   : > { %7103 = vmatpush1.bf16.msra.mxu0 %v7102_v52  ;;  %5674 = vmatprep.mubr.f32.mxu0 %v7284_v1 }
 0xd26   : > { %7105 = vmatprep.subr.bf16.mxu0 %v7104_v59 }
 0xd2c   : > { %6127 = vmatmul.mubr.msk.f32.vlgmr.msra.gmra.mrb[14].mxu0 %vm2668_vm7, %v6126_v9 }
 0xd2d   : > { %7107 = vmatpush1.bf16.msra.mxu0 %v7106_v60  ;;  %5762 = vmatprep.mubr.f32.mxu0 %v7284_v1  ;;  %v5786_v1 = vpop.permute.xlu0 %5785 }
 0xd34   : > { %6129 = vmatmul.mubr.msk.f32.vlgmr.msra.gmra.mrb[14].mxu0 %vm2668_vm7, %v6128_v10 }
 0xe07   : > { %v5764_v2 = vpop.f32.mrb[14].mxu0 }
 0xe08   : > { %v5777_v31 = vadd.f32 %v5775_v63, %v5764_v2  ;;  %v5766_v62 = vpop.f32.mrb[15].mxu0 }
 0xe09   : > { %v5778_v36 = vadd.f32 %v5775_v63, %v5766_v62 }
 0xe0a   : > { %v5779_v7 = vmax.f32 %v5777_v31, 0.0 }
 0xe0b   : > { %v5780_v6 = vmax.f32 %v5778_v36, 0.0 }
 0xe0d   : > { %5791 = vmatprep.subr.mxu1 %v5780_v6 }
 0xe0e   : > { %5792 = vmatpush1.msra.mxu1 %v5779_v7 }
 0xe0f   : > { %6130 = vmatmul.mubr.msk.f32.vlgmr.msra.gmra.mrb[16].mxu1 %vm1710_vm0, %v5781_v4 }
 0xee2   : > { %v5857_v8 = vpop.f32.mrb[16].mxu1 }
 0xee3   : > { %v5858_v35 = vadd.f32 %v5857_v8, %v5786_v1  ;;  %v5859_v53 = vpop.f32.mrb[17].mxu1 }
 0xee4   : > { %v5860_v29 = vadd.f32 %v5859_v53, %v5786_v1 }
 0xee5   : > { %v5862_v30 = vmax.f32 %v5858_v35, 0.0 }
 0xee6   : > { %v5863_v50 = vmax.f32 %v5860_v29, 0.0 }
 0xee8   : > { %v5866_v17 = vcombine.low %v5862_v30, %v5863_v50 }
 0xeea   : > { %6131 = vst.sshfl [vmem:[%s653_s27] sm:$0x33 pattern:$0x76325410] %v5866_v17 }
 0xeeb PF: > { %s8653_s6 = sld [smem:[#allocation2_spill]] }
 0xef1   : > { %s31_s2 = sadd.s32 1, %s8653_s6  }
 0xef2   : > { %p28_p4 = scmp.ge.s32.totalorder %s31_s2, 4  }
 0xef4   :  { %30 = sbr.rel (!%p28_p4) target bundleno = 9 (0x9), region = 174 }

</bundles_post_ra>
